<compile_context>
chip_gen: v7x
topology: tpu7x:2x2x1
jax: 0.10.0
libtpu: 0.0.40
codegen_flags: <defaults>
</compile_context>

<pallas_src>
import functools

import jax
import jax.numpy as jnp
from jax import lax
from jax.experimental import pallas as pl
from jax.experimental.pallas import tpu as pltpu


# ----------------------------------------------------------------------------
# Fused gInception_ST block kernel (grid = (batch, branch))
# ----------------------------------------------------------------------------
def _ginception_kernel(*refs, n_in, cins, H, W, Chid, Cout, n_branch, kmax,
                       inv_n, eps, mm_dtype):
    x_refs = refs[:n_in]
    (w1_ref, b1_ref, wb_ref, pgb_ref, mem_ref, memt_ref,
     o_ref, zpad_ref, osum_ref) = refs[n_in:]

    j = pl.program_id(1)                 # inception-branch index (reduction axis)
    HW = H * W
    pmax = kmax // 2
    Wp = W + 2 * pmax

    # ---- per-batch-item prologue: 1x1 conv + VMEM zero padding (branch 0 only)
    @pl.when(j == 0)
    def _prologue():
        # 1x1 conv with split-K over the inputs, so the decoder [z, skip]
        # concat never touches HBM.
        zacc = None
        off = 0
        for i in range(n_in):
            cin = cins[i]
            xi = x_refs[i][0].astype(mm_dtype)                       # (HW, cin)
            d = jnp.dot(xi, w1_ref[pl.ds(off, cin), :],
                        preferred_element_type=jnp.float32)
            zacc = d if zacc is None else zacc + d
            off += cin
        z = zacc + b1_ref[...]                                       # (HW, Chid) f32

        # Zero only the halo strips; the interior is fully overwritten below.
        if pmax > 0:
            zpad_ref[pl.ds(0, pmax), :, :] = jnp.zeros(
                (pmax, Wp, Chid), jnp.float32)
            zpad_ref[pl.ds(pmax + H, pmax), :, :] = jnp.zeros(
                (pmax, Wp, Chid), jnp.float32)
            zpad_ref[pl.ds(pmax, H), pl.ds(0, pmax), :] = jnp.zeros(
                (H, pmax, Chid), jnp.float32)
            zpad_ref[pl.ds(pmax, H), pl.ds(pmax + W, pmax), :] = jnp.zeros(
                (H, pmax, Chid), jnp.float32)
        zpad_ref[pl.ds(pmax, H), pl.ds(pmax, W), :] = z.reshape(H, W, Chid)

        # reset the branch-sum accumulator
        osum_ref[...] = jnp.zeros_like(osum_ref)

    # ---- branch j: accumulate k*k shifted matmuls directly (no im2col buffer)
    # TODO(synk): replace static-offset slices with pltpu.roll on a lane-dense
    # z buffer, and runtime-skip the zero taps of branches with k < kmax.
    acc = jnp.zeros((HW, Cout), jnp.float32)
    for dy in range(kmax):
        for dx in range(kmax):
            idx = dy * kmax + dx
            blk = zpad_ref[pl.ds(dy, H), pl.ds(dx, W), :]            # (H, W, Chid)
            blk = blk.reshape(HW, Chid).astype(mm_dtype)
            acc = acc + jnp.dot(blk, wb_ref[0, idx],
                                preferred_element_type=jnp.float32)

    pgb = pgb_ref[0]                          # (3, Cout): conv bias / gamma / beta
    acc = acc + pgb[0:1, :]

    # ---- GroupNorm over contiguous channel groups via a tiny (Cout, g) one-hot
    #      (two-pass, centered variance).
    s1 = jnp.sum(acc, axis=0, keepdims=True)                         # (1, Cout)
    gmean = jnp.dot(s1, mem_ref[...],
                    preferred_element_type=jnp.float32) * inv_n      # (1, g)
    mean_c = jnp.dot(gmean, memt_ref[...],
                     preferred_element_type=jnp.float32)             # (1, Cout)
    cen = acc - mean_c
    s2 = jnp.sum(cen * cen, axis=0, keepdims=True)                   # (1, Cout)
    gvar = jnp.dot(s2, mem_ref[...],
                   preferred_element_type=jnp.float32) * inv_n       # (1, g)
    inv = lax.rsqrt(jnp.maximum(gvar, 0.0) + eps)
    inv_c = jnp.dot(inv, memt_ref[...], preferred_element_type=jnp.float32)
    y = cen * (inv_c * pgb[1:2, :]) + pgb[2:3, :]
    y = jnp.where(y > 0, y, 0.2 * y)                                 # LeakyReLU(0.2)

    # ---- branch sum accumulated in f32 VMEM scratch across the branch axis
    osum_ref[...] += y

    @pl.when(j == n_branch - 1)
    def _epilogue():
        o_ref[...] = osum_ref[...].reshape(1, HW, Cout).astype(o_ref.dtype)


# ----------------------------------------------------------------------------
# pallas_call wrapper: one call per gInception block
# ----------------------------------------------------------------------------
def ginception_forward(p, xs, H, W, mm_dtype=jnp.bfloat16,
                       act_dtype=jnp.bfloat16):
    B, HW, _ = xs[0].shape
    assert HW == H * W
    cins = tuple(int(x.shape[-1]) for x in xs)
    Chid, Cout = p["Chid"], p["Cout"]
    n_branch, kmax, g = p["n_branch"], p["kmax"], p["groups"]
    pmax = kmax // 2
    Cin_tot = sum(cins)
    assert Cin_tot == p["w1"].shape[0]
    inv_n = 1.0 / float(H * W * (Cout // g))

    kernel = functools.partial(
        _ginception_kernel, n_in=len(xs), cins=cins, H=H, W=W, Chid=Chid,
        Cout=Cout, n_branch=n_branch, kmax=kmax, inv_n=inv_n, eps=1e-5,
        mm_dtype=mm_dtype)

    in_specs = (
        [pl.BlockSpec((1, HW, c), lambda b, j: (b, 0, 0)) for c in cins] + [
            pl.BlockSpec((Cin_tot, Chid), lambda b, j: (0, 0)),
            pl.BlockSpec((1, Chid), lambda b, j: (0, 0)),
            pl.BlockSpec((1, kmax * kmax, Chid, Cout),
                         lambda b, j: (j, 0, 0, 0)),      # per-branch weight tile
            pl.BlockSpec((1, 3, Cout), lambda b, j: (j, 0, 0)),
            pl.BlockSpec((Cout, g), lambda b, j: (0, 0)),
            pl.BlockSpec((g, Cout), lambda b, j: (0, 0)),
        ])

    # Explicit VMEM budget (v5e's default scoped VMEM is only 16 MiB).
    ab, mb = jnp.dtype(act_dtype).itemsize, jnp.dtype(mm_dtype).itemsize
    vmem = 2 * sum(HW * c * ab for c in cins) + 2 * HW * Cout * ab
    vmem += 2 * (kmax * kmax * Chid * Cout * mb + 3 * Cout * 4)
    vmem += Cin_tot * Chid * mb + Chid * 4 + 2 * Cout * g * 4
    vmem += (H + 2 * pmax) * (W + 2 * pmax) * Chid * 4 + HW * Cout * 4
    vmem_limit = int(min(96 * 2 ** 20, max(16 * 2 ** 20, 2 * vmem)))

    return pl.pallas_call(
        kernel,
        out_shape=jax.ShapeDtypeStruct((B, HW, Cout), act_dtype),
        grid=(B, n_branch),
        in_specs=in_specs,
        out_specs=pl.BlockSpec((1, HW, Cout), lambda b, j: (b, 0, 0)),
        scratch_shapes=[
            pltpu.VMEM((H + 2 * pmax, W + 2 * pmax, Chid), jnp.float32),
            pltpu.VMEM((HW, Cout), jnp.float32),
        ],
        # Batch stays parallel (v7x megacore); branch axis is a reduction.
        compiler_params=pltpu.CompilerParams(
            dimension_semantics=("parallel", "arbitrary"),
            vmem_limit_bytes=vmem_limit),
    )(*[x.astype(act_dtype) for x in xs],
      p["w1"].astype(mm_dtype), p["b1"], p["wb"].astype(mm_dtype),
      p["pgb"], p["member"], p["member_t"])


def midincepnet_forward(params, x, N2, mm_dtype=jnp.bfloat16,
                        act_dtype=jnp.bfloat16):
    B, T, C, H, W = x.shape
    # NCHW -> lane-dense (B, H*W, C) activations (bf16 on the perf path).
    z = jnp.transpose(x.reshape(B, T * C, H, W), (0, 2, 3, 1))
    z = z.reshape(B, H * W, T * C).astype(act_dtype)
    skips = []
    for i in range(N2):
        z = ginception_forward(params["enc"][i], [z], H, W, mm_dtype, act_dtype)
        if i < N2 - 1:
            skips.append(z)
    z = ginception_forward(params["dec"][0], [z], H, W, mm_dtype, act_dtype)
    for i in range(1, N2):
        # split-K inside the kernel: no HBM concat of [z, skip]
        z = ginception_forward(params["dec"][i], [z, skips[-i]], H, W,
                               mm_dtype, act_dtype)
    z = z.astype(jnp.float32).reshape(B, H, W, T * C)
    return jnp.transpose(z, (0, 3, 1, 2)).reshape(B, T, C, H, W)


# ----------------------------------------------------------------------------
# Deterministic parameter init (synthetic; mirrors module __init__ shapes)
# ----------------------------------------------------------------------------
def init_ginception(key, C_in, C_hid, C_out, incep_ker, groups):
    n_branch = len(incep_ker)
    kmax = max(incep_ker)
    g = groups if C_hid % groups == 0 else 1      # mirrors GroupConv2d
    assert C_out % g == 0, "GroupNorm/grouped conv require C_out % groups == 0"
    Cin_g, Cout_g = C_hid // g, C_out // g
    keys = jax.random.split(key, 2 + 4 * n_branch)

    w1 = 0.1 * jax.random.normal(keys[0], (C_in, C_hid), jnp.float32)
    b1 = 0.1 * jax.random.normal(keys[1], (1, C_hid), jnp.float32)

    wb, pgb, branch_dense = [], [], []
    for i, k in enumerate(incep_ker):
        kw, kb, kg, kbt = keys[2 + 4 * i: 6 + 4 * i]
        wg = (0.2 / k) * jax.random.normal(kw, (g, k, k, Cin_g, Cout_g),
                                           jnp.float32)
        # Block-diagonal dense grouped-conv weight (fine at toy channel counts).
        # TODO(synk): at production channel_hid, pack per-group weights densely.
        dense = jnp.zeros((k, k, C_hid, C_out), jnp.float32)
        for gi in range(g):
            dense = dense.at[:, :, gi * Cin_g:(gi + 1) * Cin_g,
                             gi * Cout_g:(gi + 1) * Cout_g].set(wg[gi])
        branch_dense.append(dense)                # used by the JAX reference
        # Embed the kxk kernel centered in the shared kmax x kmax tap window.
        off = (kmax - k) // 2
        emb = jnp.zeros((kmax, kmax, C_hid, C_out), jnp.float32)
        emb = emb.at[off:off + k, off:off + k].set(dense)
        wb.append(emb.reshape(kmax * kmax, C_hid, C_out))
        bias = 0.1 * jax.random.normal(kb, (C_out,), jnp.float32)
        gamma = 1.0 + 0.1 * jax.random.normal(kg, (C_out,), jnp.float32)
        beta = 0.1 * jax.random.normal(kbt, (C_out,), jnp.float32)
        pgb.append(jnp.stack([bias, gamma, beta], axis=0))

    wb = jnp.stack(wb, axis=0)                    # (n_branch, kmax^2, Chid, Cout)
    pgb = jnp.stack(pgb, axis=0)                  # (n_branch, 3, Cout)

    # (Cout, g) one-hot group membership (groups are contiguous channel chunks).
    Cg = C_out // g
    member = (jnp.arange(C_out)[:, None] // Cg
              == jnp.arange(g)[None, :]).astype(jnp.float32)

    return {"w1": w1, "b1": b1, "wb": wb, "pgb": pgb,
            "member": member, "member_t": member.T,
            "kmax": kmax, "n_branch": n_branch, "Cout": C_out, "Chid": C_hid,
            "groups": g, "branch_dense": branch_dense}


def init_midincepnet(key, channel_in, channel_hid, N2, incep_ker, groups):
    keys = jax.random.split(key, 2 * N2)
    enc = [init_ginception(keys[0], channel_in, channel_hid // 2, channel_hid,
                           incep_ker, groups)]
    for i in range(1, N2 - 1):
        enc.append(init_ginception(keys[i], channel_hid, channel_hid // 2,
                                   channel_hid, incep_ker, groups))
    enc.append(init_ginception(keys[N2 - 1], channel_hid, channel_hid // 2,
                               channel_hid, incep_ker, groups))
    dec = [init_ginception(keys[N2], channel_hid, channel_hid // 2, channel_hid,
                           incep_ker, groups)]
    for i in range(1, N2 - 1):
        dec.append(init_ginception(keys[N2 + i], 2 * channel_hid,
                                   channel_hid // 2, channel_hid,
                                   incep_ker, groups))
    dec.append(init_ginception(keys[2 * N2 - 1], 2 * channel_hid,
                               channel_hid // 2, channel_in, incep_ker, groups))
    return {"enc": enc, "dec": dec}


# ----------------------------------------------------------------------------
# Pure-JAX reference (correctness check only)
# ----------------------------------------------------------------------------
def _ref_ginception(p, xs):
    x = jnp.concatenate(xs, axis=-1)
    z = jnp.einsum("bhwi,io->bhwo", x, p["w1"]) + p["b1"][0]
    g, Cout, n_branch = p["groups"], p["Cout"], p["n_branch"]
    Cg = Cout // g
    y = 0.0
    for bi in range(n_branch):
        w = p["branch_dense"][bi]                 # (k, k, Chid, Cout)
        c = lax.conv_general_dilated(
            z, w, (1, 1), "SAME", dimension_numbers=("NHWC", "HWIO", "NHWC"))
        c = c + p["pgb"][bi, 0]
        B, H, W, _ = c.shape
        cg = c.reshape(B, H, W, g, Cg)
        mean = jnp.mean(cg, axis=(1, 2, 4), keepdims=True)
        var = jnp.mean((cg - mean) ** 2, axis=(1, 2, 4), keepdims=True)
        cn = (cg - mean) / jnp.sqrt(var + 1e-5)
        cn = cn.reshape(B, H, W, Cout) * p["pgb"][bi, 1] + p["pgb"][bi, 2]
        y = y + jnp.where(cn > 0, cn, 0.2 * cn)
    return y


def midincepnet_reference(params, x, N2):
    B, T, C, H, W = x.shape
    z = jnp.transpose(x.reshape(B, T * C, H, W), (0, 2, 3, 1))
    skips = []
    for i in range(N2):
        z = _ref_ginception(params["enc"][i], [z])
        if i < N2 - 1:
            skips.append(z)
    z = _ref_ginception(params["dec"][0], [z])
    for i in range(1, N2):
        z = _ref_ginception(params["dec"][i], [z, skips[-i]])
    return jnp.transpose(z, (0, 3, 1, 2)).reshape(B, T, C, H, W)


# ----------------------------------------------------------------------------
if __name__ == "__main__":
    B, T, C, H, W = 2, 4, 2, 16, 16
    channel_in = T * C       # 8
    channel_hid = 16
    N2 = 2
    incep_ker = [3, 5]
    groups = 2

    key = jax.random.PRNGKey(0)
    kx, kp = jax.random.split(key)
    x = jax.random.normal(kx, (B, T, C, H, W), jnp.float32)
    params = init_midincepnet(kp, channel_in, channel_hid, N2, incep_ker, groups)

    # Optimized path: bf16 activations + bf16 MXU operands, f32 accumulation.
    y = midincepnet_forward(params, x, N2,
                            mm_dtype=jnp.bfloat16, act_dtype=jnp.bfloat16)
    y = jax.block_until_ready(y)
    assert y.shape == (B, T, C, H, W)
    assert bool(jnp.all(jnp.isfinite(y)))

    # Exact-math path (f32 matmuls, f32 activations) vs. pure-JAX reference.
    y32 = jax.block_until_ready(
        midincepnet_forward(params, x, N2,
                            mm_dtype=jnp.float32, act_dtype=jnp.float32))
    y_ref = midincepnet_reference(params, x, N2)
    err32 = float(jnp.max(jnp.abs(y32 - y_ref)))
    assert jnp.allclose(y32, y_ref, atol=3e-3, rtol=3e-3), f"f32 err={err32}"

    # bf16 path only differs in activation/operand dtype; sanity-check deviation.
    err16 = float(jnp.max(jnp.abs(y - y32)))
    assert err16 < 0.5, f"bf16 vs f32 max_err={err16}"

    print("KERNEL_OK")
</pallas_src>

<mosaic_0001>
module attributes {stable_mosaic.version = 11 : i64} {
  func.func @_ginception_kernel(%arg0: i32, %arg1: i32, %arg2: memref<1x256x8xbf16, #tpu.memory_space<vmem>>, %arg3: memref<8x8xbf16, #tpu.memory_space<vmem>>, %arg4: memref<1x8xf32, #tpu.memory_space<vmem>>, %arg5: memref<1x25x8x16xbf16, #tpu.memory_space<vmem>>, %arg6: memref<1x3x16xf32, #tpu.memory_space<vmem>>, %arg7: memref<16x2xf32, #tpu.memory_space<vmem>>, %arg8: memref<2x16xf32, #tpu.memory_space<vmem>>, %arg9: memref<1x256x16xbf16, #tpu.memory_space<vmem>>, %arg10: memref<20x20x8xf32, #tpu.memory_space<vmem>>, %arg11: memref<256x16xf32, #tpu.memory_space<vmem>>) attributes {dimension_semantics = [#tpu.dimension_semantics<parallel>, #tpu.dimension_semantics<arbitrary>], iteration_bounds = array<i64: 2, 2>, scalar_prefetch = 0 : i64, scratch_operands = 2 : i64, tpu.core_type = #tpu.core_type<tc>, window_params = [{transform_indices = @transform_0, window_bounds = array<i64: 1, 256, 8>}, {pipeline_mode = #tpu.pipeline_mode<synchronous>, transform_indices = @transform_1, window_bounds = array<i64: 8, 8>}, {pipeline_mode = #tpu.pipeline_mode<synchronous>, transform_indices = @transform_2, window_bounds = array<i64: 1, 8>}, {transform_indices = @transform_3, window_bounds = array<i64: 1, 25, 8, 16>}, {transform_indices = @transform_4, window_bounds = array<i64: 1, 3, 16>}, {pipeline_mode = #tpu.pipeline_mode<synchronous>, transform_indices = @transform_5, window_bounds = array<i64: 16, 2>}, {pipeline_mode = #tpu.pipeline_mode<synchronous>, transform_indices = @transform_6, window_bounds = array<i64: 2, 16>}, {transform_indices = @transform_7, window_bounds = array<i64: 1, 256, 16>}]} {
    %c0_i32 = arith.constant 0 : i32
    %0 = arith.cmpi eq, %arg1, %c0_i32 : i32
    %1 = arith.extui %0 : i1 to i32
    %c0_i32_0 = arith.constant 0 : i32
    %2 = arith.cmpi ne, %1, %c0_i32_0 : i32
    scf.if %2 {
      %c0_204 = arith.constant 0 : index
      %c0_205 = arith.constant 0 : index
      %c0_206 = arith.constant 0 : index
      %226 = vector.load %arg2[%c0_204, %c0_205, %c0_206] : memref<1x256x8xbf16, #tpu.memory_space<vmem>>, vector<1x256x8xbf16>
      %227 = vector.shape_cast %226 : vector<1x256x8xbf16> to vector<256x8xbf16>
      %c0_207 = arith.constant 0 : index
      %c0_208 = arith.constant 0 : index
      %228 = vector.load %arg3[%c0_207, %c0_208] : memref<8x8xbf16, #tpu.memory_space<vmem>>, vector<8x8xbf16>
      %cst_209 = arith.constant dense<0.000000e+00> : vector<256x8xf32>
      %229 = tpu.matmul %227, %228, %cst_209 {dimension_numbers = #tpu.dot_dimension_numbers<[1], [0], [0], [1], [0, 0, 1, 1], [], []>} : vector<256x8xbf16>, vector<8x8xbf16>, vector<256x8xf32> -> vector<256x8xf32>
      %c0_210 = arith.constant 0 : index
      %c0_211 = arith.constant 0 : index
      %230 = vector.load %arg4[%c0_210, %c0_211] : memref<1x8xf32, #tpu.memory_space<vmem>>, vector<1x8xf32>
      %231 = vector.broadcast %230 : vector<1x8xf32> to vector<256x8xf32>
      %232 = arith.addf %229, %231 : vector<256x8xf32>
      %cst_212 = arith.constant 0.000000e+00 : f32
      %233 = vector.broadcast %cst_212 : f32 to vector<2x20x8xf32>
      %c0_213 = arith.constant 0 : index
      %c0_214 = arith.constant 0 : index
      %c0_215 = arith.constant 0 : index
      %234 = vector.load %arg10[%c0_213, %c0_214, %c0_215] : memref<20x20x8xf32, #tpu.memory_space<vmem>>, vector<2x20x8xf32>
      tpu.vector_store %arg10[%c0_213, %c0_214, %c0_215], %233 {strides = array<i32>} : memref<20x20x8xf32, #tpu.memory_space<vmem>>, vector<2x20x8xf32>,
      %cst_216 = arith.constant 0.000000e+00 : f32
      %235 = vector.broadcast %cst_216 : f32 to vector<2x20x8xf32>
      %c18_217 = arith.constant 18 : index
      %c0_218 = arith.constant 0 : index
      %c0_219 = arith.constant 0 : index
      %236 = vector.load %arg10[%c18_217, %c0_218, %c0_219] : memref<20x20x8xf32, #tpu.memory_space<vmem>>, vector<2x20x8xf32>
      tpu.vector_store %arg10[%c18_217, %c0_218, %c0_219], %235 {strides = array<i32>} : memref<20x20x8xf32, #tpu.memory_space<vmem>>, vector<2x20x8xf32>,
      %cst_220 = arith.constant 0.000000e+00 : f32
      %237 = vector.broadcast %cst_220 : f32 to vector<16x2x8xf32>
      %c2_221 = arith.constant 2 : index
      %c0_222 = arith.constant 0 : index
      %c0_223 = arith.constant 0 : index
      %238 = vector.load %arg10[%c2_221, %c0_222, %c0_223] : memref<20x20x8xf32, #tpu.memory_space<vmem>>, vector<16x2x8xf32>
      tpu.vector_store %arg10[%c2_221, %c0_222, %c0_223], %237 {strides = array<i32>} : memref<20x20x8xf32, #tpu.memory_space<vmem>>, vector<16x2x8xf32>,
      %cst_224 = arith.constant 0.000000e+00 : f32
      %239 = vector.broadcast %cst_224 : f32 to vector<16x2x8xf32>
      %c2_225 = arith.constant 2 : index
      %c18_226 = arith.constant 18 : index
      %c0_227 = arith.constant 0 : index
      %240 = vector.load %arg10[%c2_225, %c18_226, %c0_227] : memref<20x20x8xf32, #tpu.memory_space<vmem>>, vector<16x2x8xf32>
      tpu.vector_store %arg10[%c2_225, %c18_226, %c0_227], %239 {strides = array<i32>} : memref<20x20x8xf32, #tpu.memory_space<vmem>>, vector<16x2x8xf32>,
      %241 = vector.shape_cast %232 : vector<256x8xf32> to vector<16x16x8xf32>
      %c2_228 = arith.constant 2 : index
      %c2_229 = arith.constant 2 : index
      %c0_230 = arith.constant 0 : index
      %242 = vector.load %arg10[%c2_228, %c2_229, %c0_230] : memref<20x20x8xf32, #tpu.memory_space<vmem>>, vector<16x16x8xf32>
      tpu.vector_store %arg10[%c2_228, %c2_229, %c0_230], %241 {strides = array<i32>} : memref<20x20x8xf32, #tpu.memory_space<vmem>>, vector<16x16x8xf32>,
      %cst_231 = arith.constant 0.000000e+00 : f32
      %243 = vector.broadcast %cst_231 : f32 to vector<256x16xf32>
      %c0_232 = arith.constant 0 : index
      %c0_233 = arith.constant 0 : index
      %244 = vector.load %arg11[%c0_232, %c0_233] : memref<256x16xf32, #tpu.memory_space<vmem>>, vector<256x16xf32>
      tpu.vector_store %arg11[%c0_232, %c0_233], %243 {strides = array<i32>} : memref<256x16xf32, #tpu.memory_space<vmem>>, vector<256x16xf32>,
    } else {
    }
    %cst = arith.constant 0.000000e+00 : f32
    %3 = vector.broadcast %cst : f32 to vector<256x16xf32>
    %c0 = arith.constant 0 : index
    %c0_1 = arith.constant 0 : index
    %c0_2 = arith.constant 0 : index
    %4 = vector.load %arg10[%c0, %c0_1, %c0_2] : memref<20x20x8xf32, #tpu.memory_space<vmem>>, vector<16x16x8xf32>
    %5 = vector.shape_cast %4 : vector<16x16x8xf32> to vector<256x8xf32>
    %6 = arith.truncf %5 : vector<256x8xf32> to vector<256x8xbf16>
    %c0_3 = arith.constant 0 : index
    %c0_4 = arith.constant 0 : index
    %c0_5 = arith.constant 0 : index
    %c0_6 = arith.constant 0 : index
    %7 = vector.load %arg5[%c0_3, %c0_4, %c0_5, %c0_6] : memref<1x25x8x16xbf16, #tpu.memory_space<vmem>>, vector<1x1x8x16xbf16>
    %8 = vector.shape_cast %7 : vector<1x1x8x16xbf16> to vector<8x16xbf16>
    %cst_7 = arith.constant dense<0.000000e+00> : vector<256x16xf32>
    %9 = tpu.matmul %6, %8, %cst_7 {dimension_numbers = #tpu.dot_dimension_numbers<[1], [0], [0], [1], [0, 0, 1, 1], [], []>} : vector<256x8xbf16>, vector<8x16xbf16>, vector<256x16xf32> -> vector<256x16xf32>
    %10 = arith.addf %3, %9 : vector<256x16xf32>
    %c0_8 = arith.constant 0 : index
    %c1 = arith.constant 1 : index
    %c0_9 = arith.constant 0 : index
    %11 = vector.load %arg10[%c0_8, %c1, %c0_9] : memref<20x20x8xf32, #tpu.memory_space<vmem>>, vector<16x16x8xf32>
    %12 = vector.shape_cast %11 : vector<16x16x8xf32> to vector<256x8xf32>
    %13 = arith.truncf %12 : vector<256x8xf32> to vector<256x8xbf16>
    %c0_10 = arith.constant 0 : index
    %c1_11 = arith.constant 1 : index
    %c0_12 = arith.constant 0 : index
    %c0_13 = arith.constant 0 : index
    %14 = vector.load %arg5[%c0_10, %c1_11, %c0_12, %c0_13] : memref<1x25x8x16xbf16, #tpu.memory_space<vmem>>, vector<1x1x8x16xbf16>
    %15 = vector.shape_cast %14 : vector<1x1x8x16xbf16> to vector<8x16xbf16>
    %cst_14 = arith.constant dense<0.000000e+00> : vector<256x16xf32>
    %16 = tpu.matmul %13, %15, %cst_14 {dimension_numbers = #tpu.dot_dimension_numbers<[1], [0], [0], [1], [0, 0, 1, 1], [], []>} : vector<256x8xbf16>, vector<8x16xbf16>, vector<256x16xf32> -> vector<256x16xf32>
    %17 = arith.addf %10, %16 : vector<256x16xf32>
    %c0_15 = arith.constant 0 : index
    %c2 = arith.constant 2 : index
    %c0_16 = arith.constant 0 : index
    %18 = vector.load %arg10[%c0_15, %c2, %c0_16] : memref<20x20x8xf32, #tpu.memory_space<vmem>>, vector<16x16x8xf32>
    %19 = vector.shape_cast %18 : vector<16x16x8xf32> to vector<256x8xf32>
    %20 = arith.truncf %19 : vector<256x8xf32> to vector<256x8xbf16>
    %c0_17 = arith.constant 0 : index
    %c2_18 = arith.constant 2 : index
    %c0_19 = arith.constant 0 : index
    %c0_20 = arith.constant 0 : index
    %21 = vector.load %arg5[%c0_17, %c2_18, %c0_19, %c0_20] : memref<1x25x8x16xbf16, #tpu.memory_space<vmem>>, vector<1x1x8x16xbf16>
    %22 = vector.shape_cast %21 : vector<1x1x8x16xbf16> to vector<8x16xbf16>
    %cst_21 = arith.constant dense<0.000000e+00> : vector<256x16xf32>
    %23 = tpu.matmul %20, %22, %cst_21 {dimension_numbers = #tpu.dot_dimension_numbers<[1], [0], [0], [1], [0, 0, 1, 1], [], []>} : vector<256x8xbf16>, vector<8x16xbf16>, vector<256x16xf32> -> vector<256x16xf32>
    %24 = arith.addf %17, %23 : vector<256x16xf32>
    %c0_22 = arith.constant 0 : index
    %c3 = arith.constant 3 : index
    %c0_23 = arith.constant 0 : index
    %25 = vector.load %arg10[%c0_22, %c3, %c0_23] : memref<20x20x8xf32, #tpu.memory_space<vmem>>, vector<16x16x8xf32>
    %26 = vector.shape_cast %25 : vector<16x16x8xf32> to vector<256x8xf32>
    %27 = arith.truncf %26 : vector<256x8xf32> to vector<256x8xbf16>
    %c0_24 = arith.constant 0 : index
    %c3_25 = arith.constant 3 : index
    %c0_26 = arith.constant 0 : index
    %c0_27 = arith.constant 0 : index
    %28 = vector.load %arg5[%c0_24, %c3_25, %c0_26, %c0_27] : memref<1x25x8x16xbf16, #tpu.memory_space<vmem>>, vector<1x1x8x16xbf16>
    %29 = vector.shape_cast %28 : vector<1x1x8x16xbf16> to vector<8x16xbf16>
    %cst_28 = arith.constant dense<0.000000e+00> : vector<256x16xf32>
    %30 = tpu.matmul %27, %29, %cst_28 {dimension_numbers = #tpu.dot_dimension_numbers<[1], [0], [0], [1], [0, 0, 1, 1], [], []>} : vector<256x8xbf16>, vector<8x16xbf16>, vector<256x16xf32> -> vector<256x16xf32>
    %31 = arith.addf %24, %30 : vector<256x16xf32>
    %c0_29 = arith.constant 0 : index
    %c4 = arith.constant 4 : index
    %c0_30 = arith.constant 0 : index
    %32 = vector.load %arg10[%c0_29, %c4, %c0_30] : memref<20x20x8xf32, #tpu.memory_space<vmem>>, vector<16x16x8xf32>
    %33 = vector.shape_cast %32 : vector<16x16x8xf32> to vector<256x8xf32>
    %34 = arith.truncf %33 : vector<256x8xf32> to vector<256x8xbf16>
    %c0_31 = arith.constant 0 : index
    %c4_32 = arith.constant 4 : index
    %c0_33 = arith.constant 0 : index
    %c0_34 = arith.constant 0 : index
    %35 = vector.load %arg5[%c0_31, %c4_32, %c0_33, %c0_34] : memref<1x25x8x16xbf16, #tpu.memory_space<vmem>>, vector<1x1x8x16xbf16>
    %36 = vector.shape_cast %35 : vector<1x1x8x16xbf16> to vector<8x16xbf16>
    %cst_35 = arith.constant dense<0.000000e+00> : vector<256x16xf32>
    %37 = tpu.matmul %34, %36, %cst_35 {dimension_numbers = #tpu.dot_dimension_numbers<[1], [0], [0], [1], [0, 0, 1, 1], [], []>} : vector<256x8xbf16>, vector<8x16xbf16>, vector<256x16xf32> -> vector<256x16xf32>
    %38 = arith.addf %31, %37 : vector<256x16xf32>
    %c1_36 = arith.constant 1 : index
    %c0_37 = arith.constant 0 : index
    %c0_38 = arith.constant 0 : index
    %39 = vector.load %arg10[%c1_36, %c0_37, %c0_38] : memref<20x20x8xf32, #tpu.memory_space<vmem>>, vector<16x16x8xf32>
    %40 = vector.shape_cast %39 : vector<16x16x8xf32> to vector<256x8xf32>
    %41 = arith.truncf %40 : vector<256x8xf32> to vector<256x8xbf16>
    %c0_39 = arith.constant 0 : index
    %c5 = arith.constant 5 : index
    %c0_40 = arith.constant 0 : index
    %c0_41 = arith.constant 0 : index
    %42 = vector.load %arg5[%c0_39, %c5, %c0_40, %c0_41] : memref<1x25x8x16xbf16, #tpu.memory_space<vmem>>, vector<1x1x8x16xbf16>
    %43 = vector.shape_cast %42 : vector<1x1x8x16xbf16> to vector<8x16xbf16>
    %cst_42 = arith.constant dense<0.000000e+00> : vector<256x16xf32>
    %44 = tpu.matmul %41, %43, %cst_42 {dimension_numbers = #tpu.dot_dimension_numbers<[1], [0], [0], [1], [0, 0, 1, 1], [], []>} : vector<256x8xbf16>, vector<8x16xbf16>, vector<256x16xf32> -> vector<256x16xf32>
    %45 = arith.addf %38, %44 : vector<256x16xf32>
    %c1_43 = arith.constant 1 : index
    %c1_44 = arith.constant 1 : index
    %c0_45 = arith.constant 0 : index
    %46 = vector.load %arg10[%c1_43, %c1_44, %c0_45] : memref<20x20x8xf32, #tpu.memory_space<vmem>>, vector<16x16x8xf32>
    %47 = vector.shape_cast %46 : vector<16x16x8xf32> to vector<256x8xf32>
    %48 = arith.truncf %47 : vector<256x8xf32> to vector<256x8xbf16>
    %c0_46 = arith.constant 0 : index
    %c6 = arith.constant 6 : index
    %c0_47 = arith.constant 0 : index
    %c0_48 = arith.constant 0 : index
    %49 = vector.load %arg5[%c0_46, %c6, %c0_47, %c0_48] : memref<1x25x8x16xbf16, #tpu.memory_space<vmem>>, vector<1x1x8x16xbf16>
    %50 = vector.shape_cast %49 : vector<1x1x8x16xbf16> to vector<8x16xbf16>
    %cst_49 = arith.constant dense<0.000000e+00> : vector<256x16xf32>
    %51 = tpu.matmul %48, %50, %cst_49 {dimension_numbers = #tpu.dot_dimension_numbers<[1], [0], [0], [1], [0, 0, 1, 1], [], []>} : vector<256x8xbf16>, vector<8x16xbf16>, vector<256x16xf32> -> vector<256x16xf32>
    %52 = arith.addf %45, %51 : vector<256x16xf32>
    %c1_50 = arith.constant 1 : index
    %c2_51 = arith.constant 2 : index
    %c0_52 = arith.constant 0 : index
    %53 = vector.load %arg10[%c1_50, %c2_51, %c0_52] : memref<20x20x8xf32, #tpu.memory_space<vmem>>, vector<16x16x8xf32>
    %54 = vector.shape_cast %53 : vector<16x16x8xf32> to vector<256x8xf32>
    %55 = arith.truncf %54 : vector<256x8xf32> to vector<256x8xbf16>
    %c0_53 = arith.constant 0 : index
    %c7 = arith.constant 7 : index
    %c0_54 = arith.constant 0 : index
    %c0_55 = arith.constant 0 : index
    %56 = vector.load %arg5[%c0_53, %c7, %c0_54, %c0_55] : memref<1x25x8x16xbf16, #tpu.memory_space<vmem>>, vector<1x1x8x16xbf16>
    %57 = vector.shape_cast %56 : vector<1x1x8x16xbf16> to vector<8x16xbf16>
    %cst_56 = arith.constant dense<0.000000e+00> : vector<256x16xf32>
    %58 = tpu.matmul %55, %57, %cst_56 {dimension_numbers = #tpu.dot_dimension_numbers<[1], [0], [0], [1], [0, 0, 1, 1], [], []>} : vector<256x8xbf16>, vector<8x16xbf16>, vector<256x16xf32> -> vector<256x16xf32>
    %59 = arith.addf %52, %58 : vector<256x16xf32>
    %c1_57 = arith.constant 1 : index
    %c3_58 = arith.constant 3 : index
    %c0_59 = arith.constant 0 : index
    %60 = vector.load %arg10[%c1_57, %c3_58, %c0_59] : memref<20x20x8xf32, #tpu.memory_space<vmem>>, vector<16x16x8xf32>
    %61 = vector.shape_cast %60 : vector<16x16x8xf32> to vector<256x8xf32>
    %62 = arith.truncf %61 : vector<256x8xf32> to vector<256x8xbf16>
    %c0_60 = arith.constant 0 : index
    %c8 = arith.constant 8 : index
    %c0_61 = arith.constant 0 : index
    %c0_62 = arith.constant 0 : index
    %63 = vector.load %arg5[%c0_60, %c8, %c0_61, %c0_62] : memref<1x25x8x16xbf16, #tpu.memory_space<vmem>>, vector<1x1x8x16xbf16>
    %64 = vector.shape_cast %63 : vector<1x1x8x16xbf16> to vector<8x16xbf16>
    %cst_63 = arith.constant dense<0.000000e+00> : vector<256x16xf32>
    %65 = tpu.matmul %62, %64, %cst_63 {dimension_numbers = #tpu.dot_dimension_numbers<[1], [0], [0], [1], [0, 0, 1, 1], [], []>} : vector<256x8xbf16>, vector<8x16xbf16>, vector<256x16xf32> -> vector<256x16xf32>
    %66 = arith.addf %59, %65 : vector<256x16xf32>
    %c1_64 = arith.constant 1 : index
    %c4_65 = arith.constant 4 : index
    %c0_66 = arith.constant 0 : index
    %67 = vector.load %arg10[%c1_64, %c4_65, %c0_66] : memref<20x20x8xf32, #tpu.memory_space<vmem>>, vector<16x16x8xf32>
    %68 = vector.shape_cast %67 : vector<16x16x8xf32> to vector<256x8xf32>
    %69 = arith.truncf %68 : vector<256x8xf32> to vector<256x8xbf16>
    %c0_67 = arith.constant 0 : index
    %c9 = arith.constant 9 : index
    %c0_68 = arith.constant 0 : index
    %c0_69 = arith.constant 0 : index
    %70 = vector.load %arg5[%c0_67, %c9, %c0_68, %c0_69] : memref<1x25x8x16xbf16, #tpu.memory_space<vmem>>, vector<1x1x8x16xbf16>
    %71 = vector.shape_cast %70 : vector<1x1x8x16xbf16> to vector<8x16xbf16>
    %cst_70 = arith.constant dense<0.000000e+00> : vector<256x16xf32>
    %72 = tpu.matmul %69, %71, %cst_70 {dimension_numbers = #tpu.dot_dimension_numbers<[1], [0], [0], [1], [0, 0, 1, 1], [], []>} : vector<256x8xbf16>, vector<8x16xbf16>, vector<256x16xf32> -> vector<256x16xf32>
    %73 = arith.addf %66, %72 : vector<256x16xf32>
    %c2_71 = arith.constant 2 : index
    %c0_72 = arith.constant 0 : index
    %c0_73 = arith.constant 0 : index
    %74 = vector.load %arg10[%c2_71, %c0_72, %c0_73] : memref<20x20x8xf32, #tpu.memory_space<vmem>>, vector<16x16x8xf32>
    %75 = vector.shape_cast %74 : vector<16x16x8xf32> to vector<256x8xf32>
    %76 = arith.truncf %75 : vector<256x8xf32> to vector<256x8xbf16>
    %c0_74 = arith.constant 0 : index
    %c10 = arith.constant 10 : index
    %c0_75 = arith.constant 0 : index
    %c0_76 = arith.constant 0 : index
    %77 = vector.load %arg5[%c0_74, %c10, %c0_75, %c0_76] : memref<1x25x8x16xbf16, #tpu.memory_space<vmem>>, vector<1x1x8x16xbf16>
    %78 = vector.shape_cast %77 : vector<1x1x8x16xbf16> to vector<8x16xbf16>
    %cst_77 = arith.constant dense<0.000000e+00> : vector<256x16xf32>
    %79 = tpu.matmul %76, %78, %cst_77 {dimension_numbers = #tpu.dot_dimension_numbers<[1], [0], [0], [1], [0, 0, 1, 1], [], []>} : vector<256x8xbf16>, vector<8x16xbf16>, vector<256x16xf32> -> vector<256x16xf32>
    %80 = arith.addf %73, %79 : vector<256x16xf32>
    %c2_78 = arith.constant 2 : index
    %c1_79 = arith.constant 1 : index
    %c0_80 = arith.constant 0 : index
    %81 = vector.load %arg10[%c2_78, %c1_79, %c0_80] : memref<20x20x8xf32, #tpu.memory_space<vmem>>, vector<16x16x8xf32>
    %82 = vector.shape_cast %81 : vector<16x16x8xf32> to vector<256x8xf32>
    %83 = arith.truncf %82 : vector<256x8xf32> to vector<256x8xbf16>
    %c0_81 = arith.constant 0 : index
    %c11 = arith.constant 11 : index
    %c0_82 = arith.constant 0 : index
    %c0_83 = arith.constant 0 : index
    %84 = vector.load %arg5[%c0_81, %c11, %c0_82, %c0_83] : memref<1x25x8x16xbf16, #tpu.memory_space<vmem>>, vector<1x1x8x16xbf16>
    %85 = vector.shape_cast %84 : vector<1x1x8x16xbf16> to vector<8x16xbf16>
    %cst_84 = arith.constant dense<0.000000e+00> : vector<256x16xf32>
    %86 = tpu.matmul %83, %85, %cst_84 {dimension_numbers = #tpu.dot_dimension_numbers<[1], [0], [0], [1], [0, 0, 1, 1], [], []>} : vector<256x8xbf16>, vector<8x16xbf16>, vector<256x16xf32> -> vector<256x16xf32>
    %87 = arith.addf %80, %86 : vector<256x16xf32>
    %c2_85 = arith.constant 2 : index
    %c2_86 = arith.constant 2 : index
    %c0_87 = arith.constant 0 : index
    %88 = vector.load %arg10[%c2_85, %c2_86, %c0_87] : memref<20x20x8xf32, #tpu.memory_space<vmem>>, vector<16x16x8xf32>
    %89 = vector.shape_cast %88 : vector<16x16x8xf32> to vector<256x8xf32>
    %90 = arith.truncf %89 : vector<256x8xf32> to vector<256x8xbf16>
    %c0_88 = arith.constant 0 : index
    %c12 = arith.constant 12 : index
    %c0_89 = arith.constant 0 : index
    %c0_90 = arith.constant 0 : index
    %91 = vector.load %arg5[%c0_88, %c12, %c0_89, %c0_90] : memref<1x25x8x16xbf16, #tpu.memory_space<vmem>>, vector<1x1x8x16xbf16>
    %92 = vector.shape_cast %91 : vector<1x1x8x16xbf16> to vector<8x16xbf16>
    %cst_91 = arith.constant dense<0.000000e+00> : vector<256x16xf32>
    %93 = tpu.matmul %90, %92, %cst_91 {dimension_numbers = #tpu.dot_dimension_numbers<[1], [0], [0], [1], [0, 0, 1, 1], [], []>} : vector<256x8xbf16>, vector<8x16xbf16>, vector<256x16xf32> -> vector<256x16xf32>
    %94 = arith.addf %87, %93 : vector<256x16xf32>
    %c2_92 = arith.constant 2 : index
    %c3_93 = arith.constant 3 : index
    %c0_94 = arith.constant 0 : index
    %95 = vector.load %arg10[%c2_92, %c3_93, %c0_94] : memref<20x20x8xf32, #tpu.memory_space<vmem>>, vector<16x16x8xf32>
    %96 = vector.shape_cast %95 : vector<16x16x8xf32> to vector<256x8xf32>
    %97 = arith.truncf %96 : vector<256x8xf32> to vector<256x8xbf16>
    %c0_95 = arith.constant 0 : index
    %c13 = arith.constant 13 : index
    %c0_96 = arith.constant 0 : index
    %c0_97 = arith.constant 0 : index
    %98 = vector.load %arg5[%c0_95, %c13, %c0_96, %c0_97] : memref<1x25x8x16xbf16, #tpu.memory_space<vmem>>, vector<1x1x8x16xbf16>
    %99 = vector.shape_cast %98 : vector<1x1x8x16xbf16> to vector<8x16xbf16>
    %cst_98 = arith.constant dense<0.000000e+00> : vector<256x16xf32>
    %100 = tpu.matmul %97, %99, %cst_98 {dimension_numbers = #tpu.dot_dimension_numbers<[1], [0], [0], [1], [0, 0, 1, 1], [], []>} : vector<256x8xbf16>, vector<8x16xbf16>, vector<256x16xf32> -> vector<256x16xf32>
    %101 = arith.addf %94, %100 : vector<256x16xf32>
    %c2_99 = arith.constant 2 : index
    %c4_100 = arith.constant 4 : index
    %c0_101 = arith.constant 0 : index
    %102 = vector.load %arg10[%c2_99, %c4_100, %c0_101] : memref<20x20x8xf32, #tpu.memory_space<vmem>>, vector<16x16x8xf32>
    %103 = vector.shape_cast %102 : vector<16x16x8xf32> to vector<256x8xf32>
    %104 = arith.truncf %103 : vector<256x8xf32> to vector<256x8xbf16>
    %c0_102 = arith.constant 0 : index
    %c14 = arith.constant 14 : index
    %c0_103 = arith.constant 0 : index
    %c0_104 = arith.constant 0 : index
    %105 = vector.load %arg5[%c0_102, %c14, %c0_103, %c0_104] : memref<1x25x8x16xbf16, #tpu.memory_space<vmem>>, vector<1x1x8x16xbf16>
    %106 = vector.shape_cast %105 : vector<1x1x8x16xbf16> to vector<8x16xbf16>
    %cst_105 = arith.constant dense<0.000000e+00> : vector<256x16xf32>
    %107 = tpu.matmul %104, %106, %cst_105 {dimension_numbers = #tpu.dot_dimension_numbers<[1], [0], [0], [1], [0, 0, 1, 1], [], []>} : vector<256x8xbf16>, vector<8x16xbf16>, vector<256x16xf32> -> vector<256x16xf32>
    %108 = arith.addf %101, %107 : vector<256x16xf32>
    %c3_106 = arith.constant 3 : index
    %c0_107 = arith.constant 0 : index
    %c0_108 = arith.constant 0 : index
    %109 = vector.load %arg10[%c3_106, %c0_107, %c0_108] : memref<20x20x8xf32, #tpu.memory_space<vmem>>, vector<16x16x8xf32>
    %110 = vector.shape_cast %109 : vector<16x16x8xf32> to vector<256x8xf32>
    %111 = arith.truncf %110 : vector<256x8xf32> to vector<256x8xbf16>
    %c0_109 = arith.constant 0 : index
    %c15 = arith.constant 15 : index
    %c0_110 = arith.constant 0 : index
    %c0_111 = arith.constant 0 : index
    %112 = vector.load %arg5[%c0_109, %c15, %c0_110, %c0_111] : memref<1x25x8x16xbf16, #tpu.memory_space<vmem>>, vector<1x1x8x16xbf16>
    %113 = vector.shape_cast %112 : vector<1x1x8x16xbf16> to vector<8x16xbf16>
    %cst_112 = arith.constant dense<0.000000e+00> : vector<256x16xf32>
    %114 = tpu.matmul %111, %113, %cst_112 {dimension_numbers = #tpu.dot_dimension_numbers<[1], [0], [0], [1], [0, 0, 1, 1], [], []>} : vector<256x8xbf16>, vector<8x16xbf16>, vector<256x16xf32> -> vector<256x16xf32>
    %115 = arith.addf %108, %114 : vector<256x16xf32>
    %c3_113 = arith.constant 3 : index
    %c1_114 = arith.constant 1 : index
    %c0_115 = arith.constant 0 : index
    %116 = vector.load %arg10[%c3_113, %c1_114, %c0_115] : memref<20x20x8xf32, #tpu.memory_space<vmem>>, vector<16x16x8xf32>
    %117 = vector.shape_cast %116 : vector<16x16x8xf32> to vector<256x8xf32>
    %118 = arith.truncf %117 : vector<256x8xf32> to vector<256x8xbf16>
    %c0_116 = arith.constant 0 : index
    %c16 = arith.constant 16 : index
    %c0_117 = arith.constant 0 : index
    %c0_118 = arith.constant 0 : index
    %119 = vector.load %arg5[%c0_116, %c16, %c0_117, %c0_118] : memref<1x25x8x16xbf16, #tpu.memory_space<vmem>>, vector<1x1x8x16xbf16>
    %120 = vector.shape_cast %119 : vector<1x1x8x16xbf16> to vector<8x16xbf16>
    %cst_119 = arith.constant dense<0.000000e+00> : vector<256x16xf32>
    %121 = tpu.matmul %118, %120, %cst_119 {dimension_numbers = #tpu.dot_dimension_numbers<[1], [0], [0], [1], [0, 0, 1, 1], [], []>} : vector<256x8xbf16>, vector<8x16xbf16>, vector<256x16xf32> -> vector<256x16xf32>
    %122 = arith.addf %115, %121 : vector<256x16xf32>
    %c3_120 = arith.constant 3 : index
    %c2_121 = arith.constant 2 : index
    %c0_122 = arith.constant 0 : index
    %123 = vector.load %arg10[%c3_120, %c2_121, %c0_122] : memref<20x20x8xf32, #tpu.memory_space<vmem>>, vector<16x16x8xf32>
    %124 = vector.shape_cast %123 : vector<16x16x8xf32> to vector<256x8xf32>
    %125 = arith.truncf %124 : vector<256x8xf32> to vector<256x8xbf16>
    %c0_123 = arith.constant 0 : index
    %c17 = arith.constant 17 : index
    %c0_124 = arith.constant 0 : index
    %c0_125 = arith.constant 0 : index
    %126 = vector.load %arg5[%c0_123, %c17, %c0_124, %c0_125] : memref<1x25x8x16xbf16, #tpu.memory_space<vmem>>, vector<1x1x8x16xbf16>
    %127 = vector.shape_cast %126 : vector<1x1x8x16xbf16> to vector<8x16xbf16>
    %cst_126 = arith.constant dense<0.000000e+00> : vector<256x16xf32>
    %128 = tpu.matmul %125, %127, %cst_126 {dimension_numbers = #tpu.dot_dimension_numbers<[1], [0], [0], [1], [0, 0, 1, 1], [], []>} : vector<256x8xbf16>, vector<8x16xbf16>, vector<256x16xf32> -> vector<256x16xf32>
    %129 = arith.addf %122, %128 : vector<256x16xf32>
    %c3_127 = arith.constant 3 : index
    %c3_128 = arith.constant 3 : index
    %c0_129 = arith.constant 0 : index
    %130 = vector.load %arg10[%c3_127, %c3_128, %c0_129] : memref<20x20x8xf32, #tpu.memory_space<vmem>>, vector<16x16x8xf32>
    %131 = vector.shape_cast %130 : vector<16x16x8xf32> to vector<256x8xf32>
    %132 = arith.truncf %131 : vector<256x8xf32> to vector<256x8xbf16>
    %c0_130 = arith.constant 0 : index
    %c18 = arith.constant 18 : index
    %c0_131 = arith.constant 0 : index
    %c0_132 = arith.constant 0 : index
    %133 = vector.load %arg5[%c0_130, %c18, %c0_131, %c0_132] : memref<1x25x8x16xbf16, #tpu.memory_space<vmem>>, vector<1x1x8x16xbf16>
    %134 = vector.shape_cast %133 : vector<1x1x8x16xbf16> to vector<8x16xbf16>
    %cst_133 = arith.constant dense<0.000000e+00> : vector<256x16xf32>
    %135 = tpu.matmul %132, %134, %cst_133 {dimension_numbers = #tpu.dot_dimension_numbers<[1], [0], [0], [1], [0, 0, 1, 1], [], []>} : vector<256x8xbf16>, vector<8x16xbf16>, vector<256x16xf32> -> vector<256x16xf32>
    %136 = arith.addf %129, %135 : vector<256x16xf32>
    %c3_134 = arith.constant 3 : index
    %c4_135 = arith.constant 4 : index
    %c0_136 = arith.constant 0 : index
    %137 = vector.load %arg10[%c3_134, %c4_135, %c0_136] : memref<20x20x8xf32, #tpu.memory_space<vmem>>, vector<16x16x8xf32>
    %138 = vector.shape_cast %137 : vector<16x16x8xf32> to vector<256x8xf32>
    %139 = arith.truncf %138 : vector<256x8xf32> to vector<256x8xbf16>
    %c0_137 = arith.constant 0 : index
    %c19 = arith.constant 19 : index
    %c0_138 = arith.constant 0 : index
    %c0_139 = arith.constant 0 : index
    %140 = vector.load %arg5[%c0_137, %c19, %c0_138, %c0_139] : memref<1x25x8x16xbf16, #tpu.memory_space<vmem>>, vector<1x1x8x16xbf16>
    %141 = vector.shape_cast %140 : vector<1x1x8x16xbf16> to vector<8x16xbf16>
    %cst_140 = arith.constant dense<0.000000e+00> : vector<256x16xf32>
    %142 = tpu.matmul %139, %141, %cst_140 {dimension_numbers = #tpu.dot_dimension_numbers<[1], [0], [0], [1], [0, 0, 1, 1], [], []>} : vector<256x8xbf16>, vector<8x16xbf16>, vector<256x16xf32> -> vector<256x16xf32>
    %143 = arith.addf %136, %142 : vector<256x16xf32>
    %c4_141 = arith.constant 4 : index
    %c0_142 = arith.constant 0 : index
    %c0_143 = arith.constant 0 : index
    %144 = vector.load %arg10[%c4_141, %c0_142, %c0_143] : memref<20x20x8xf32, #tpu.memory_space<vmem>>, vector<16x16x8xf32>
    %145 = vector.shape_cast %144 : vector<16x16x8xf32> to vector<256x8xf32>
    %146 = arith.truncf %145 : vector<256x8xf32> to vector<256x8xbf16>
    %c0_144 = arith.constant 0 : index
    %c20 = arith.constant 20 : index
    %c0_145 = arith.constant 0 : index
    %c0_146 = arith.constant 0 : index
    %147 = vector.load %arg5[%c0_144, %c20, %c0_145, %c0_146] : memref<1x25x8x16xbf16, #tpu.memory_space<vmem>>, vector<1x1x8x16xbf16>
    %148 = vector.shape_cast %147 : vector<1x1x8x16xbf16> to vector<8x16xbf16>
    %cst_147 = arith.constant dense<0.000000e+00> : vector<256x16xf32>
    %149 = tpu.matmul %146, %148, %cst_147 {dimension_numbers = #tpu.dot_dimension_numbers<[1], [0], [0], [1], [0, 0, 1, 1], [], []>} : vector<256x8xbf16>, vector<8x16xbf16>, vector<256x16xf32> -> vector<256x16xf32>
    %150 = arith.addf %143, %149 : vector<256x16xf32>
    %c4_148 = arith.constant 4 : index
    %c1_149 = arith.constant 1 : index
    %c0_150 = arith.constant 0 : index
    %151 = vector.load %arg10[%c4_148, %c1_149, %c0_150] : memref<20x20x8xf32, #tpu.memory_space<vmem>>, vector<16x16x8xf32>
    %152 = vector.shape_cast %151 : vector<16x16x8xf32> to vector<256x8xf32>
    %153 = arith.truncf %152 : vector<256x8xf32> to vector<256x8xbf16>
    %c0_151 = arith.constant 0 : index
    %c21 = arith.constant 21 : index
    %c0_152 = arith.constant 0 : index
    %c0_153 = arith.constant 0 : index
    %154 = vector.load %arg5[%c0_151, %c21, %c0_152, %c0_153] : memref<1x25x8x16xbf16, #tpu.memory_space<vmem>>, vector<1x1x8x16xbf16>
    %155 = vector.shape_cast %154 : vector<1x1x8x16xbf16> to vector<8x16xbf16>
    %cst_154 = arith.constant dense<0.000000e+00> : vector<256x16xf32>
    %156 = tpu.matmul %153, %155, %cst_154 {dimension_numbers = #tpu.dot_dimension_numbers<[1], [0], [0], [1], [0, 0, 1, 1], [], []>} : vector<256x8xbf16>, vector<8x16xbf16>, vector<256x16xf32> -> vector<256x16xf32>
    %157 = arith.addf %150, %156 : vector<256x16xf32>
    %c4_155 = arith.constant 4 : index
    %c2_156 = arith.constant 2 : index
    %c0_157 = arith.constant 0 : index
    %158 = vector.load %arg10[%c4_155, %c2_156, %c0_157] : memref<20x20x8xf32, #tpu.memory_space<vmem>>, vector<16x16x8xf32>
    %159 = vector.shape_cast %158 : vector<16x16x8xf32> to vector<256x8xf32>
    %160 = arith.truncf %159 : vector<256x8xf32> to vector<256x8xbf16>
    %c0_158 = arith.constant 0 : index
    %c22 = arith.constant 22 : index
    %c0_159 = arith.constant 0 : index
    %c0_160 = arith.constant 0 : index
    %161 = vector.load %arg5[%c0_158, %c22, %c0_159, %c0_160] : memref<1x25x8x16xbf16, #tpu.memory_space<vmem>>, vector<1x1x8x16xbf16>
    %162 = vector.shape_cast %161 : vector<1x1x8x16xbf16> to vector<8x16xbf16>
    %cst_161 = arith.constant dense<0.000000e+00> : vector<256x16xf32>
    %163 = tpu.matmul %160, %162, %cst_161 {dimension_numbers = #tpu.dot_dimension_numbers<[1], [0], [0], [1], [0, 0, 1, 1], [], []>} : vector<256x8xbf16>, vector<8x16xbf16>, vector<256x16xf32> -> vector<256x16xf32>
    %164 = arith.addf %157, %163 : vector<256x16xf32>
    %c4_162 = arith.constant 4 : index
    %c3_163 = arith.constant 3 : index
    %c0_164 = arith.constant 0 : index
    %165 = vector.load %arg10[%c4_162, %c3_163, %c0_164] : memref<20x20x8xf32, #tpu.memory_space<vmem>>, vector<16x16x8xf32>
    %166 = vector.shape_cast %165 : vector<16x16x8xf32> to vector<256x8xf32>
    %167 = arith.truncf %166 : vector<256x8xf32> to vector<256x8xbf16>
    %c0_165 = arith.constant 0 : index
    %c23 = arith.constant 23 : index
    %c0_166 = arith.constant 0 : index
    %c0_167 = arith.constant 0 : index
    %168 = vector.load %arg5[%c0_165, %c23, %c0_166, %c0_167] : memref<1x25x8x16xbf16, #tpu.memory_space<vmem>>, vector<1x1x8x16xbf16>
    %169 = vector.shape_cast %168 : vector<1x1x8x16xbf16> to vector<8x16xbf16>
    %cst_168 = arith.constant dense<0.000000e+00> : vector<256x16xf32>
    %170 = tpu.matmul %167, %169, %cst_168 {dimension_numbers = #tpu.dot_dimension_numbers<[1], [0], [0], [1], [0, 0, 1, 1], [], []>} : vector<256x8xbf16>, vector<8x16xbf16>, vector<256x16xf32> -> vector<256x16xf32>
    %171 = arith.addf %164, %170 : vector<256x16xf32>
    %c4_169 = arith.constant 4 : index
    %c4_170 = arith.constant 4 : index
    %c0_171 = arith.constant 0 : index
    %172 = vector.load %arg10[%c4_169, %c4_170, %c0_171] : memref<20x20x8xf32, #tpu.memory_space<vmem>>, vector<16x16x8xf32>
    %173 = vector.shape_cast %172 : vector<16x16x8xf32> to vector<256x8xf32>
    %174 = arith.truncf %173 : vector<256x8xf32> to vector<256x8xbf16>
    %c0_172 = arith.constant 0 : index
    %c24 = arith.constant 24 : index
    %c0_173 = arith.constant 0 : index
    %c0_174 = arith.constant 0 : index
    %175 = vector.load %arg5[%c0_172, %c24, %c0_173, %c0_174] : memref<1x25x8x16xbf16, #tpu.memory_space<vmem>>, vector<1x1x8x16xbf16>
    %176 = vector.shape_cast %175 : vector<1x1x8x16xbf16> to vector<8x16xbf16>
    %cst_175 = arith.constant dense<0.000000e+00> : vector<256x16xf32>
    %177 = tpu.matmul %174, %176, %cst_175 {dimension_numbers = #tpu.dot_dimension_numbers<[1], [0], [0], [1], [0, 0, 1, 1], [], []>} : vector<256x8xbf16>, vector<8x16xbf16>, vector<256x16xf32> -> vector<256x16xf32>
    %178 = arith.addf %171, %177 : vector<256x16xf32>
    %c0_176 = arith.constant 0 : index
    %c0_177 = arith.constant 0 : index
    %c0_178 = arith.constant 0 : index
    %179 = vector.load %arg6[%c0_176, %c0_177, %c0_178] : memref<1x3x16xf32, #tpu.memory_space<vmem>>, vector<1x3x16xf32>
    %180 = vector.shape_cast %179 : vector<1x3x16xf32> to vector<3x16xf32>
    %181 = vector.extract_strided_slice %180 {offsets = [0, 0], sizes = [1, 16], strides = [1, 1]} : vector<3x16xf32> to vector<1x16xf32>
    %182 = vector.broadcast %181 : vector<1x16xf32> to vector<256x16xf32>
    %183 = arith.addf %178, %182 : vector<256x16xf32>
    %cst_179 = arith.constant dense<0.000000e+00> : vector<16xf32>
    %184 = vector.multi_reduction <add>, %183, %cst_179 [0] : vector<256x16xf32> to vector<16xf32>
    %185 = vector.shape_cast %184 : vector<16xf32> to vector<1x16xf32>
    %c0_180 = arith.constant 0 : index
    %c0_181 = arith.constant 0 : index
    %186 = vector.load %arg7[%c0_180, %c0_181] : memref<16x2xf32, #tpu.memory_space<vmem>>, vector<16x2xf32>
    %cst_182 = arith.constant dense<0.000000e+00> : vector<1x2xf32>
    %187 = tpu.matmul %185, %186, %cst_182 {dimension_numbers = #tpu.dot_dimension_numbers<[1], [0], [0], [1], [0, 0, 1, 1], [], []>} : vector<1x16xf32>, vector<16x2xf32>, vector<1x2xf32> -> vector<1x2xf32>
    %cst_183 = arith.constant 4.8828125E-4 : f32
    %188 = vector.broadcast %cst_183 : f32 to vector<1x2xf32>
    %189 = arith.mulf %187, %188 : vector<1x2xf32>
    %c0_184 = arith.constant 0 : index
    %c0_185 = arith.constant 0 : index
    %190 = vector.load %arg8[%c0_184, %c0_185] : memref<2x16xf32, #tpu.memory_space<vmem>>, vector<2x16xf32>
    %cst_186 = arith.constant dense<0.000000e+00> : vector<1x16xf32>
    %191 = tpu.matmul %189, %190, %cst_186 {dimension_numbers = #tpu.dot_dimension_numbers<[1], [0], [0], [1], [0, 0, 1, 1], [], []>} : vector<1x2xf32>, vector<2x16xf32>, vector<1x16xf32> -> vector<1x16xf32>
    %192 = vector.broadcast %191 : vector<1x16xf32> to vector<256x16xf32>
    %193 = arith.subf %183, %192 : vector<256x16xf32>
    %194 = arith.mulf %193, %193 : vector<256x16xf32>
    %cst_187 = arith.constant dense<0.000000e+00> : vector<16xf32>
    %195 = vector.multi_reduction <add>, %194, %cst_187 [0] : vector<256x16xf32> to vector<16xf32>
    %196 = vector.shape_cast %195 : vector<16xf32> to vector<1x16xf32>
    %c0_188 = arith.constant 0 : index
    %c0_189 = arith.constant 0 : index
    %197 = vector.load %arg7[%c0_188, %c0_189] : memref<16x2xf32, #tpu.memory_space<vmem>>, vector<16x2xf32>
    %cst_190 = arith.constant dense<0.000000e+00> : vector<1x2xf32>
    %198 = tpu.matmul %196, %197, %cst_190 {dimension_numbers = #tpu.dot_dimension_numbers<[1], [0], [0], [1], [0, 0, 1, 1], [], []>} : vector<1x16xf32>, vector<16x2xf32>, vector<1x2xf32> -> vector<1x2xf32>
    %cst_191 = arith.constant 4.8828125E-4 : f32
    %199 = vector.broadcast %cst_191 : f32 to vector<1x2xf32>
    %200 = arith.mulf %198, %199 : vector<1x2xf32>
    %cst_192 = arith.constant 0.000000e+00 : f32
    %201 = vector.broadcast %cst_192 : f32 to vector<1x2xf32>
    %202 = arith.maximumf %200, %201 : vector<1x2xf32>
    %cst_193 = arith.constant 9.99999974E-6 : f32
    %203 = vector.broadcast %cst_193 : f32 to vector<1x2xf32>
    %204 = arith.addf %202, %203 : vector<1x2xf32>
    %205 = math.rsqrt %204 : vector<1x2xf32>
    %c0_194 = arith.constant 0 : index
    %c0_195 = arith.constant 0 : index
    %206 = vector.load %arg8[%c0_194, %c0_195] : memref<2x16xf32, #tpu.memory_space<vmem>>, vector<2x16xf32>
    %cst_196 = arith.constant dense<0.000000e+00> : vector<1x16xf32>
    %207 = tpu.matmul %205, %206, %cst_196 {dimension_numbers = #tpu.dot_dimension_numbers<[1], [0], [0], [1], [0, 0, 1, 1], [], []>} : vector<1x2xf32>, vector<2x16xf32>, vector<1x16xf32> -> vector<1x16xf32>
    %208 = vector.extract_strided_slice %180 {offsets = [1, 0], sizes = [1, 16], strides = [1, 1]} : vector<3x16xf32> to vector<1x16xf32>
    %209 = arith.mulf %207, %208 : vector<1x16xf32>
    %210 = vector.broadcast %209 : vector<1x16xf32> to vector<256x16xf32>
    %211 = arith.mulf %193, %210 : vector<256x16xf32>
    %212 = vector.extract_strided_slice %180 {offsets = [2, 0], sizes = [1, 16], strides = [1, 1]} : vector<3x16xf32> to vector<1x16xf32>
    %213 = vector.broadcast %212 : vector<1x16xf32> to vector<256x16xf32>
    %214 = arith.addf %211, %213 : vector<256x16xf32>
    %cst_197 = arith.constant 0.000000e+00 : f32
    %215 = vector.broadcast %cst_197 : f32 to vector<256x16xf32>
    %216 = arith.cmpf ogt, %214, %215 : vector<256x16xf32>
    %cst_198 = arith.constant 2.000000e-01 : f32
    %217 = vector.broadcast %cst_198 : f32 to vector<256x16xf32>
    %218 = arith.mulf %217, %214 : vector<256x16xf32>
    %219 = arith.select %216, %214, %218 : vector<256x16xi1>, vector<256x16xf32>
    %c0_199 = arith.constant 0 : index
    %c0_200 = arith.constant 0 : index
    %220 = vector.load %arg11[%c0_199, %c0_200] : memref<256x16xf32, #tpu.memory_space<vmem>>, vector<256x16xf32>
    %221 = arith.addf %220, %219 : vector<256x16xf32>
    %c0_201 = arith.constant 0 : index
    %c0_202 = arith.constant 0 : index
    %222 = vector.load %arg11[%c0_201, %c0_202] : memref<256x16xf32, #tpu.memory_space<vmem>>, vector<256x16xf32>
    tpu.vector_store %arg11[%c0_201, %c0_202], %221 {strides = array<i32>} : memref<256x16xf32, #tpu.memory_space<vmem>>, vector<256x16xf32>,
    %c1_i32 = arith.constant 1 : i32
    %223 = arith.cmpi eq, %arg1, %c1_i32 : i32
    %224 = arith.extui %223 : i1 to i32
    %c0_i32_203 = arith.constant 0 : i32
    %225 = arith.cmpi ne, %224, %c0_i32_203 : i32
    scf.if %225 {
      %c0_204 = arith.constant 0 : index
      %c0_205 = arith.constant 0 : index
      %226 = vector.load %arg11[%c0_204, %c0_205] : memref<256x16xf32, #tpu.memory_space<vmem>>, vector<256x16xf32>
      %227 = vector.shape_cast %226 : vector<256x16xf32> to vector<1x256x16xf32>
      %228 = arith.truncf %227 : vector<1x256x16xf32> to vector<1x256x16xbf16>
      %c0_206 = arith.constant 0 : index
      %c0_207 = arith.constant 0 : index
      %c0_208 = arith.constant 0 : index
      %229 = vector.load %arg9[%c0_206, %c0_207, %c0_208] : memref<1x256x16xbf16, #tpu.memory_space<vmem>>, vector<1x256x16xbf16>
      tpu.vector_store %arg9[%c0_206, %c0_207, %c0_208], %228 {strides = array<i32>} : memref<1x256x16xbf16, #tpu.memory_space<vmem>>, vector<1x256x16xbf16>,
    } else {
    }
    return
  }
  func.func @transform_0(%arg0: i32, %arg1: i32) -> (i32, i32, i32) {
    %c0_i32 = arith.constant 0 : i32
    %c0_i32_0 = arith.constant 0 : i32
    %c0_i32_1 = arith.constant 0 : i32
    return %arg0, %c0_i32, %c0_i32_0 : i32, i32, i32
  }
  func.func @transform_1(%arg0: i32, %arg1: i32) -> (i32, i32) {
    %c0_i32 = arith.constant 0 : i32
    %c0_i32_0 = arith.constant 0 : i32
    %c0_i32_1 = arith.constant 0 : i32
    return %c0_i32, %c0_i32_0 : i32, i32
  }
  func.func @transform_2(%arg0: i32, %arg1: i32) -> (i32, i32) {
    %c0_i32 = arith.constant 0 : i32
    %c0_i32_0 = arith.constant 0 : i32
    %c0_i32_1 = arith.constant 0 : i32
    return %c0_i32, %c0_i32_0 : i32, i32
  }
  func.func @transform_3(%arg0: i32, %arg1: i32) -> (i32, i32, i32, i32) {
    %c0_i32 = arith.constant 0 : i32
    %c0_i32_0 = arith.constant 0 : i32
    %c0_i32_1 = arith.constant 0 : i32
    %c0_i32_2 = arith.constant 0 : i32
    return %arg1, %c0_i32, %c0_i32_0, %c0_i32_1 : i32, i32, i32, i32
  }
  func.func @transform_4(%arg0: i32, %arg1: i32) -> (i32, i32, i32) {
    %c0_i32 = arith.constant 0 : i32
    %c0_i32_0 = arith.constant 0 : i32
    %c0_i32_1 = arith.constant 0 : i32
    return %arg1, %c0_i32, %c0_i32_0 : i32, i32, i32
  }
  func.func @transform_5(%arg0: i32, %arg1: i32) -> (i32, i32) {
    %c0_i32 = arith.constant 0 : i32
    %c0_i32_0 = arith.constant 0 : i32
    %c0_i32_1 = arith.constant 0 : i32
    return %c0_i32, %c0_i32_0 : i32, i32
  }
  func.func @transform_6(%arg0: i32, %arg1: i32) -> (i32, i32) {
    %c0_i32 = arith.constant 0 : i32
    %c0_i32_0 = arith.constant 0 : i32
    %c0_i32_1 = arith.constant 0 : i32
    return %c0_i32, %c0_i32_0 : i32, i32
  }
  func.func @transform_7(%arg0: i32, %arg1: i32) -> (i32, i32, i32) {
    %c0_i32 = arith.constant 0 : i32
    %c0_i32_0 = arith.constant 0 : i32
    %c0_i32_1 = arith.constant 0 : i32
    return %arg0, %c0_i32, %c0_i32_0 : i32, i32, i32
  }
}

</mosaic_0001>

<bundles_post_ra>
// kernel: tpu_custom_call.1
= control target key start
LH: loop header
LB: loop body
LE: loop exit
PB: predicated region body
PF: predicated region fallthrough
CT: control target
= control target key end

     0   :  { %s12033_s24 = smov 0   ;;  %s12035_s25 = smov 0   ;;  %s14382_s0 = inlined_call_operand.vmem [shape: bf16[2,256,8], index: 0, kind: input, shape index: {}]   ;;  %s14383_s1 = inlined_call_operand.vmem [shape: bf16[8,8], index: 1, kind: input, shape index: {}]   ;;  %s14384_s2 = inlined_call_operand.vmem [shape: f32[1,8], index: 2, kind: input, shape index: {}]   ;;  %s14385_s3 = inlined_call_operand.vmem [shape: bf16[2,25,8,16], index: 3, kind: input, shape index: {}]   ;;  %s14386_s4 = inlined_call_operand.vmem [shape: f32[2,3,16], index: 4, kind: input, shape index: {}]   ;;  %s14387_s5 = inlined_call_operand.vmem [shape: f32[16,2], index: 5, kind: input, shape index: {}]   ;;  %s14388_s6 = inlined_call_operand.vmem [shape: f32[2,16], index: 6, kind: input, shape index: {}]   ;;  %s14389_s7 = inlined_call_operand.vmem [shape: bf16[2,256,16], index: 7, kind: output, shape index: {}]  }
   0x1   :  { %s12037_s26 = smov 0   ;;  %s12039_s27 = smov 0  }
   0x2   :  { %s12041_s28 = smov 0  }
   0x3 LB: > { %s26_s29 = sadd.s32 1, %s11979_s26  ;;  %s29_s30 = sadd.s32 1, %s11983_s27  ;;  %s11987_s28 = sphi %s12041_s28, %s17_s28   ;;  %s11983_s27 = sphi %s12039_s27, %s14476_s27   ;;  %s11979_s26 = sphi %s12037_s26, %s14475_s26   ;;  %s11975_s25 = sphi %s12035_s25, %s14474_s25   ;;  %s11971_s24 = sphi %s12033_s24, %s14473_s24  }
   0x4   : > { %p27_p0 = scmp.ge.s32.totalorder %s26_s29, 2  ;;  %p9179_p1 = scmp.ge.s32.totalorder %s11987_s28, 1 }
   0x5   : > { %p268_p2 = scmp.lt.s32.totalorder %s11987_s28, 5 }
   0x6   : > { %s14478_s29 = smov (%p27_p0, %s26_s29), 0  ;;  %s14480_s30 = smov (!%p27_p0, %s29_s30), %s11983_s27 }
   0x7   : > { %p269_p3 = pnand %p9179_p1, %p268_p2  ;;  %p31_p4 = scmp.ge.s32.totalorder %s14480_s30, 2 }
   0x9   : > { %s14482_s30 = smov (%p31_p4, %s14480_s30), 0  ;;  %272 = sbr.rel (%p269_p3) target bundleno = 2353 (0x931), region = 48 }
  0x10   : > { %p309_p5 = scmp.lt.s32.totalorder %s11975_s25, 1  ;;  %p314_p6 = scmp.lt.s32.totalorder %s11971_s24, 1 }
  0x11   : > { %p9186_p7 = scmp.ne.s32.totalorder %s11971_s24, 0 }
  0x12   : > { %s14484_s25 = smov (!%p309_p5, %s11975_s25), 1  ;;  %v365_v0 = vld [vmem:[%s14383_s1] sm:$0xf] (!%p9186_p7)  ;;  %vm502_vm0 = vcmask (!%p9186_p7), 1043456   ;;  %vm453_vm1 = vcmask (!%p9186_p7), 64512   ;;  %vm669_vm2 = vcmask (!%p9186_p7), 60416  }
  0x13   : > { %s315_s8 = scalar_select %p314_p6, %s11971_s24, 1 }
  0x14   : > { %s9685_s9 = sshll.u32 %s14484_s25, 7  ;;  %332 = sbr.rel (%p9186_p7) target bundleno = 267 (0x10b), region = 52  ;;  %11857 = vmatprep.subr.msk.bf16.mxu0 (!%p9186_p7), %vm502_vm0, %v365_v0  ;;  %11858 = vmatprep.subr.msk.bf16.mxu1 (!%p9186_p7), %vm502_vm0, %v365_v0  ;;  %v504_v2 = vsel (!%p9186_p7), %vm502_vm0, %v365_v0, 0  ;;  %vm682_vm3 = vcmask (!%p9186_p7), 58368   ;;  %vm747_vm4 = vcmask (!%p9186_p7), 130048   ;;  %v11989_v18 = vmov (!%p9186_p7), 0.0  }
  0x15   : > { %s12070_s12 = scalar_lea.vmem %s14382_s0, %s9685_s9  ;;  %s11885_s13 = smul.u32 100, %s315_s8  ;;  %10172 = vmatpush3.bf16.msra.mxu0 (!%p9186_p7), %v504_v2  ;;  %11086 = vmatpush3.bf16.msra.mxu1 (!%p9186_p7), %v504_v2  ;;  %667 = vst.msk [vmem:[#allocation2] sm:$0xff] (!%p9186_p7), %vm453_vm1, %v11989_v18  ;;  %668 = vst.msk [vmem:[#allocation2 + $0x8] sm:$0xff] (!%p9186_p7), %vm453_vm1, %v11989_v18  ;;  %v12274_v19 = vld [vmem:[%s14384_s2] ss:$0 sm:$0xff] (!%p9186_p7) }
  0x16   : > { %s9183_s14 = sshll.u32 %s315_s8, 2  ;;  %s12075_s17 = scalar_lea.vmem %s14389_s7, %s9685_s9  ;;  %v11930_v1 = vld [vmem:[%s12070_s12] sm:$0xff] (!%p9186_p7)   ;;  %v11932_v4 = vld [vmem:[%s12070_s12 + $0x8] sm:$0xff] (!%p9186_p7)   ;;  %v11934_v6 = vld [vmem:[%s12070_s12 + $0x10] sm:$0xff] (!%p9186_p7)   ;;  %670 = vst.msk [vmem:[#allocation2 + $0x10] sm:$0xf] (!%p9186_p7), %vm669_vm2, %v11989_v18 }
  0x17   : > { %s12080_s20 = scalar_lea.vmem %s14385_s3, %s11885_s13  ;;  %s12085_s23 = scalar_lea.vmem %s14386_s4, %s9183_s14  ;;  %v11931_v3 = vld [vmem:[%s12070_s12 + $0x40] sm:$0xff] (!%p9186_p7)   ;;  %10173 = vmatprep.mubr.msk.bf16.mxu0 (!%p9186_p7), %vm453_vm1, %v11930_v1  ;;  %v11933_v5 = vld [vmem:[%s12070_s12 + $0x48] sm:$0xff] (!%p9186_p7)   ;;  %v11935_v7 = vld [vmem:[%s12070_s12 + $0x50] sm:$0xff] (!%p9186_p7)   ;;  %671 = vst.msk [vmem:[#allocation2 + $0x18] sm:$0xff] (!%p9186_p7), %vm453_vm1, %v11989_v18 }
  0x18   : > { %10189 = vmatprep.mubr.msk.bf16.mxu1 (!%p9186_p7), %vm453_vm1, %v11931_v3  ;;  %10174 = vmatmul.mubr.msk.bf16.vlgmr.msra.gmra.mrb[0].mxu0 (!%p9186_p7), %vm453_vm1, %v11932_v4  ;;  %v11936_v8 = vld [vmem:[%s12070_s12 + $0x18] sm:$0xff] (!%p9186_p7)   ;;  %v11938_v10 = vld [vmem:[%s12070_s12 + $0x20] sm:$0xff] (!%p9186_p7)   ;;  %v11940_v12 = vld [vmem:[%s12070_s12 + $0x28] sm:$0xff] (!%p9186_p7)   ;;  %672 = vst.msk [vmem:[#allocation2 + $0x20] sm:$0xff] (!%p9186_p7), %vm453_vm1, %v11989_v18 }
  0x19   : > { %10190 = vmatmul.mubr.msk.bf16.vlgmr.msra.gmra.mrb[0].mxu1 (!%p9186_p7), %vm453_vm1, %v11933_v5  ;;  %10177 = vmatprep.mubr.msk.bf16.mxu0 (!%p9186_p7), %vm453_vm1, %v11934_v6  ;;  %v11937_v9 = vld [vmem:[%s12070_s12 + $0x58] sm:$0xff] (!%p9186_p7)   ;;  %v11939_v11 = vld [vmem:[%s12070_s12 + $0x60] sm:$0xff] (!%p9186_p7)   ;;  %v11941_v13 = vld [vmem:[%s12070_s12 + $0x68] sm:$0xff] (!%p9186_p7)   ;;  %673 = vst.msk [vmem:[#allocation2 + $0x28] sm:$0xf] (!%p9186_p7), %vm669_vm2, %v11989_v18 }
  0x1a   : > { %10193 = vmatprep.mubr.msk.bf16.mxu1 (!%p9186_p7), %vm453_vm1, %v11935_v7  ;;  %v11942_v14 = vld [vmem:[%s12070_s12 + $0x30] sm:$0xff] (!%p9186_p7)   ;;  %v11944_v16 = vld [vmem:[%s12070_s12 + $0x38] sm:$0xff] (!%p9186_p7)   ;;  %675 = vst.msk [vmem:[#allocation2 + $0x1b0] sm:$0xff] (!%p9186_p7), %vm453_vm1, %v11989_v18  ;;  %676 = vst.msk [vmem:[#allocation2 + $0x1b8] sm:$0xff] (!%p9186_p7), %vm453_vm1, %v11989_v18 }
  0x1b   : > { %v11943_v15 = vld [vmem:[%s12070_s12 + $0x70] sm:$0xff]   ;;  %v11945_v17 = vld [vmem:[%s12070_s12 + $0x78] sm:$0xff]   ;;  %677 = vst.msk [vmem:[#allocation2 + $0x1c0] sm:$0xf] %vm669_vm2, %v11989_v18  ;;  %680 = vst.msk [vmem:[#allocation2 + $0x1d8] sm:$0xf] %vm669_vm2, %v11989_v18 }
  0x1c   : > { %678 = vst.msk [vmem:[#allocation2 + $0x1c8] sm:$0xff] %vm453_vm1, %v11989_v18  ;;  %679 = vst.msk [vmem:[#allocation2 + $0x1d0] sm:$0xff] %vm453_vm1, %v11989_v18 }
  0x1d   : > { %683 = vst.msk [vmem:[#allocation2 + $0x30] sm:$0x3] %vm682_vm3, %v11989_v18  ;;  %684 = vst.msk [vmem:[#allocation2 + $0x48] sm:$0x3] %vm682_vm3, %v11989_v18 }
  0x1e   : > { %685 = vst.msk [vmem:[#allocation2 + $0x60] sm:$0x3] %vm682_vm3, %v11989_v18  ;;  %686 = vst.msk [vmem:[#allocation2 + $0x78] sm:$0x3] %vm682_vm3, %v11989_v18 }
  0x1f   : > { %687 = vst.msk [vmem:[#allocation2 + $0x90] sm:$0x3] %vm682_vm3, %v11989_v18  ;;  %688 = vst.msk [vmem:[#allocation2 + $0xa8] sm:$0x3] %vm682_vm3, %v11989_v18 }
  0x20   : > { %10178 = vmatmul.mubr.msk.bf16.gmra.mrb[4].mxu0 %vm453_vm1, %v11936_v8  ;;  %689 = vst.msk [vmem:[#allocation2 + $0xc0] sm:$0x3] %vm682_vm3, %v11989_v18  ;;  %690 = vst.msk [vmem:[#allocation2 + $0xd8] sm:$0x3] %vm682_vm3, %v11989_v18 }
  0x21   : > { %10194 = vmatmul.mubr.msk.bf16.gmra.mrb[4].mxu1 %vm453_vm1, %v11937_v9  ;;  %10181 = vmatprep.mubr.msk.bf16.mxu0 %vm453_vm1, %v11938_v10  ;;  %691 = vst.msk [vmem:[#allocation2 + $0xf0] sm:$0x3] %vm682_vm3, %v11989_v18  ;;  %692 = vst.msk [vmem:[#allocation2 + $0x108] sm:$0x3] %vm682_vm3, %v11989_v18 }
  0x22   : > { %10197 = vmatprep.mubr.msk.bf16.mxu1 %vm453_vm1, %v11939_v11  ;;  %693 = vst.msk [vmem:[#allocation2 + $0x120] sm:$0x3] %vm682_vm3, %v11989_v18  ;;  %694 = vst.msk [vmem:[#allocation2 + $0x138] sm:$0x3] %vm682_vm3, %v11989_v18 }
  0x23   : > { %695 = vst.msk [vmem:[#allocation2 + $0x150] sm:$0x3] %vm682_vm3, %v11989_v18  ;;  %696 = vst.msk [vmem:[#allocation2 + $0x168] sm:$0x3] %vm682_vm3, %v11989_v18 }
  0x24   : > { %697 = vst.msk [vmem:[#allocation2 + $0x180] sm:$0x3] %vm682_vm3, %v11989_v18  ;;  %698 = vst.msk [vmem:[#allocation2 + $0x198] sm:$0x3] %vm682_vm3, %v11989_v18 }
  0x25   : > { %699 = vst.msk [vmem:[#allocation2 + $0x42] sm:$0x3] %vm682_vm3, %v11989_v18  ;;  %700 = vst.msk [vmem:[#allocation2 + $0x5a] sm:$0x3] %vm682_vm3, %v11989_v18 }
  0x26   : > { %701 = vst.msk [vmem:[#allocation2 + $0x72] sm:$0x3] %vm682_vm3, %v11989_v18  ;;  %702 = vst.msk [vmem:[#allocation2 + $0x8a] sm:$0x3] %vm682_vm3, %v11989_v18 }
  0x27   : > { %703 = vst.msk [vmem:[#allocation2 + $0xa2] sm:$0x3] %vm682_vm3, %v11989_v18  ;;  %704 = vst.msk [vmem:[#allocation2 + $0xba] sm:$0x3] %vm682_vm3, %v11989_v18 }
  0x28   : > { %10182 = vmatmul.mubr.msk.bf16.gmra.mrb[8].mxu0 %vm453_vm1, %v11940_v12  ;;  %705 = vst.msk [vmem:[#allocation2 + $0xd2] sm:$0x3] %vm682_vm3, %v11989_v18  ;;  %706 = vst.msk [vmem:[#allocation2 + $0xea] sm:$0x3] %vm682_vm3, %v11989_v18 }
  0x29   : > { %10198 = vmatmul.mubr.msk.bf16.gmra.mrb[8].mxu1 %vm453_vm1, %v11941_v13  ;;  %10185 = vmatprep.mubr.msk.bf16.mxu0 %vm453_vm1, %v11942_v14  ;;  %707 = vst.msk [vmem:[#allocation2 + $0x102] sm:$0x3] %vm682_vm3, %v11989_v18  ;;  %708 = vst.msk [vmem:[#allocation2 + $0x11a] sm:$0x3] %vm682_vm3, %v11989_v18 }
  0x2a   : > { %10201 = vmatprep.mubr.msk.bf16.mxu1 %vm453_vm1, %v11943_v15  ;;  %709 = vst.msk [vmem:[#allocation2 + $0x132] sm:$0x3] %vm682_vm3, %v11989_v18  ;;  %710 = vst.msk [vmem:[#allocation2 + $0x14a] sm:$0x3] %vm682_vm3, %v11989_v18 }
  0x2b   : > { %711 = vst.msk [vmem:[#allocation2 + $0x162] sm:$0x3] %vm682_vm3, %v11989_v18  ;;  %712 = vst.msk [vmem:[#allocation2 + $0x17a] sm:$0x3] %vm682_vm3, %v11989_v18 }
  0x2c   : > { %713 = vst.msk [vmem:[#allocation2 + $0x192] sm:$0x3] %vm682_vm3, %v11989_v18  ;;  %714 = vst.msk [vmem:[#allocation2 + $0x1aa] sm:$0x3] %vm682_vm3, %v11989_v18 }
  0x2d   : > { %748 = vst.msk [vmem:[#allocation3] sm:$0xff] %vm747_vm4, %v11989_v18  ;;  %749 = vst.msk [vmem:[#allocation3 + $0x8] sm:$0xff] %vm747_vm4, %v11989_v18 }
  0x2e   : > { %750 = vst.msk [vmem:[#allocation3 + $0x10] sm:$0xff] %vm747_vm4, %v11989_v18  ;;  %751 = vst.msk [vmem:[#allocation3 + $0x18] sm:$0xff] %vm747_vm4, %v11989_v18 }
  0x2f   : > { %752 = vst.msk [vmem:[#allocation3 + $0x20] sm:$0xff] %vm747_vm4, %v11989_v18  ;;  %753 = vst.msk [vmem:[#allocation3 + $0x28] sm:$0xff] %vm747_vm4, %v11989_v18 }
  0x30   : > { %10186 = vmatmul.mubr.msk.bf16.gmra.mrb[12].mxu0 %vm453_vm1, %v11944_v16  ;;  %754 = vst.msk [vmem:[#allocation3 + $0x30] sm:$0xff] %vm747_vm4, %v11989_v18  ;;  %755 = vst.msk [vmem:[#allocation3 + $0x38] sm:$0xff] %vm747_vm4, %v11989_v18 }
  0x31   : > { %10202 = vmatmul.mubr.msk.bf16.gmra.mrb[12].mxu1 %vm453_vm1, %v11945_v17  ;;  %756 = vst.msk [vmem:[#allocation3 + $0x40] sm:$0xff] %vm747_vm4, %v11989_v18  ;;  %757 = vst.msk [vmem:[#allocation3 + $0x48] sm:$0xff] %vm747_vm4, %v11989_v18 }
  0x32   : > { %758 = vst.msk [vmem:[#allocation3 + $0x50] sm:$0xff] %vm747_vm4, %v11989_v18  ;;  %759 = vst.msk [vmem:[#allocation3 + $0x58] sm:$0xff] %vm747_vm4, %v11989_v18 }
  0x33   : > { %760 = vst.msk [vmem:[#allocation3 + $0x60] sm:$0xff] %vm747_vm4, %v11989_v18  ;;  %761 = vst.msk [vmem:[#allocation3 + $0x68] sm:$0xff] %vm747_vm4, %v11989_v18 }
  0x34   : > { %762 = vst.msk [vmem:[#allocation3 + $0x70] sm:$0xff] %vm747_vm4, %v11989_v18  ;;  %763 = vst.msk [vmem:[#allocation3 + $0x78] sm:$0xff] %vm747_vm4, %v11989_v18 }
  0x35   : > { %764 = vst.msk [vmem:[#allocation3 + $0x80] sm:$0xff] %vm747_vm4, %v11989_v18  ;;  %765 = vst.msk [vmem:[#allocation3 + $0x88] sm:$0xff] %vm747_vm4, %v11989_v18 }
  0x36   : > { %766 = vst.msk [vmem:[#allocation3 + $0x90] sm:$0xff] %vm747_vm4, %v11989_v18  ;;  %767 = vst.msk [vmem:[#allocation3 + $0x98] sm:$0xff] %vm747_vm4, %v11989_v18 }
  0x37   : > { %768 = vst.msk [vmem:[#allocation3 + $0xa0] sm:$0xff] %vm747_vm4, %v11989_v18  ;;  %769 = vst.msk [vmem:[#allocation3 + $0xa8] sm:$0xff] %vm747_vm4, %v11989_v18 }
  0x38   : > { %770 = vst.msk [vmem:[#allocation3 + $0xb0] sm:$0xff] %vm747_vm4, %v11989_v18  ;;  %771 = vst.msk [vmem:[#allocation3 + $0xb8] sm:$0xff] %vm747_vm4, %v11989_v18 }
  0x39   : > { %772 = vst.msk [vmem:[#allocation3 + $0xc0] sm:$0xff] %vm747_vm4, %v11989_v18  ;;  %773 = vst.msk [vmem:[#allocation3 + $0xc8] sm:$0xff] %vm747_vm4, %v11989_v18 }
  0x3a   : > { %774 = vst.msk [vmem:[#allocation3 + $0xd0] sm:$0xff] %vm747_vm4, %v11989_v18  ;;  %775 = vst.msk [vmem:[#allocation3 + $0xd8] sm:$0xff] %vm747_vm4, %v11989_v18 }
  0x3b   : > { %776 = vst.msk [vmem:[#allocation3 + $0xe0] sm:$0xff] %vm747_vm4, %v11989_v18  ;;  %777 = vst.msk [vmem:[#allocation3 + $0xe8] sm:$0xff] %vm747_vm4, %v11989_v18 }
  0x3c   : > { %778 = vst.msk [vmem:[#allocation3 + $0xf0] sm:$0xff] %vm747_vm4, %v11989_v18  ;;  %779 = vst.msk [vmem:[#allocation3 + $0xf8] sm:$0xff] %vm747_vm4, %v11989_v18 }
  0xeb   : > { %v10175_v20 = vpop.f32.mrb[0].mxu0 }
  0xec   : > { %v549_v21 = vadd.f32 %v10175_v20, %v12274_v19  ;;  %v10191_v22 = vpop.f32.mrb[0].mxu1  ;;  %v540_v23 = vpop.f32.mrb[1].mxu0 }
  0xed   : > { %v613_v24 = vadd.f32 %v10191_v22, %v12274_v19  ;;  %v541_v25 = vadd.f32 %v12274_v19, %v540_v23  ;;  %v604_v26 = vpop.f32.mrb[1].mxu1  ;;  %v10176_v27 = vpop.f32.mrb[2].mxu0 }
  0xee   : > { %717 = vst.msk [vmem:[#allocation2 + $0x4a] sm:$0xff] %vm453_vm1, %v549_v21  ;;  %v605_v28 = vadd.f32 %v12274_v19, %v604_v26  ;;  %v552_v29 = vadd.f32 %v10176_v27, %v12274_v19  ;;  %v10192_v30 = vpop.f32.mrb[2].mxu1  ;;  %v543_v31 = vpop.f32.mrb[3].mxu0 }
  0xef   : > { %733 = vst.msk [vmem:[#allocation2 + $0x10a] sm:$0xff] %vm453_vm1, %v613_v24  ;;  %715 = vst.msk [vmem:[#allocation2 + $0x32] sm:$0xff] %vm453_vm1, %v541_v25  ;;  %v616_v32 = vadd.f32 %v10192_v30, %v12274_v19  ;;  %v544_v33 = vadd.f32 %v12274_v19, %v543_v31  ;;  %v607_v34 = vpop.f32.mrb[3].mxu1 }
  0xf0   : > { %731 = vst.msk [vmem:[#allocation2 + $0xf2] sm:$0xff] %vm453_vm1, %v605_v28  ;;  %718 = vst.msk [vmem:[#allocation2 + $0x52] sm:$0xff] %vm453_vm1, %v552_v29  ;;  %v608_v35 = vadd.f32 %v12274_v19, %v607_v34 }
  0xf1   : > { %734 = vst.msk [vmem:[#allocation2 + $0x112] sm:$0xff] %vm453_vm1, %v616_v32  ;;  %716 = vst.msk [vmem:[#allocation2 + $0x3a] sm:$0xff] %vm453_vm1, %v544_v33 }
  0xf2   : > { %732 = vst.msk [vmem:[#allocation2 + $0xfa] sm:$0xff] %vm453_vm1, %v608_v35 }
  0xf3   : > { %v10179_v36 = vpop.f32.mrb[4].mxu0 }
  0xf4   : > { %v565_v37 = vadd.f32 %v10179_v36, %v12274_v19  ;;  %v10195_v38 = vpop.f32.mrb[4].mxu1  ;;  %v556_v39 = vpop.f32.mrb[5].mxu0 }
  0xf5   : > { %v629_v40 = vadd.f32 %v10195_v38, %v12274_v19  ;;  %v557_v41 = vadd.f32 %v12274_v19, %v556_v39  ;;  %v620_v42 = vpop.f32.mrb[5].mxu1  ;;  %v10180_v43 = vpop.f32.mrb[6].mxu0 }
  0xf6   : > { %721 = vst.msk [vmem:[#allocation2 + $0x7a] sm:$0xff] %vm453_vm1, %v565_v37  ;;  %v621_v44 = vadd.f32 %v12274_v19, %v620_v42  ;;  %v568_v45 = vadd.f32 %v10180_v43, %v12274_v19  ;;  %v10196_v46 = vpop.f32.mrb[6].mxu1  ;;  %v559_v47 = vpop.f32.mrb[7].mxu0 }
  0xf7   : > { %737 = vst.msk [vmem:[#allocation2 + $0x13a] sm:$0xff] %vm453_vm1, %v629_v40  ;;  %719 = vst.msk [vmem:[#allocation2 + $0x62] sm:$0xff] %vm453_vm1, %v557_v41  ;;  %v632_v48 = vadd.f32 %v10196_v46, %v12274_v19  ;;  %v560_v49 = vadd.f32 %v12274_v19, %v559_v47  ;;  %v623_v50 = vpop.f32.mrb[7].mxu1 }
  0xf8   : > { %735 = vst.msk [vmem:[#allocation2 + $0x122] sm:$0xff] %vm453_vm1, %v621_v44  ;;  %722 = vst.msk [vmem:[#allocation2 + $0x82] sm:$0xff] %vm453_vm1, %v568_v45  ;;  %v624_v51 = vadd.f32 %v12274_v19, %v623_v50 }
  0xf9   : > { %738 = vst.msk [vmem:[#allocation2 + $0x142] sm:$0xff] %vm453_vm1, %v632_v48  ;;  %720 = vst.msk [vmem:[#allocation2 + $0x6a] sm:$0xff] %vm453_vm1, %v560_v49 }
  0xfa   : > { %736 = vst.msk [vmem:[#allocation2 + $0x12a] sm:$0xff] %vm453_vm1, %v624_v51 }
  0xfb   : > { %v10183_v52 = vpop.f32.mrb[8].mxu0 }
  0xfc   : > { %v581_v53 = vadd.f32 %v10183_v52, %v12274_v19  ;;  %v10199_v54 = vpop.f32.mrb[8].mxu1  ;;  %v572_v55 = vpop.f32.mrb[9].mxu0 }
  0xfd   : > { %v645_v56 = vadd.f32 %v10199_v54, %v12274_v19  ;;  %v573_v57 = vadd.f32 %v12274_v19, %v572_v55  ;;  %v636_v58 = vpop.f32.mrb[9].mxu1  ;;  %v10184_v59 = vpop.f32.mrb[10].mxu0 }
  0xfe   : > { %725 = vst.msk [vmem:[#allocation2 + $0xaa] sm:$0xff] %vm453_vm1, %v581_v53  ;;  %v637_v60 = vadd.f32 %v12274_v19, %v636_v58  ;;  %v584_v61 = vadd.f32 %v10184_v59, %v12274_v19  ;;  %v10200_v62 = vpop.f32.mrb[10].mxu1  ;;  %v575_v63 = vpop.f32.mrb[11].mxu0 }
  0xff   : > { %741 = vst.msk [vmem:[#allocation2 + $0x16a] sm:$0xff] %vm453_vm1, %v645_v56  ;;  %723 = vst.msk [vmem:[#allocation2 + $0x92] sm:$0xff] %vm453_vm1, %v573_v57  ;;  %v648_v0 = vadd.f32 %v10200_v62, %v12274_v19  ;;  %v576_v1 = vadd.f32 %v12274_v19, %v575_v63  ;;  %v639_v2 = vpop.f32.mrb[11].mxu1 }
 0x100   : > { %739 = vst.msk [vmem:[#allocation2 + $0x152] sm:$0xff] %vm453_vm1, %v637_v60  ;;  %726 = vst.msk [vmem:[#allocation2 + $0xb2] sm:$0xff] %vm453_vm1, %v584_v61  ;;  %v640_v3 = vadd.f32 %v12274_v19, %v639_v2 }
 0x101   : > { %742 = vst.msk [vmem:[#allocation2 + $0x172] sm:$0xff] %vm453_vm1, %v648_v0  ;;  %724 = vst.msk [vmem:[#allocation2 + $0x9a] sm:$0xff] %vm453_vm1, %v576_v1 }
 0x102   : > { %740 = vst.msk [vmem:[#allocation2 + $0x15a] sm:$0xff] %vm453_vm1, %v640_v3 }
 0x103   : > { %v10187_v4 = vpop.f32.mrb[12].mxu0 }
 0x104   : > { %v597_v5 = vadd.f32 %v10187_v4, %v12274_v19  ;;  %v10203_v6 = vpop.f32.mrb[12].mxu1  ;;  %v588_v7 = vpop.f32.mrb[13].mxu0 }
 0x105   : > { %v661_v8 = vadd.f32 %v10203_v6, %v12274_v19  ;;  %v589_v9 = vadd.f32 %v12274_v19, %v588_v7  ;;  %v652_v10 = vpop.f32.mrb[13].mxu1  ;;  %v10188_v11 = vpop.f32.mrb[14].mxu0 }
 0x106   : > { %729 = vst.msk [vmem:[#allocation2 + $0xda] sm:$0xff] %vm453_vm1, %v597_v5  ;;  %v653_v12 = vadd.f32 %v12274_v19, %v652_v10  ;;  %v600_v13 = vadd.f32 %v10188_v11, %v12274_v19  ;;  %v10204_v14 = vpop.f32.mrb[14].mxu1  ;;  %v591_v15 = vpop.f32.mrb[15].mxu0 }
 0x107   : > { %745 = vst.msk [vmem:[#allocation2 + $0x19a] sm:$0xff] %vm453_vm1, %v661_v8  ;;  %727 = vst.msk [vmem:[#allocation2 + $0xc2] sm:$0xff] %vm453_vm1, %v589_v9  ;;  %v664_v16 = vadd.f32 %v10204_v14, %v12274_v19  ;;  %v592_v17 = vadd.f32 %v12274_v19, %v591_v15  ;;  %v655_v18 = vpop.f32.mrb[15].mxu1 }
 0x108   : > { %743 = vst.msk [vmem:[#allocation2 + $0x182] sm:$0xff] %vm453_vm1, %v653_v12  ;;  %730 = vst.msk [vmem:[#allocation2 + $0xe2] sm:$0xff] %vm453_vm1, %v600_v13  ;;  %v656_v20 = vadd.f32 %v12274_v19, %v655_v18 }
 0x109   : > { %746 = vst.msk [vmem:[#allocation2 + $0x1a2] sm:$0xff] %vm453_vm1, %v664_v16  ;;  %728 = vst.msk [vmem:[#allocation2 + $0xca] sm:$0xff] %vm453_vm1, %v592_v17 }
 0x10a   : > { %744 = vst.msk [vmem:[#allocation2 + $0x18a] sm:$0xff] %vm453_vm1, %v656_v20 }
 0x10b PF: > { %v9220_v21 = vld [vmem:[%s12080_s20 + $0x4] sm:$0xf]  ;;  %vm928_vm5 = vcmask 1043456   ;;  %v9423_v22 = vld [vmem:[%s12080_s20 + $0x30] sm:$0xf]  ;;  %vm879_vm6 = vcmask 64512  }
 0x10c   : > { %v829_v23 = vld [vmem:[#allocation2 + $0x1] sm:$0xff]  ;;  %11859 = vmatprep.subr.msk.bf16.mxu1 %vm928_vm5, %v9220_v21  ;;  %11871 = vmatprep.subr.msk.bf16.mxu0 %vm928_vm5, %v9423_v22  ;;  %v930_v19 = vsel %vm928_vm5, %v9220_v21, 0  ;;  %v12346_v24 = vsel %vm928_vm5, %v9423_v22, 0  ;;  %v4247_v26 = vld [vmem:[#allocation2 + $0x32] sm:$0xff]  ;;  %v4249_v32 = vld [vmem:[#allocation2 + $0x4a] sm:$0xff]  ;;  %vm11991_vm7 = vmmov 0  }
 0x10d   : > { %14402 = vst [vmem:[#allocation4_spill] sm:$0xff] %v12346_v24  ;;  %v830_v25 = vld [vmem:[#allocation2 + $0x9] sm:$0xff]  ;;  %v4248_v27 = vld [vmem:[#allocation2 + $0x3a] sm:$0xff]  ;;  %10206 = vmatpush3.bf16.msra.mxu1 %v930_v19  ;;  %10614 = vmatpush3.bf16.msra.mxu0 %v12346_v24  ;;  %v4250_v34 = vld [vmem:[#allocation2 + $0x52] sm:$0xff]  ;;  %vm14401_vm8 = vcmask 130048   ;;  %vm8259_vm9 = vcmask 1041408  }
 0x10e   : > { %v861_v28 = vpack.c.bf16 %v830_v25, %v829_v23  ;;  %v12349_v29 = vpack.c.bf16 %v4248_v27, %v4247_v26  ;;  %v9440_v35 = vld [vmem:[%s12080_s20 + $0x34] sm:$0xf]  ;;  %v12355_v37 = vpack.c.bf16 %v4250_v34, %v4249_v32  ;;  %v834_v39 = vld [vmem:[#allocation2 + $0x39] sm:$0xff]  ;;  %v4251_v40 = vld [vmem:[#allocation2 + $0x62] sm:$0xff]  ;;  %vm8255_vm10 = vcmask 15360   ;;  %p9650_p8 = scmp.ne.s32.totalorder %s11971_s24, 1 }
 0x10f   : > { %v831_v30 = vld [vmem:[#allocation2 + $0x19] sm:$0xff]  ;;  %v833_v36 = vld [vmem:[#allocation2 + $0x31] sm:$0xff]  ;;  %v4640_v38 = vsel %vm928_vm5, %v9440_v35, 0  ;;  %11873 = vmatprep.subr.msk.bf16.mxu0 %vm928_vm5, %v9440_v35  ;;  %v835_v44 = vld [vmem:[#allocation2 + $0x49] sm:$0xff] }
 0x110   : > { %v832_v31 = vld [vmem:[#allocation2 + $0x21] sm:$0xff]  ;;  %10207 = vmatprep.mubr.msk.bf16.mxu1 %vm879_vm6, %v861_v28  ;;  %10615 = vmatprep.mubr.msk.bf16.mxu0 %vm879_vm6, %v12349_v29  ;;  %v4252_v41 = vld [vmem:[#allocation2 + $0x6a] sm:$0xff]  ;;  %v863_v42 = vpack.c.bf16 %v834_v39, %v833_v36  ;;  %v4255_v50 = vld [vmem:[#allocation2 + $0x92] sm:$0xff] }
 0x111   : > { %v862_v33 = vpack.c.bf16 %v832_v31, %v831_v30  ;;  %v12360_v43 = vpack.c.bf16 %v4252_v41, %v4251_v40  ;;  %10616 = vmatmul.mubr.msk.bf16.vlgmr.msra.gmra.mrb[0].mxu0 %vm879_vm6, %v12355_v37  ;;  %v836_v45 = vld [vmem:[#allocation2 + $0x51] sm:$0xff]  ;;  %v4253_v46 = vld [vmem:[#allocation2 + $0x7a] sm:$0xff]  ;;  %v4254_v47 = vld [vmem:[#allocation2 + $0x82] sm:$0xff] }
 0x112   : > { %10648 = vmatpush3.bf16.msra.mxu0 %v4640_v38  ;;  %v837_v48 = vld [vmem:[#allocation2 + $0x61] sm:$0xff]  ;;  %v838_v49 = vld [vmem:[#allocation2 + $0x69] sm:$0xff]  ;;  %v12368_v53 = vpack.c.bf16 %v836_v45, %v835_v44  ;;  %v12372_v55 = vpack.c.bf16 %v4254_v47, %v4253_v46  ;;  %v839_v58 = vld [vmem:[#allocation2 + $0x79] sm:$0xff] }
 0x113   : > { %10208 = vmatmul.mubr.msk.bf16.vlgmr.msra.gmra.mrb[0].mxu1 %vm879_vm6, %v862_v33  ;;  %10619 = vmatprep.mubr.msk.bf16.mxu0 %vm879_vm6, %v12360_v43  ;;  %v4256_v51 = vld [vmem:[#allocation2 + $0x9a] sm:$0xff]  ;;  %v12374_v56 = vpack.c.bf16 %v838_v49, %v837_v48  ;;  %v4257_v60 = vld [vmem:[#allocation2 + $0xaa] sm:$0xff]  ;;  %v4258_v61 = vld [vmem:[#allocation2 + $0xb2] sm:$0xff] }
 0x114   : > { %10211 = vmatprep.mubr.msk.bf16.mxu1 %vm879_vm6, %v863_v42  ;;  %v828_v52 = vld [vmem:[%s12080_s20] sm:$0xf]  ;;  %v12376_v57 = vpack.c.bf16 %v4256_v51, %v4255_v50  ;;  %v841_v62 = vld [vmem:[#allocation2 + $0x91] sm:$0xff]  ;;  %v12389_v4 = vpack.c.bf16 %v4258_v61, %v4257_v60  ;;  %v843_v7 = vld [vmem:[#allocation2 + $0xa9] sm:$0xff] }
 0x115   : > { %11860 = vmatprep.subr.msk.bf16.mxu1 %vm928_vm5, %v828_v52  ;;  %v1142_v54 = vsel %vm928_vm5, %v828_v52, 0  ;;  %v840_v59 = vld [vmem:[#allocation2 + $0x81] sm:$0xff]  ;;  %v842_v63 = vld [vmem:[#allocation2 + $0x99] sm:$0xff]  ;;  %v4260_v1 = vld [vmem:[#allocation2 + $0xca] sm:$0xff] }
 0x116   : > { %10240 = vmatpush3.bf16.msra.mxu1 %v1142_v54  ;;  %v4259_v0 = vld [vmem:[#allocation2 + $0xc2] sm:$0xff]  ;;  %v12386_v2 = vpack.c.bf16 %v840_v59, %v839_v58  ;;  %v9457_v3 = vld [vmem:[%s12080_s20 + $0x38] sm:$0xf]  ;;  %v12391_v5 = vpack.c.bf16 %v842_v63, %v841_v62  ;;  %v4265_v22 = vld [vmem:[#allocation2 + $0x10a] sm:$0xff] }
 0x117   : > { %11874 = vmatprep.subr.msk.bf16.mxu0 %vm928_vm5, %v9457_v3  ;;  %v12394_v6 = vpack.c.bf16 %v4260_v1, %v4259_v0  ;;  %v844_v8 = vld [vmem:[#allocation2 + $0xb1] sm:$0xff]  ;;  %v4261_v9 = vld [vmem:[#allocation2 + $0xda] sm:$0xff]  ;;  %v4262_v10 = vld [vmem:[#allocation2 + $0xe2] sm:$0xff]  ;;  %v4934_v48 = vsel %vm928_vm5, %v9457_v3, 0 }
 0x118   : > { %v845_v11 = vld [vmem:[#allocation2 + $0xc1] sm:$0xff]  ;;  %v846_v12 = vld [vmem:[#allocation2 + $0xc9] sm:$0xff]  ;;  %v4263_v13 = vld [vmem:[#allocation2 + $0xf2] sm:$0xff]  ;;  %v12404_v15 = vpack.c.bf16 %v844_v8, %v843_v7  ;;  %v12406_v16 = vpack.c.bf16 %v4262_v10, %v4261_v9 }
 0x119   : > { %10620 = vmatmul.mubr.msk.bf16.gmra.mrb[4].mxu0 %vm879_vm6, %v12372_v55  ;;  %v4264_v14 = vld [vmem:[#allocation2 + $0xfa] sm:$0xff]  ;;  %v12408_v17 = vpack.c.bf16 %v846_v12, %v845_v11  ;;  %v12419_v23 = vld [vmem:[%s12080_s20 + $0x8] sm:$0xf]  ;;  %v4266_v19 = vld [vmem:[#allocation2 + $0x112] sm:$0xff] }
 0x11a   : > { %10623 = vmatprep.mubr.msk.bf16.mxu0 %vm879_vm6, %v12376_v57  ;;  %v12410_v18 = vpack.c.bf16 %v4264_v14, %v4263_v13  ;;  %v847_v20 = vld [vmem:[#allocation2 + $0xd9] sm:$0xff]  ;;  %v848_v21 = vld [vmem:[#allocation2 + $0xe1] sm:$0xff]  ;;  %v849_v25 = vld [vmem:[#allocation2 + $0xf1] sm:$0xff]  ;;  %11861 = vmatprep.subr.msk.bf16.mxu1 %vm928_vm5, %v12419_v23  ;;  %v12427_v31 = vpack.c.bf16 %v4266_v19, %v4265_v22 }
 0x11b   : > { %10212 = vmatmul.mubr.msk.bf16.gmra.mrb[4].mxu1 %vm879_vm6, %v12368_v53  ;;  %v850_v26 = vld [vmem:[#allocation2 + $0xf9] sm:$0xff]  ;;  %v12425_v30 = vpack.c.bf16 %v848_v21, %v847_v20  ;;  %v851_v34 = vld [vmem:[#allocation2 + $0x109] sm:$0xff]  ;;  %v852_v35 = vld [vmem:[#allocation2 + $0x111] sm:$0xff] }
 0x11c   : > { %10215 = vmatprep.mubr.msk.bf16.mxu1 %vm879_vm6, %v12374_v56  ;;  %v4541_v27 = vld [vmem:[#allocation2 + $0x33] sm:$0xff]  ;;  %v4542_v28 = vld [vmem:[#allocation2 + $0x3b] sm:$0xff]  ;;  %v12429_v32 = vpack.c.bf16 %v850_v26, %v849_v25  ;;  %v4543_v36 = vld [vmem:[#allocation2 + $0x4b] sm:$0xff]  ;;  %v12441_v44 = vpack.c.bf16 %v852_v35, %v851_v34 }
 0x11d   : > { %v12431_v33 = vpack.c.bf16 %v4542_v28, %v4541_v27  ;;  %v4544_v38 = vld [vmem:[#allocation2 + $0x53] sm:$0xff]  ;;  %v853_v39 = vld [vmem:[#allocation2 + $0x121] sm:$0xff]  ;;  %v854_v40 = vld [vmem:[#allocation2 + $0x129] sm:$0xff] }
 0x11e   : > { %v4545_v41 = vld [vmem:[#allocation2 + $0x63] sm:$0xff]  ;;  %v4546_v42 = vld [vmem:[#allocation2 + $0x6b] sm:$0xff]  ;;  %v12443_v45 = vpack.c.bf16 %v4544_v38, %v4543_v36  ;;  %v12445_v46 = vpack.c.bf16 %v854_v40, %v853_v39  ;;  %v12453_v49 = vld [vmem:[%s12080_s20 + $0x3c] sm:$0xf] }
 0x11f   : > { %v12447_v47 = vpack.c.bf16 %v4546_v42, %v4545_v41  ;;  %v855_v50 = vld [vmem:[#allocation2 + $0x139] sm:$0xff]  ;;  %v856_v51 = vld [vmem:[#allocation2 + $0x141] sm:$0xff]  ;;  %v857_v58 = vld [vmem:[#allocation2 + $0x151] sm:$0xff]  ;;  %v1404_v42 = vsel %vm928_vm5, %v12419_v23, 0 }
 0x120   : > { %v4547_v52 = vld [vmem:[#allocation2 + $0x7b] sm:$0xff]  ;;  %v4548_v54 = vld [vmem:[#allocation2 + $0x83] sm:$0xff]  ;;  %v4549_v60 = vld [vmem:[#allocation2 + $0x93] sm:$0xff]  ;;  %v12463_v62 = vpack.c.bf16 %v856_v51, %v855_v50 }
 0x121   : > { %10624 = vmatmul.mubr.msk.bf16.gmra.mrb[8].mxu0 %vm879_vm6, %v12389_v4  ;;  %v858_v59 = vld [vmem:[#allocation2 + $0x159] sm:$0xff]  ;;  %v12465_v63 = vpack.c.bf16 %v4548_v54, %v4547_v52  ;;  %v859_v3 = vld [vmem:[#allocation2 + $0x169] sm:$0xff]  ;;  %v860_v7 = vld [vmem:[#allocation2 + $0x171] sm:$0xff] }
 0x122   : > { %10627 = vmatprep.mubr.msk.bf16.mxu0 %vm879_vm6, %v12394_v6  ;;  %v4550_v61 = vld [vmem:[#allocation2 + $0x9b] sm:$0xff]  ;;  %14403 = vst [vmem:[#allocation5_spill] sm:$0xff] %v12463_v62  ;;  %v12467_v0 = vpack.c.bf16 %v858_v59, %v857_v58  ;;  %v4551_v8 = vld [vmem:[#allocation2 + $0xab] sm:$0xff]  ;;  %v4552_v9 = vld [vmem:[#allocation2 + $0xb3] sm:$0xff]  ;;  %v12479_v14 = vpack.c.bf16 %v860_v7, %v859_v3 }
 0x123   : > { %10216 = vmatmul.mubr.msk.bf16.gmra.mrb[8].mxu1 %vm879_vm6, %v12386_v2  ;;  %v12469_v1 = vpack.c.bf16 %v4550_v61, %v4549_v60  ;;  %v780_v10 = vld [vmem:[#allocation2] sm:$0xff]  ;;  %v781_v11 = vld [vmem:[#allocation2 + $0x8] sm:$0xff]  ;;  %v12481_v20 = vpack.c.bf16 %v4552_v9, %v4551_v8  ;;  %v782_v19 = vld [vmem:[#allocation2 + $0x18] sm:$0xff] }
 0x124   : > { %10219 = vmatprep.mubr.msk.bf16.mxu1 %vm879_vm6, %v12391_v5  ;;  %14404 = vst [vmem:[#allocation6_spill] sm:$0xff] %v12467_v0  ;;  %v4553_v12 = vld [vmem:[#allocation2 + $0xc3] sm:$0xff]  ;;  %v4554_v13 = vld [vmem:[#allocation2 + $0xcb] sm:$0xff]  ;;  %14405 = vst [vmem:[#allocation7_spill] sm:$0xff] %v12479_v14  ;;  %v812_v21 = vpack.c.bf16 %v781_v11, %v780_v10 }
 0x125   : > { %v12483_v22 = vpack.c.bf16 %v4554_v13, %v4553_v12  ;;  %v783_v25 = vld [vmem:[#allocation2 + $0x20] sm:$0xff]  ;;  %v784_v28 = vld [vmem:[#allocation2 + $0x30] sm:$0xff]  ;;  %v785_v34 = vld [vmem:[#allocation2 + $0x38] sm:$0xff] }
 0x126   : > { %v4555_v26 = vld [vmem:[#allocation2 + $0xdb] sm:$0xff]  ;;  %v4556_v27 = vld [vmem:[#allocation2 + $0xe3] sm:$0xff]  ;;  %v4557_v35 = vld [vmem:[#allocation2 + $0xf3] sm:$0xff]  ;;  %v813_v38 = vpack.c.bf16 %v783_v25, %v782_v19  ;;  %v814_v40 = vpack.c.bf16 %v785_v34, %v784_v28 }
 0x127   : > { %v4558_v36 = vld [vmem:[#allocation2 + $0xfb] sm:$0xff]  ;;  %v12492_v39 = vpack.c.bf16 %v4556_v27, %v4555_v26  ;;  %v786_v50 = vld [vmem:[#allocation2 + $0x48] sm:$0xff]  ;;  %v787_v51 = vld [vmem:[#allocation2 + $0x50] sm:$0xff] }
 0x128   : > { %v12494_v41 = vpack.c.bf16 %v4558_v36, %v4557_v35  ;;  %v4559_v52 = vld [vmem:[#allocation2 + $0x10b] sm:$0xff]  ;;  %v4560_v54 = vld [vmem:[#allocation2 + $0x113] sm:$0xff]  ;;  %v788_v58 = vld [vmem:[#allocation2 + $0x60] sm:$0xff]  ;;  %v12509_v61 = vpack.c.bf16 %v787_v51, %v786_v50 }
 0x129   : > { %10628 = vmatmul.mubr.msk.bf16.gmra.mrb[12].mxu0 %vm879_vm6, %v12406_v16  ;;  %v789_v59 = vld [vmem:[#allocation2 + $0x68] sm:$0xff]  ;;  %v12511_v3 = vpack.c.bf16 %v4560_v54, %v4559_v52  ;;  %v790_v9 = vld [vmem:[#allocation2 + $0x78] sm:$0xff]  ;;  %v791_v10 = vld [vmem:[#allocation2 + $0x80] sm:$0xff] }
 0x12a   : > { %10631 = vmatprep.mubr.msk.bf16.mxu0 %vm879_vm6, %v12410_v18  ;;  %v4561_v23 = vld [vmem:[#allocation2 + $0x123] sm:$0xff]  ;;  %v4562_v60 = vld [vmem:[#allocation2 + $0x12b] sm:$0xff]  ;;  %v12513_v7 = vpack.c.bf16 %v789_v59, %v788_v58  ;;  %v4563_v11 = vld [vmem:[#allocation2 + $0x13b] sm:$0xff]  ;;  %v12525_v26 = vpack.c.bf16 %v791_v10, %v790_v9 }
 0x12b   : > { %10220 = vmatmul.mubr.msk.bf16.gmra.mrb[12].mxu1 %vm879_vm6, %v12404_v15  ;;  %v12515_v8 = vpack.c.bf16 %v4562_v60, %v4561_v23  ;;  %v4564_v12 = vld [vmem:[#allocation2 + $0x143] sm:$0xff]  ;;  %v792_v13 = vld [vmem:[#allocation2 + $0x90] sm:$0xff]  ;;  %v4566_v25 = vld [vmem:[#allocation2 + $0x15b] sm:$0xff] }
 0x12c   : > { %10223 = vmatprep.mubr.msk.bf16.mxu1 %vm879_vm6, %v12408_v17  ;;  %v4565_v19 = vld [vmem:[#allocation2 + $0x153] sm:$0xff]  ;;  %v12527_v27 = vpack.c.bf16 %v4564_v12, %v4563_v11  ;;  %v794_v35 = vld [vmem:[#allocation2 + $0xa8] sm:$0xff]  ;;  %v799_v9 = vld [vmem:[#allocation2 + $0xe0] sm:$0xff] }
 0x12d   : > { %v12531_v34 = vpack.c.bf16 %v4566_v25, %v4565_v19  ;;  %v795_v36 = vld [vmem:[#allocation2 + $0xb0] sm:$0xff]  ;;  %v797_v50 = vld [vmem:[#allocation2 + $0xc8] sm:$0xff]  ;;  %v798_v60 = vld [vmem:[#allocation2 + $0xd8] sm:$0xff] }
 0x12e   : > { %v4569_v51 = vld [vmem:[#allocation2 + $0x183] sm:$0xff]  ;;  %v4570_v52 = vld [vmem:[#allocation2 + $0x18b] sm:$0xff]  ;;  %v12541_v54 = vpack.c.bf16 %v795_v36, %v794_v35  ;;  %v4571_v10 = vld [vmem:[#allocation2 + $0x19b] sm:$0xff]  ;;  %v12554_v25 = vpack.c.bf16 %v799_v9, %v798_v60 }
 0x12f   : > { %v4587_v23 = vpack.c.bf16 %v4570_v52, %v4569_v51  ;;  %v4572_v11 = vld [vmem:[#allocation2 + $0x1a3] sm:$0xff]  ;;  %v800_v12 = vld [vmem:[#allocation2 + $0xf0] sm:$0xff] }
 0x130   : > { %v4836_v19 = vld [vmem:[#allocation2 + $0x3c] sm:$0xff]  ;;  %v4588_v35 = vpack.c.bf16 %v4572_v11, %v4571_v10  ;;  %v4838_v51 = vld [vmem:[#allocation2 + $0x54] sm:$0xff]  ;;  %v4839_v60 = vld [vmem:[#allocation2 + $0x64] sm:$0xff] }
 0x131   : > { %10632 = vmatmul.mubr.msk.bf16.gmra.mrb[16].mxu0 %vm879_vm6, %v12427_v31  ;;  %v804_v52 = vld [vmem:[#allocation2 + $0x120] sm:$0xff]  ;;  %v4840_v9 = vld [vmem:[#allocation2 + $0x6c] sm:$0xff] }
 0x132   : > { %10649 = vmatprep.mubr.msk.bf16.mxu0 %vm879_vm6, %v12431_v33 }
 0x133   : > { %10224 = vmatmul.mubr.msk.bf16.gmra.mrb[16].mxu1 %vm879_vm6, %v12425_v30 }
 0x134   : > { %10227 = vmatprep.mubr.msk.bf16.mxu1 %vm879_vm6, %v12429_v32 }
 0x139   : > { %10650 = vmatmul.mubr.msk.bf16.vlgmr.msra.gmra.mrb[0].mxu0 %vm879_vm6, %v12443_v45 }
 0x13a   : > { %10682 = vmatpush3.bf16.msra.mxu0 %v4934_v48  ;;  %10653 = vmatprep.mubr.msk.bf16.mxu0 %vm879_vm6, %v12447_v47  ;;  %v12500_v48 = vld [vmem:[%s12080_s20 + $0xc] sm:$0xf] }
 0x13b   : > { %10228 = vmatmul.mubr.msk.bf16.gmra.mrb[20].mxu1 %vm879_vm6, %v12441_v44  ;;  %11875 = vmatprep.subr.msk.bf16.mxu0 %vm928_vm5, %v12453_v49 }
 0x13c   : > { %10231 = vmatprep.mubr.msk.bf16.mxu1 %vm879_vm6, %v12445_v46 }
 0x141   : > { %10654 = vmatmul.mubr.msk.bf16.gmra.mrb[4].mxu0 %vm879_vm6, %v12465_v63 }
 0x142   : > { %10657 = vmatprep.mubr.msk.bf16.mxu0 %vm879_vm6, %v12469_v1 }
 0x143   : > { %10232 = vmatmul.mubr.msk.bf16.gmra.mrb[24].mxu1 %vm879_vm6, %v12463_v62  ;;  %v4845_v62 = vld [vmem:[#allocation2 + $0xac] sm:$0xff] }
 0x144   : > { %10235 = vmatprep.mubr.msk.bf16.mxu1 %vm879_vm6, %v12467_v0  ;;  %v811_v0 = vld [vmem:[#allocation2 + $0x170] sm:$0xff] }
 0x149   : > { %10658 = vmatmul.mubr.msk.bf16.gmra.mrb[8].mxu0 %vm879_vm6, %v12481_v20 }
 0x14a   : > { %10661 = vmatprep.mubr.msk.bf16.mxu0 %vm879_vm6, %v12483_v22 }
 0x14b   : > { %10236 = vmatmul.mubr.msk.bf16.gmra.mrb[28].mxu1 %vm879_vm6, %v12479_v14 }
 0x14c   : > { %10241 = vmatprep.mubr.msk.bf16.mxu1 %vm879_vm6, %v812_v21  ;;  %v793_v21 = vld [vmem:[#allocation2 + $0x98] sm:$0xff] }
 0x14d   : > { %v12529_v28 = vpack.c.bf16 %v793_v21, %v792_v13  ;;  %v801_v13 = vld [vmem:[#allocation2 + $0xf8] sm:$0xff] }
 0x14e   : > { %v4835_v21 = vld [vmem:[#allocation2 + $0x34] sm:$0xff]  ;;  %v12556_v36 = vpack.c.bf16 %v801_v13, %v800_v12  ;;  %v12573_v13 = vpack.c.bf16 %v4840_v9, %v4839_v60 }
 0x150   : > { %14406 = vst [vmem:[#allocation8_spill] sm:$0xff] %v12573_v13 }
 0x151   : > { %10662 = vmatmul.mubr.msk.bf16.gmra.mrb[12].mxu0 %vm879_vm6, %v12492_v39 }
 0x152   : > { %10665 = vmatprep.mubr.msk.bf16.mxu0 %vm879_vm6, %v12494_v41 }
 0x153   : > { %10242 = vmatmul.mubr.msk.bf16.vlgmr.msra.gmra.mrb[0].mxu1 %vm879_vm6, %v813_v38  ;;  %v4567_v38 = vld [vmem:[#allocation2 + $0x16b] sm:$0xff] }
 0x154   : > { %10245 = vmatprep.mubr.msk.bf16.mxu1 %vm879_vm6, %v814_v40  ;;  %10274 = vmatpush3.bf16.msra.mxu1 %v1404_v42  ;;  %v4568_v40 = vld [vmem:[#allocation2 + $0x173] sm:$0xff]  ;;  %v796_v42 = vld [vmem:[#allocation2 + $0xc0] sm:$0xff] }
 0x155   : > { %11862 = vmatprep.subr.msk.bf16.mxu1 %vm928_vm5, %v12500_v48  ;;  %v12543_v58 = vpack.c.bf16 %v4568_v40, %v4567_v38  ;;  %v12545_v59 = vpack.c.bf16 %v797_v50, %v796_v42  ;;  %v12558_v38 = vpack.c.bf16 %v4836_v19, %v4835_v21  ;;  %v802_v40 = vld [vmem:[#allocation2 + $0x108] sm:$0xff]  ;;  %v803_v42 = vld [vmem:[#allocation2 + $0x110] sm:$0xff]  ;;  %v5229_v21 = vsel %vm928_vm5, %v12453_v49, 0  ;;  %v12580_v19 = vld [vmem:[%s12080_s20 + $0x40] sm:$0xf] }
 0x156   : > { %v4837_v50 = vld [vmem:[#allocation2 + $0x4c] sm:$0xff]  ;;  %v12567_v10 = vpack.c.bf16 %v803_v42, %v802_v40  ;;  %v807_v40 = vld [vmem:[#allocation2 + $0x140] sm:$0xff] }
 0x157   : > { %v12569_v11 = vpack.c.bf16 %v4838_v51, %v4837_v50  ;;  %v4841_v42 = vld [vmem:[#allocation2 + $0x7c] sm:$0xff]  ;;  %v4842_v50 = vld [vmem:[#allocation2 + $0x84] sm:$0xff]  ;;  %v808_v49 = vld [vmem:[#allocation2 + $0x150] sm:$0xff] }
 0x158   : > { %v809_v51 = vld [vmem:[#allocation2 + $0x158] sm:$0xff]  ;;  %v12592_v9 = vpack.c.bf16 %v4842_v50, %v4841_v42  ;;  %v1306_v42 = vld [vmem:[#allocation2 + $0xa] sm:$0xff] }
 0x159   : > { %10666 = vmatmul.mubr.msk.bf16.gmra.mrb[16].mxu0 %vm879_vm6, %v12511_v3  ;;  %v12594_v24 = vpack.c.bf16 %v809_v51, %v808_v49  ;;  %v4847_v50 = vld [vmem:[#allocation2 + $0xc4] sm:$0xff]  ;;  %v4848_v49 = vld [vmem:[#allocation2 + $0xcc] sm:$0xff] }
 0x15a   : > { %10669 = vmatprep.mubr.msk.bf16.mxu0 %vm879_vm6, %v12515_v8  ;;  %14407 = vst [vmem:[#allocation9_spill] sm:$0xff] %v12592_v9 }
 0x15b   : > { %10246 = vmatmul.mubr.msk.bf16.gmra.mrb[4].mxu1 %vm879_vm6, %v12509_v61 }
 0x15c   : > { %10249 = vmatprep.mubr.msk.bf16.mxu1 %vm879_vm6, %v12513_v7 }
 0x161   : > { %10670 = vmatmul.mubr.msk.bf16.gmra.mrb[20].mxu0 %vm879_vm6, %v12527_v27 }
 0x162   : > { %10673 = vmatprep.mubr.msk.bf16.mxu0 %vm879_vm6, %v12531_v34 }
 0x163   : > { %10250 = vmatmul.mubr.msk.bf16.gmra.mrb[8].mxu1 %vm879_vm6, %v12525_v26 }
 0x164   : > { %10253 = vmatprep.mubr.msk.bf16.mxu1 %vm879_vm6, %v12529_v28 }
 0x169   : > { %10674 = vmatmul.mubr.msk.bf16.gmra.mrb[24].mxu0 %vm879_vm6, %v12543_v58 }
 0x16a   : > { %10677 = vmatprep.mubr.msk.bf16.mxu0 %vm879_vm6, %v4587_v23  ;;  %v805_v23 = vld [vmem:[#allocation2 + $0x128] sm:$0xff] }
 0x16b   : > { %10254 = vmatmul.mubr.msk.bf16.gmra.mrb[12].mxu1 %vm879_vm6, %v12541_v54  ;;  %v12571_v12 = vpack.c.bf16 %v805_v23, %v804_v52  ;;  %v4843_v52 = vld [vmem:[#allocation2 + $0x94] sm:$0xff]  ;;  %v4844_v23 = vld [vmem:[#allocation2 + $0x9c] sm:$0xff] }
 0x16c   : > { %10257 = vmatprep.mubr.msk.bf16.mxu1 %vm879_vm6, %v12545_v59  ;;  %v12596_v14 = vpack.c.bf16 %v4844_v23, %v4843_v52 }
 0x16e   : > { %14408 = vst [vmem:[#allocation10_spill] sm:$0xff] %v12596_v14 }
 0x171   : > { %10678 = vmatmul.mubr.msk.bf16.gmra.mrb[28].mxu0 %vm879_vm6, %v4588_v35  ;;  %v806_v35 = vld [vmem:[#allocation2 + $0x138] sm:$0xff] }
 0x172   : > { %10683 = vmatprep.mubr.msk.bf16.mxu0 %vm879_vm6, %v12558_v38  ;;  %v12590_v60 = vpack.c.bf16 %v807_v40, %v806_v35  ;;  %v4846_v35 = vld [vmem:[#allocation2 + $0xb4] sm:$0xff]  ;;  %v1305_v40 = vld [vmem:[#allocation2 + $0x2] sm:$0xff] }
 0x173   : > { %10258 = vmatmul.mubr.msk.bf16.gmra.mrb[16].mxu1 %vm879_vm6, %v12554_v25  ;;  %v12608_v52 = vpack.c.bf16 %v4846_v35, %v4845_v62  ;;  %v1337_v23 = vpack.c.bf16 %v1306_v42, %v1305_v40  ;;  %v4850_v62 = vld [vmem:[#allocation2 + $0xe4] sm:$0xff]  ;;  %v4852_v35 = vld [vmem:[#allocation2 + $0xfc] sm:$0xff] }
 0x174   : > { %10261 = vmatprep.mubr.msk.bf16.mxu1 %vm879_vm6, %v12556_v36 }
 0x179   : > { %10684 = vmatmul.mubr.msk.bf16.vlgmr.msra.gmra.mrb[0].mxu0 %vm879_vm6, %v12569_v11 }
 0x17a   : > { %10716 = vmatpush3.bf16.msra.mxu0 %v5229_v21  ;;  %10687 = vmatprep.mubr.msk.bf16.mxu0 %vm879_vm6, %v12573_v13  ;;  %v810_v21 = vld [vmem:[#allocation2 + $0x168] sm:$0xff] }
 0x17b   : > { %10262 = vmatmul.mubr.msk.bf16.gmra.mrb[20].mxu1 %vm879_vm6, %v12567_v10  ;;  %11876 = vmatprep.subr.msk.bf16.mxu0 %vm928_vm5, %v12580_v19  ;;  %v12606_v51 = vpack.c.bf16 %v811_v0, %v810_v21  ;;  %v1308_v13 = vld [vmem:[#allocation2 + $0x22] sm:$0xff]  ;;  %v4851_v21 = vld [vmem:[#allocation2 + $0xf4] sm:$0xff] }
 0x17c   : > { %10265 = vmatprep.mubr.msk.bf16.mxu1 %vm879_vm6, %v12571_v12  ;;  %v4849_v0 = vld [vmem:[#allocation2 + $0xdc] sm:$0xff] }
 0x17d   : > { %v12619_v42 = vpack.c.bf16 %v4850_v62, %v4849_v0  ;;  %v4855_v0 = vld [vmem:[#allocation2 + $0x124] sm:$0xff]  ;;  %v4856_v62 = vld [vmem:[#allocation2 + $0x12c] sm:$0xff] }
 0x181   : > { %10688 = vmatmul.mubr.msk.bf16.gmra.mrb[4].mxu0 %vm879_vm6, %v12592_v9  ;;  %v12610_v9 = vpack.c.bf16 %v4848_v49, %v4847_v50  ;;  %v12621_v50 = vpack.c.bf16 %v4852_v35, %v4851_v21  ;;  %v1698_v49 = vsel %vm928_vm5, %v12500_v48, 0  ;;  %v12639_v21 = vpack.c.bf16 %v4856_v62, %v4855_v0  ;;  %v4858_v35 = vld [vmem:[#allocation2 + $0x144] sm:$0xff]  ;;  %v4864_v62 = vld [vmem:[#allocation2 + $0x18c] sm:$0xff] }
 0x182   : > { %10691 = vmatprep.mubr.msk.bf16.mxu0 %vm879_vm6, %v12596_v14  ;;  %v1307_v14 = vld [vmem:[#allocation2 + $0x1a] sm:$0xff]  ;;  %v4863_v0 = vld [vmem:[#allocation2 + $0x184] sm:$0xff] }
 0x183   : > { %10266 = vmatmul.mubr.msk.bf16.gmra.mrb[24].mxu1 %vm879_vm6, %v12590_v60  ;;  %v1338_v40 = vpack.c.bf16 %v1308_v13, %v1307_v14  ;;  %v4853_v14 = vld [vmem:[#allocation2 + $0x10c] sm:$0xff]  ;;  %v4854_v13 = vld [vmem:[#allocation2 + $0x114] sm:$0xff] }
 0x184   : > { %10269 = vmatprep.mubr.msk.bf16.mxu1 %vm879_vm6, %v12594_v24  ;;  %v12637_v48 = vpack.c.bf16 %v4854_v13, %v4853_v14 }
 0x189   : > { %10692 = vmatmul.mubr.msk.bf16.gmra.mrb[8].mxu0 %vm879_vm6, %v12608_v52 }
 0x18a   : > { %10695 = vmatprep.mubr.msk.bf16.mxu0 %vm879_vm6, %v12610_v9 }
 0x18b   : > { %10270 = vmatmul.mubr.msk.bf16.gmra.mrb[28].mxu1 %vm879_vm6, %v12606_v51 }
 0x18c   : > { %10275 = vmatprep.mubr.msk.bf16.mxu1 %vm879_vm6, %v1337_v23  ;;  %v12627_v23 = vld [vmem:[%s12080_s20 + $0x10] sm:$0xf] }
 0x191   : > { %10696 = vmatmul.mubr.msk.bf16.gmra.mrb[12].mxu0 %vm879_vm6, %v12619_v42 }
 0x192   : > { %10699 = vmatprep.mubr.msk.bf16.mxu0 %vm879_vm6, %v12621_v50 }
 0x193   : > { %10276 = vmatmul.mubr.msk.bf16.vlgmr.msra.gmra.mrb[0].mxu1 %vm879_vm6, %v1338_v40  ;;  %v4859_v40 = vld [vmem:[#allocation2 + $0x154] sm:$0xff] }
 0x194   : > { %10279 = vmatprep.mubr.msk.bf16.mxu1 %vm879_vm6, %v12349_v29  ;;  %10308 = vmatpush3.bf16.msra.mxu1 %v1698_v49  ;;  %v4857_v29 = vld [vmem:[#allocation2 + $0x13c] sm:$0xff] }
 0x195   : > { %11863 = vmatprep.subr.msk.bf16.mxu1 %vm928_vm5, %v12627_v23  ;;  %v4860_v49 = vld [vmem:[#allocation2 + $0x15c] sm:$0xff]  ;;  %v12649_v14 = vpack.c.bf16 %v4858_v35, %v4857_v29  ;;  %v4881_v35 = vpack.c.bf16 %v4864_v62, %v4863_v0 }
 0x196   : > { %v12651_v13 = vpack.c.bf16 %v4860_v49, %v4859_v40  ;;  %v1330_v49 = vld [vmem:[#allocation2 + $0x12a] sm:$0xff]  ;;  %v1334_v0 = vld [vmem:[#allocation2 + $0x15a] sm:$0xff] }
 0x197   : > { %v1599_v62 = vld [vmem:[#allocation2 + $0x3] sm:$0xff] }
 0x199   : > { %10700 = vmatmul.mubr.msk.bf16.gmra.mrb[16].mxu0 %vm879_vm6, %v12637_v48 }
 0x19a   : > { %10703 = vmatprep.mubr.msk.bf16.mxu0 %vm879_vm6, %v12639_v21 }
 0x19b   : > { %10280 = vmatmul.mubr.msk.bf16.gmra.mrb[4].mxu1 %vm879_vm6, %v12355_v37  ;;  %v4861_v37 = vld [vmem:[#allocation2 + $0x16c] sm:$0xff] }
 0x19c   : > { %10283 = vmatprep.mubr.msk.bf16.mxu1 %vm879_vm6, %v12360_v43  ;;  %v4862_v43 = vld [vmem:[#allocation2 + $0x174] sm:$0xff] }
 0x19d   : > { %v12661_v29 = vpack.c.bf16 %v4862_v43, %v4861_v37  ;;  %v9508_v43 = vld [vmem:[%s12080_s20 + $0x44] sm:$0xf] }
 0x1a1   : > { %10704 = vmatmul.mubr.msk.bf16.gmra.mrb[20].mxu0 %vm879_vm6, %v12649_v14 }
 0x1a2   : > { %10707 = vmatprep.mubr.msk.bf16.mxu0 %vm879_vm6, %v12651_v13 }
 0x1a3   : > { %10284 = vmatmul.mubr.msk.bf16.gmra.mrb[8].mxu1 %vm879_vm6, %v12372_v55  ;;  %v4865_v55 = vld [vmem:[#allocation2 + $0x19c] sm:$0xff] }
 0x1a4   : > { %10287 = vmatprep.mubr.msk.bf16.mxu1 %vm879_vm6, %v12376_v57  ;;  %v4866_v57 = vld [vmem:[#allocation2 + $0x1a4] sm:$0xff] }
 0x1a5   : > { %v4882_v40 = vpack.c.bf16 %v4866_v57, %v4865_v55 }
 0x1a9   : > { %10708 = vmatmul.mubr.msk.bf16.gmra.mrb[24].mxu0 %vm879_vm6, %v12661_v29 }
 0x1aa   : > { %10711 = vmatprep.mubr.msk.bf16.mxu0 %vm879_vm6, %v4881_v35  ;;  %v1600_v35 = vld [vmem:[#allocation2 + $0xb] sm:$0xff] }
 0x1ab   : > { %10288 = vmatmul.mubr.msk.bf16.gmra.mrb[12].mxu1 %vm879_vm6, %v12389_v4  ;;  %v1329_v4 = vld [vmem:[#allocation2 + $0x122] sm:$0xff]  ;;  %v1631_v57 = vpack.c.bf16 %v1600_v35, %v1599_v62  ;;  %v5726_v62 = vld [vmem:[#allocation2 + $0xaa] sm:$0xff]  ;;  %v5727_v35 = vld [vmem:[#allocation2 + $0xb2] sm:$0xff] }
 0x1ac   : > { %10291 = vmatprep.mubr.msk.bf16.mxu1 %vm879_vm6, %v12394_v6  ;;  %v12677_v37 = vpack.c.bf16 %v1330_v49, %v1329_v4  ;;  %v5523_v6 = vsel %vm928_vm5, %v12580_v19, 0  ;;  %v9304_v49 = vld [vmem:[%s12080_s20 + $0x14] sm:$0xf] }
 0x1b1   : > { %10712 = vmatmul.mubr.msk.bf16.gmra.mrb[28].mxu0 %vm879_vm6, %v4882_v40  ;;  %v1602_v40 = vld [vmem:[#allocation2 + $0x23] sm:$0xff] }
 0x1b2   : > { %10717 = vmatprep.mubr.msk.bf16.mxu0 %vm879_vm6, %v12509_v61  ;;  %v1333_v61 = vld [vmem:[#allocation2 + $0x152] sm:$0xff] }
 0x1b3   : > { %10292 = vmatmul.mubr.msk.bf16.gmra.mrb[16].mxu1 %vm879_vm6, %v12406_v16  ;;  %v1331_v16 = vld [vmem:[#allocation2 + $0x13a] sm:$0xff] }
 0x1b4   : > { %10295 = vmatprep.mubr.msk.bf16.mxu1 %vm879_vm6, %v12410_v18  ;;  %v1332_v18 = vld [vmem:[#allocation2 + $0x142] sm:$0xff] }
 0x1b5   : > { %v12691_v19 = vpack.c.bf16 %v1332_v18, %v1331_v16  ;;  %v5722_v16 = vld [vmem:[#allocation2 + $0x7a] sm:$0xff]  ;;  %v5723_v18 = vld [vmem:[#allocation2 + $0x82] sm:$0xff] }
 0x1b9   : > { %10718 = vmatmul.mubr.msk.bf16.vlgmr.msra.gmra.mrb[0].mxu0 %vm879_vm6, %v12513_v7  ;;  %v1335_v7 = vld [vmem:[#allocation2 + $0x16a] sm:$0xff] }
 0x1ba   : > { %10750 = vmatpush3.bf16.msra.mxu0 %v5523_v6  ;;  %10721 = vmatprep.mubr.msk.bf16.mxu0 %vm879_vm6, %v12525_v26  ;;  %v1336_v26 = vld [vmem:[#allocation2 + $0x172] sm:$0xff] }
 0x1bb   : > { %10296 = vmatmul.mubr.msk.bf16.gmra.mrb[20].mxu1 %vm879_vm6, %v12427_v31  ;;  %11877 = vmatprep.subr.msk.bf16.mxu0 %vm928_vm5, %v9508_v43  ;;  %v12693_v31 = vpack.c.bf16 %v1334_v0, %v1333_v61  ;;  %v12703_v55 = vpack.c.bf16 %v1336_v26, %v1335_v7  ;;  %v12830_v0 = vpack.c.bf16 %v5723_v18, %v5722_v16  ;;  %v5725_v26 = vld [vmem:[#allocation2 + $0x9a] sm:$0xff]  ;;  %v5748_v16 = vld [vmem:[#allocation2 + $0x1b2] sm:$0xff] }
 0x1bc   : > { %10299 = vmatprep.mubr.msk.bf16.mxu1 %vm879_vm6, %v12677_v37  ;;  %v5749_v18 = vld [vmem:[#allocation2 + $0x1ba] sm:$0xff] }
 0x1c1   : > { %10722 = vmatmul.mubr.msk.bf16.gmra.mrb[4].mxu0 %vm879_vm6, %v12529_v28  ;;  %v1601_v28 = vld [vmem:[#allocation2 + $0x1b] sm:$0xff] }
 0x1c2   : > { %10725 = vmatprep.mubr.msk.bf16.mxu0 %vm879_vm6, %v12541_v54  ;;  %v1632_v4 = vpack.c.bf16 %v1602_v40, %v1601_v28  ;;  %v1992_v54 = vsel %vm928_vm5, %v12627_v23, 0  ;;  %v5719_v23 = vld [vmem:[#allocation2 + $0x52] sm:$0xff]  ;;  %v5729_v28 = vld [vmem:[#allocation2 + $0xca] sm:$0xff] }
 0x1c3   : > { %10300 = vmatmul.mubr.msk.bf16.gmra.mrb[24].mxu1 %vm879_vm6, %v12691_v19  ;;  %v2188_v40 = vld [vmem:[#allocation2 + $0x18] sm:$0xff] }
 0x1c4   : > { %10303 = vmatprep.mubr.msk.bf16.mxu1 %vm879_vm6, %v12693_v31 }
 0x1c9   : > { %10726 = vmatmul.mubr.msk.bf16.gmra.mrb[8].mxu0 %vm879_vm6, %v12545_v59  ;;  %v5158_v59 = vld [vmem:[#allocation2 + $0x198] sm:$0xff] }
 0x1ca   : > { %10729 = vmatprep.mubr.msk.bf16.mxu0 %vm879_vm6, %v12554_v25  ;;  %v5159_v25 = vld [vmem:[#allocation2 + $0x1a0] sm:$0xff] }
 0x1cb   : > { %10304 = vmatmul.mubr.msk.bf16.gmra.mrb[28].mxu1 %vm879_vm6, %v12703_v55 }
 0x1cc   : > { %10309 = vmatprep.mubr.msk.bf16.mxu1 %vm879_vm6, %v1631_v57  ;;  %v12848_v57 = vpack.c.bf16 %v5727_v35, %v5726_v62  ;;  %v6013_v62 = vld [vmem:[#allocation2 + $0x53] sm:$0xff] }
 0x1d1   : > { %10730 = vmatmul.mubr.msk.bf16.gmra.mrb[12].mxu0 %vm879_vm6, %v12556_v36  ;;  %v5176_v36 = vpack.c.bf16 %v5159_v25, %v5158_v59  ;;  %v5732_v25 = vld [vmem:[#allocation2 + $0xf2] sm:$0xff] }
 0x1d2   : > { %10733 = vmatprep.mubr.msk.bf16.mxu0 %vm879_vm6, %v12567_v10 }
 0x1d3   : > { %10310 = vmatmul.mubr.msk.bf16.vlgmr.msra.gmra.mrb[0].mxu1 %vm879_vm6, %v1632_v4  ;;  %v2189_v4 = vld [vmem:[#allocation2 + $0x20] sm:$0xff] }
 0x1d4   : > { %10313 = vmatprep.mubr.msk.bf16.mxu1 %vm879_vm6, %v12431_v33  ;;  %10342 = vmatpush3.bf16.msra.mxu1 %v1992_v54  ;;  %v5156_v33 = vld [vmem:[#allocation2 + $0x180] sm:$0xff] }
 0x1d5   : > { %11864 = vmatprep.subr.msk.bf16.mxu1 %vm928_vm5, %v9304_v49  ;;  %v5730_v54 = vld [vmem:[#allocation2 + $0xda] sm:$0xff] }
 0x1d9   : > { %10734 = vmatmul.mubr.msk.bf16.gmra.mrb[16].mxu0 %vm879_vm6, %v12571_v12  ;;  %v5454_v12 = vld [vmem:[#allocation2 + $0x1b1] sm:$0xff] }
 0x1da   : > { %10737 = vmatprep.mubr.msk.bf16.mxu0 %vm879_vm6, %v12590_v60  ;;  %v5455_v60 = vld [vmem:[#allocation2 + $0x1b9] sm:$0xff] }
 0x1db   : > { %10314 = vmatmul.mubr.msk.bf16.gmra.mrb[4].mxu1 %vm879_vm6, %v12443_v45  ;;  %v5157_v45 = vld [vmem:[#allocation2 + $0x188] sm:$0xff]  ;;  %v5471_v6 = vpack.c.bf16 %v5455_v60, %v5454_v12  ;;  %v2205_v12 = vld [vmem:[#allocation2 + $0xe0] sm:$0xff] }
 0x1dc   : > { %10317 = vmatprep.mubr.msk.bf16.mxu1 %vm879_vm6, %v12447_v47  ;;  %v12739_v47 = vpack.c.bf16 %v5157_v45, %v5156_v33  ;;  %v2220_v45 = vpack.c.bf16 %v2189_v4, %v2188_v40  ;;  %v5746_v60 = vld [vmem:[#allocation2 + $0x19a] sm:$0xff] }
 0x1dd   : > { %v2210_v4 = vld [vmem:[#allocation2 + $0x120] sm:$0xff] }
 0x1e1   : > { %10738 = vmatmul.mubr.msk.bf16.gmra.mrb[20].mxu0 %vm879_vm6, %v12594_v24  ;;  %v5160_v24 = vld [vmem:[#allocation2 + $0x1b0] sm:$0xff] }
 0x1e2   : > { %10741 = vmatprep.mubr.msk.bf16.mxu0 %vm879_vm6, %v12606_v51  ;;  %v5718_v51 = vld [vmem:[#allocation2 + $0x4a] sm:$0xff] }
 0x1e3   : > { %10318 = vmatmul.mubr.msk.bf16.gmra.mrb[8].mxu1 %vm879_vm6, %v12465_v63  ;;  %v5161_v63 = vld [vmem:[#allocation2 + $0x1b8] sm:$0xff] }
 0x1e4   : > { %10321 = vmatprep.mubr.msk.bf16.mxu1 %vm879_vm6, %v12469_v1  ;;  %v5177_v1 = vpack.c.bf16 %v5161_v63, %v5160_v24  ;;  %v2192_v24 = vld [vmem:[#allocation2 + $0x48] sm:$0xff]  ;;  %v2193_v63 = vld [vmem:[#allocation2 + $0x50] sm:$0xff] }
 0x1e9   : > { %10742 = vmatmul.mubr.msk.bf16.gmra.mrb[24].mxu0 %vm879_vm6, %v12739_v47 }
 0x1ea   : > { %10745 = vmatprep.mubr.msk.bf16.mxu0 %vm879_vm6, %v5176_v36  ;;  %v5733_v36 = vld [vmem:[#allocation2 + $0xfa] sm:$0xff] }
 0x1eb   : > { %10322 = vmatmul.mubr.msk.bf16.gmra.mrb[12].mxu1 %vm879_vm6, %v12481_v20  ;;  %v5817_v20 = vsel %vm928_vm5, %v9508_v43, 0  ;;  %v12819_v43 = vpack.c.bf16 %v5719_v23, %v5718_v51  ;;  %v5747_v51 = vld [vmem:[#allocation2 + $0x1a2] sm:$0xff] }
 0x1ec   : > { %10325 = vmatprep.mubr.msk.bf16.mxu1 %vm879_vm6, %v12483_v22  ;;  %v9525_v22 = vld [vmem:[%s12080_s20 + $0x48] sm:$0xf] }
 0x1ed   : > { %v6111_v7 = vsel %vm928_vm5, %v9525_v22, 0 }
 0x1f1   : > { %10746 = vmatmul.mubr.msk.bf16.gmra.mrb[28].mxu0 %vm879_vm6, %v5177_v1  ;;  %v5734_v1 = vld [vmem:[#allocation2 + $0x10a] sm:$0xff] }
 0x1f2   : > { %10751 = vmatprep.mubr.msk.bf16.mxu0 %vm879_vm6, %v12368_v53  ;;  %v1893_v53 = vld [vmem:[#allocation2 + $0x4] sm:$0xff] }
 0x1f3   : > { %10326 = vmatmul.mubr.msk.bf16.gmra.mrb[16].mxu1 %vm879_vm6, %v12492_v39 }
 0x1f4   : > { %10329 = vmatprep.mubr.msk.bf16.mxu1 %vm879_vm6, %v12494_v41  ;;  %v1896_v41 = vld [vmem:[#allocation2 + $0x24] sm:$0xff] }
 0x1f9   : > { %10752 = vmatmul.mubr.msk.bf16.vlgmr.msra.gmra.mrb[0].mxu0 %vm879_vm6, %v12374_v56  ;;  %v1894_v56 = vld [vmem:[#allocation2 + $0xc] sm:$0xff] }
 0x1fa   : > { %10784 = vmatpush3.bf16.msra.mxu0 %v5817_v20  ;;  %10755 = vmatprep.mubr.msk.bf16.mxu0 %vm879_vm6, %v12386_v2  ;;  %v1925_v39 = vpack.c.bf16 %v1894_v56, %v1893_v53  ;;  %v1895_v2 = vld [vmem:[#allocation2 + $0x1c] sm:$0xff]  ;;  %v5735_v20 = vld [vmem:[#allocation2 + $0x112] sm:$0xff]  ;;  %v12869_v53 = vpack.c.bf16 %v5733_v36, %v5732_v25 }
 0x1fb   : > { %10330 = vmatmul.mubr.msk.bf16.gmra.mrb[20].mxu1 %vm879_vm6, %v12511_v3  ;;  %11878 = vmatprep.subr.msk.bf16.mxu0 %vm928_vm5, %v9525_v22  ;;  %v2287_v3 = vsel %vm928_vm5, %v9304_v49, 0  ;;  %v5731_v49 = vld [vmem:[#allocation2 + $0xe2] sm:$0xff]  ;;  %v12871_v56 = vpack.c.bf16 %v5735_v20, %v5734_v1 }
 0x1fc   : > { %10333 = vmatprep.mubr.msk.bf16.mxu1 %vm879_vm6, %v12515_v8  ;;  %v14413_v8 = vld [vmem:[#allocation10_spill] sm:$0xff]  ;;  %v12860_v59 = vpack.c.bf16 %v5731_v49, %v5730_v54  ;;  %v2211_v54 = vld [vmem:[#allocation2 + $0x128] sm:$0xff]  ;;  %v6016_v25 = vld [vmem:[#allocation2 + $0x7b] sm:$0xff] }
 0x1fd   : > { %v6014_v49 = vld [vmem:[#allocation2 + $0x63] sm:$0xff] }
 0x1fe   : > { %v6017_v36 = vld [vmem:[#allocation2 + $0x83] sm:$0xff] }
 0x1ff   : > { %v12942_v20 = vpack.c.bf16 %v6017_v36, %v6016_v25  ;;  %v2488_v25 = vld [vmem:[#allocation2 + $0x61] sm:$0xff]  ;;  %v2489_v36 = vld [vmem:[#allocation2 + $0x69] sm:$0xff] }
 0x201   : > { %10756 = vmatmul.mubr.msk.bf16.gmra.mrb[4].mxu0 %vm879_vm6, %v12391_v5  ;;  %v1926_v5 = vpack.c.bf16 %v1896_v41, %v1895_v2  ;;  %v12877_v2 = vld [vmem:[%s12080_s20 + $0x1c] sm:$0xf]  ;;  %v2194_v41 = vld [vmem:[#allocation2 + $0x60] sm:$0xff] }
 0x202   : > { %10759 = vmatprep.mubr.msk.bf16.mxu0 %vm879_vm6, %v12404_v15  ;;  %v12784_v15 = vld [vmem:[%s12080_s20 + $0x18] sm:$0xf] }
 0x203   : > { %10334 = vmatmul.mubr.msk.bf16.gmra.mrb[24].mxu1 %vm879_vm6, %v12527_v27  ;;  %v14414_v27 = vld [vmem:[#allocation7_spill] sm:$0xff] }
 0x204   : > { %10337 = vmatprep.mubr.msk.bf16.mxu1 %vm879_vm6, %v12531_v34  ;;  %v5450_v34 = vld [vmem:[#allocation2 + $0x181] sm:$0xff] }
 0x209   : > { %10760 = vmatmul.mubr.msk.bf16.gmra.mrb[8].mxu0 %vm879_vm6, %v12408_v17  ;;  %v14409_v17 = vld [vmem:[#allocation8_spill] sm:$0xff] }
 0x20a   : > { %10763 = vmatprep.mubr.msk.bf16.mxu0 %vm879_vm6, %v12425_v30  ;;  %v14410_v30 = vld [vmem:[#allocation5_spill] sm:$0xff] }
 0x20b   : > { %10338 = vmatmul.mubr.msk.bf16.gmra.mrb[28].mxu1 %vm879_vm6, %v12543_v58  ;;  %v5452_v58 = vld [vmem:[#allocation2 + $0x199] sm:$0xff] }
 0x20c   : > { %10343 = vmatprep.mubr.msk.bf16.mxu1 %vm879_vm6, %v1925_v39  ;;  %v2581_v39 = vsel %vm928_vm5, %v12784_v15, 0 }
 0x211   : > { %10764 = vmatmul.mubr.msk.bf16.gmra.mrb[12].mxu0 %vm879_vm6, %v12429_v32  ;;  %v14411_v32 = vld [vmem:[#allocation9_spill] sm:$0xff] }
 0x212   : > { %10767 = vmatprep.mubr.msk.bf16.mxu0 %vm879_vm6, %v12441_v44  ;;  %v14412_v44 = vld [vmem:[#allocation6_spill] sm:$0xff] }
 0x213   : > { %10344 = vmatmul.mubr.msk.bf16.vlgmr.msra.gmra.mrb[0].mxu1 %vm879_vm6, %v1926_v5  ;;  %v2195_v5 = vld [vmem:[#allocation2 + $0x68] sm:$0xff] }
 0x214   : > { %10347 = vmatprep.mubr.msk.bf16.mxu1 %vm879_vm6, %v12558_v38  ;;  %10376 = vmatpush3.bf16.msra.mxu1 %v2287_v3  ;;  %v5453_v38 = vld [vmem:[#allocation2 + $0x1a1] sm:$0xff]  ;;  %v2196_v3 = vld [vmem:[#allocation2 + $0x78] sm:$0xff] }
 0x215   : > { %11865 = vmatprep.subr.msk.bf16.mxu1 %vm928_vm5, %v12784_v15  ;;  %v12886_v15 = vpack.c.bf16 %v2195_v5, %v2194_v41  ;;  %v2215_v41 = vld [vmem:[#allocation2 + $0x158] sm:$0xff] }
 0x216   : > { %v6018_v5 = vld [vmem:[#allocation2 + $0x93] sm:$0xff] }
 0x219   : > { %10768 = vmatmul.mubr.msk.bf16.gmra.mrb[16].mxu0 %vm879_vm6, %v12445_v46  ;;  %v5451_v46 = vld [vmem:[#allocation2 + $0x189] sm:$0xff] }
 0x21a   : > { %10771 = vmatprep.mubr.msk.bf16.mxu0 %vm879_vm6, %v14410_v30  ;;  %v12810_v10 = vpack.c.bf16 %v5451_v46, %v5450_v34 }
 0x21b   : > { %10348 = vmatmul.mubr.msk.bf16.gmra.mrb[4].mxu1 %vm879_vm6, %v12569_v11  ;;  %v5470_v11 = vpack.c.bf16 %v5453_v38, %v5452_v58  ;;  %v2203_v58 = vld [vmem:[#allocation2 + $0xc8] sm:$0xff] }
 0x21c   : > { %10351 = vmatprep.mubr.msk.bf16.mxu1 %vm879_vm6, %v14409_v17  ;;  %v2197_v17 = vld [vmem:[#allocation2 + $0x80] sm:$0xff] }
 0x21d   : > { %v12888_v30 = vpack.c.bf16 %v2197_v17, %v2196_v3  ;;  %v5744_v38 = vld [vmem:[#allocation2 + $0x182] sm:$0xff]  ;;  %v2217_v17 = vld [vmem:[#allocation2 + $0x170] sm:$0xff] }
 0x21e   : > { %v6019_v3 = vld [vmem:[#allocation2 + $0x9b] sm:$0xff] }
 0x221   : > { %10772 = vmatmul.mubr.msk.bf16.gmra.mrb[20].mxu0 %vm879_vm6, %v14412_v44  ;;  %v2199_v44 = vld [vmem:[#allocation2 + $0x98] sm:$0xff] }
 0x222   : > { %10775 = vmatprep.mubr.msk.bf16.mxu0 %vm879_vm6, %v14414_v27  ;;  %v2201_v27 = vld [vmem:[#allocation2 + $0xb0] sm:$0xff] }
 0x223   : > { %10352 = vmatmul.mubr.msk.bf16.gmra.mrb[8].mxu1 %vm879_vm6, %v14411_v32  ;;  %v2198_v32 = vld [vmem:[#allocation2 + $0x90] sm:$0xff] }
 0x224   : > { %10355 = vmatprep.mubr.msk.bf16.mxu1 %vm879_vm6, %v14413_v8  ;;  %v2200_v8 = vld [vmem:[#allocation2 + $0xa8] sm:$0xff]  ;;  %v12898_v34 = vpack.c.bf16 %v2199_v44, %v2198_v32  ;;  %v6021_v44 = vld [vmem:[#allocation2 + $0xb3] sm:$0xff] }
 0x225   : > { %v12900_v46 = vpack.c.bf16 %v2201_v27, %v2200_v8  ;;  %v6020_v32 = vld [vmem:[#allocation2 + $0xab] sm:$0xff]  ;;  %v12961_v27 = vpack.c.bf16 %v6019_v3, %v6018_v5  ;;  %v2491_v5 = vld [vmem:[#allocation2 + $0x81] sm:$0xff] }
 0x226   : > { %v6033_v3 = vld [vmem:[#allocation2 + $0x143] sm:$0xff] }
 0x229   : > { %10776 = vmatmul.mubr.msk.bf16.gmra.mrb[24].mxu0 %vm879_vm6, %v12810_v10 }
 0x22a   : > { %10779 = vmatprep.mubr.msk.bf16.mxu0 %vm879_vm6, %v5470_v11  ;;  %v2204_v11 = vld [vmem:[#allocation2 + $0xd8] sm:$0xff] }
 0x22b   : > { %10356 = vmatmul.mubr.msk.bf16.gmra.mrb[12].mxu1 %vm879_vm6, %v12608_v52  ;;  %v5721_v52 = vld [vmem:[#allocation2 + $0x6a] sm:$0xff] }
 0x22c   : > { %10359 = vmatprep.mubr.msk.bf16.mxu1 %vm879_vm6, %v12610_v9  ;;  %v5720_v9 = vld [vmem:[#allocation2 + $0x62] sm:$0xff] }
 0x22d   : > { %v12828_v61 = vpack.c.bf16 %v5721_v52, %v5720_v9  ;;  %v12914_v9 = vpack.c.bf16 %v2205_v12, %v2204_v11  ;;  %v2207_v52 = vld [vmem:[#allocation2 + $0xf8] sm:$0xff]  ;;  %v2483_v12 = vld [vmem:[#allocation2 + $0x21] sm:$0xff] }
 0x22e   : > { %v2482_v11 = vld [vmem:[#allocation2 + $0x19] sm:$0xff] }
 0x231   : > { %10780 = vmatmul.mubr.msk.bf16.gmra.mrb[28].mxu0 %vm879_vm6, %v5471_v6 }
 0x232   : > { %10785 = vmatprep.mubr.msk.bf16.mxu0 %vm879_vm6, %v12819_v43 }
 0x233   : > { %10360 = vmatmul.mubr.msk.bf16.gmra.mrb[16].mxu1 %vm879_vm6, %v12619_v42  ;;  %v12836_v42 = vld [vmem:[%s12080_s20 + $0x4c] sm:$0xf] }
 0x234   : > { %10363 = vmatprep.mubr.msk.bf16.mxu1 %vm879_vm6, %v12621_v50  ;;  %v5724_v50 = vld [vmem:[#allocation2 + $0x92] sm:$0xff] }
 0x239   : > { %10786 = vmatmul.mubr.msk.bf16.vlgmr.msra.gmra.mrb[0].mxu0 %vm879_vm6, %v12828_v61 }
 0x23a   : > { %10818 = vmatpush3.bf16.msra.mxu0 %v6111_v7  ;;  %10789 = vmatprep.mubr.msk.bf16.mxu0 %vm879_vm6, %v12830_v0  ;;  %v2208_v7 = vld [vmem:[#allocation2 + $0x108] sm:$0xff] }
 0x23b   : > { %10364 = vmatmul.mubr.msk.bf16.gmra.mrb[20].mxu1 %vm879_vm6, %v12637_v48  ;;  %11879 = vmatprep.subr.msk.bf16.mxu0 %vm928_vm5, %v12836_v42  ;;  %v12846_v48 = vpack.c.bf16 %v5725_v26, %v5724_v50  ;;  %v2209_v50 = vld [vmem:[#allocation2 + $0x110] sm:$0xff] }
 0x23c   : > { %10367 = vmatprep.mubr.msk.bf16.mxu1 %vm879_vm6, %v12639_v21  ;;  %v5728_v21 = vld [vmem:[#allocation2 + $0xc2] sm:$0xff]  ;;  %v6012_v26 = vld [vmem:[#allocation2 + $0x4b] sm:$0xff] }
 0x23d   : > { %v12858_v33 = vpack.c.bf16 %v5729_v28, %v5728_v21  ;;  %v5765_v21 = vpack.c.bf16 %v5749_v18, %v5748_v16  ;;  %v12925_v28 = vpack.c.bf16 %v2209_v50, %v2208_v7  ;;  %v12927_v40 = vpack.c.bf16 %v6013_v62, %v6012_v26  ;;  %v2484_v16 = vld [vmem:[#allocation2 + $0x31] sm:$0xff]  ;;  %v2485_v18 = vld [vmem:[#allocation2 + $0x39] sm:$0xff]  ;;  %v2486_v26 = vld [vmem:[#allocation2 + $0x49] sm:$0xff] }
 0x23e   : > { %v6026_v7 = vld [vmem:[#allocation2 + $0xf3] sm:$0xff]  ;;  %v6027_v50 = vld [vmem:[#allocation2 + $0xfb] sm:$0xff] }
 0x23f   : > { %v2487_v62 = vld [vmem:[#allocation2 + $0x51] sm:$0xff] }
 0x241   : > { %10790 = vmatmul.mubr.msk.bf16.gmra.mrb[4].mxu0 %vm879_vm6, %v12846_v48 }
 0x242   : > { %10793 = vmatprep.mubr.msk.bf16.mxu0 %vm879_vm6, %v12848_v57 }
 0x243   : > { %10368 = vmatmul.mubr.msk.bf16.gmra.mrb[24].mxu1 %vm879_vm6, %v12649_v14  ;;  %v2190_v14 = vld [vmem:[#allocation2 + $0x30] sm:$0xff] }
 0x244   : > { %10371 = vmatprep.mubr.msk.bf16.mxu1 %vm879_vm6, %v12651_v13  ;;  %v2191_v13 = vld [vmem:[#allocation2 + $0x38] sm:$0xff] }
 0x245   : > { %v2221_v22 = vpack.c.bf16 %v2191_v13, %v2190_v14  ;;  %v2212_v14 = vld [vmem:[#allocation2 + $0x138] sm:$0xff]  ;;  %v2213_v13 = vld [vmem:[#allocation2 + $0x140] sm:$0xff] }
 0x246   : > { %v12940_v1 = vpack.c.bf16 %v2213_v13, %v2212_v14  ;;  %v2875_v14 = vsel %vm928_vm5, %v12877_v2, 0  ;;  %v12994_v13 = vld [vmem:[%s12080_s20 + $0x20] sm:$0xf] }
 0x249   : > { %10794 = vmatmul.mubr.msk.bf16.gmra.mrb[8].mxu0 %vm879_vm6, %v12858_v33 }
 0x24a   : > { %10797 = vmatprep.mubr.msk.bf16.mxu0 %vm879_vm6, %v12860_v59 }
 0x24b   : > { %10372 = vmatmul.mubr.msk.bf16.gmra.mrb[28].mxu1 %vm879_vm6, %v12661_v29  ;;  %v2222_v29 = vpack.c.bf16 %v2193_v63, %v2192_v24  ;;  %v12936_v24 = vpack.c.bf16 %v2211_v54, %v2210_v4  ;;  %v6029_v4 = vld [vmem:[#allocation2 + $0x113] sm:$0xff]  ;;  %v2515_v54 = vpack.c.bf16 %v2485_v18, %v2484_v16 }
 0x24c   : > { %10377 = vmatprep.mubr.msk.bf16.mxu1 %vm879_vm6, %v2220_v45  ;;  %v6015_v45 = vld [vmem:[#allocation2 + $0x6b] sm:$0xff]  ;;  %v6037_v16 = vld [vmem:[#allocation2 + $0x173] sm:$0xff] }
 0x24d   : > { %v12938_v63 = vpack.c.bf16 %v6015_v45, %v6014_v49  ;;  %v12986_v49 = vpack.c.bf16 %v6027_v50, %v6026_v7 }
 0x251   : > { %10798 = vmatmul.mubr.msk.bf16.gmra.mrb[12].mxu0 %vm879_vm6, %v12869_v53 }
 0x252   : > { %10801 = vmatprep.mubr.msk.bf16.mxu0 %vm879_vm6, %v12871_v56 }
 0x253   : > { %10378 = vmatmul.mubr.msk.bf16.vlgmr.msra.gmra.mrb[0].mxu1 %vm879_vm6, %v2221_v22  ;;  %v6405_v22 = vsel %vm928_vm5, %v12836_v42, 0  ;;  %v2216_v42 = vld [vmem:[#allocation2 + $0x168] sm:$0xff] }
 0x254   : > { %10381 = vmatprep.mubr.msk.bf16.mxu1 %vm879_vm6, %v2222_v29  ;;  %10410 = vmatpush3.bf16.msra.mxu1 %v2581_v39  ;;  %v12949_v29 = vld [vmem:[%s12080_s20 + $0x50] sm:$0xf] }
 0x255   : > { %11866 = vmatprep.subr.msk.bf16.mxu1 %vm928_vm5, %v12877_v2  ;;  %v2214_v39 = vld [vmem:[#allocation2 + $0x150] sm:$0xff]  ;;  %v6032_v2 = vld [vmem:[#allocation2 + $0x13b] sm:$0xff] }
 0x256   : > { %v12959_v8 = vpack.c.bf16 %v2215_v41, %v2214_v39  ;;  %v6031_v39 = vld [vmem:[#allocation2 + $0x12b] sm:$0xff]  ;;  %v2490_v41 = vld [vmem:[#allocation2 + $0x79] sm:$0xff] }
 0x259   : > { %10802 = vmatmul.mubr.msk.bf16.gmra.mrb[16].mxu0 %vm879_vm6, %v12677_v37  ;;  %v2202_v37 = vld [vmem:[#allocation2 + $0xc0] sm:$0xff] }
 0x25a   : > { %10805 = vmatprep.mubr.msk.bf16.mxu0 %vm879_vm6, %v12691_v19  ;;  %v5745_v19 = vld [vmem:[#allocation2 + $0x18a] sm:$0xff]  ;;  %v12910_v23 = vpack.c.bf16 %v2203_v58, %v2202_v37  ;;  %v12963_v37 = vpack.c.bf16 %v2217_v17, %v2216_v42  ;;  %v12965_v58 = vpack.c.bf16 %v6021_v44, %v6020_v32  ;;  %v13003_v42 = vpack.c.bf16 %v2489_v36, %v2488_v25  ;;  %v6040_v25 = vld [vmem:[#allocation2 + $0x19b] sm:$0xff] }
 0x25b   : > { %10382 = vmatmul.mubr.msk.bf16.gmra.mrb[4].mxu1 %vm879_vm6, %v12886_v15  ;;  %v12912_v6 = vpack.c.bf16 %v5745_v19, %v5744_v38  ;;  %v6022_v38 = vld [vmem:[#allocation2 + $0xc3] sm:$0xff]  ;;  %v6023_v19 = vld [vmem:[#allocation2 + $0xcb] sm:$0xff]  ;;  %v13007_v32 = vpack.c.bf16 %v2491_v5, %v2490_v41  ;;  %v13009_v44 = vpack.c.bf16 %v6033_v3, %v6032_v2  ;;  %v2501_v3 = vld [vmem:[#allocation2 + $0xf9] sm:$0xff] }
 0x25c   : > { %10385 = vmatprep.mubr.msk.bf16.mxu1 %vm879_vm6, %v12888_v30  ;;  %v6041_v36 = vld [vmem:[#allocation2 + $0x1a3] sm:$0xff]  ;;  %v2500_v2 = vld [vmem:[#allocation2 + $0xf1] sm:$0xff] }
 0x25d   : > { %v6058_v5 = vpack.c.bf16 %v6041_v36, %v6040_v25  ;;  %v2506_v25 = vld [vmem:[#allocation2 + $0x139] sm:$0xff]  ;;  %v2507_v36 = vld [vmem:[#allocation2 + $0x141] sm:$0xff] }
 0x261   : > { %10806 = vmatmul.mubr.msk.bf16.gmra.mrb[20].mxu0 %vm879_vm6, %v12693_v31  ;;  %v5764_v31 = vpack.c.bf16 %v5747_v51, %v5746_v60  ;;  %v6024_v60 = vld [vmem:[#allocation2 + $0xdb] sm:$0xff]  ;;  %v6025_v51 = vld [vmem:[#allocation2 + $0xe3] sm:$0xff] }
 0x262   : > { %10809 = vmatprep.mubr.msk.bf16.mxu0 %vm879_vm6, %v12703_v55  ;;  %v2206_v55 = vld [vmem:[#allocation2 + $0xf0] sm:$0xff] }
 0x263   : > { %10386 = vmatmul.mubr.msk.bf16.gmra.mrb[8].mxu1 %vm879_vm6, %v12898_v34  ;;  %v12923_v35 = vpack.c.bf16 %v2207_v52, %v2206_v55  ;;  %v2514_v55 = vpack.c.bf16 %v2483_v12, %v2482_v11  ;;  %v12977_v52 = vpack.c.bf16 %v6025_v51, %v6024_v60  ;;  %v6034_v11 = vld [vmem:[#allocation2 + $0x153] sm:$0xff]  ;;  %v6035_v12 = vld [vmem:[#allocation2 + $0x15b] sm:$0xff]  ;;  %v2494_v60 = vld [vmem:[#allocation2 + $0xa9] sm:$0xff] }
 0x264   : > { %10389 = vmatprep.mubr.msk.bf16.mxu1 %vm879_vm6, %v12900_v46  ;;  %v2495_v51 = vld [vmem:[#allocation2 + $0xb1] sm:$0xff]  ;;  %v13021_v7 = vpack.c.bf16 %v6035_v12, %v6034_v11  ;;  %v2502_v11 = vld [vmem:[#allocation2 + $0x109] sm:$0xff] }
 0x265   : > { %v13023_v50 = vpack.c.bf16 %v2495_v51, %v2494_v60  ;;  %v2503_v12 = vld [vmem:[#allocation2 + $0x111] sm:$0xff] }
 0x266   : > { %v6306_v60 = vld [vmem:[#allocation2 + $0x4c] sm:$0xff]  ;;  %v6307_v51 = vld [vmem:[#allocation2 + $0x54] sm:$0xff] }
 0x269   : > { %10810 = vmatmul.mubr.msk.bf16.gmra.mrb[24].mxu0 %vm879_vm6, %v12912_v6 }
 0x26a   : > { %10813 = vmatprep.mubr.msk.bf16.mxu0 %vm879_vm6, %v5764_v31  ;;  %v12975_v31 = vpack.c.bf16 %v6023_v19, %v6022_v38  ;;  %v2492_v38 = vld [vmem:[#allocation2 + $0x91] sm:$0xff]  ;;  %v2493_v19 = vld [vmem:[#allocation2 + $0x99] sm:$0xff] }
 0x26b   : > { %10390 = vmatmul.mubr.msk.bf16.gmra.mrb[12].mxu1 %vm879_vm6, %v12910_v23  ;;  %v13019_v18 = vpack.c.bf16 %v2493_v19, %v2492_v38  ;;  %v6042_v38 = vld [vmem:[#allocation2 + $0x1b3] sm:$0xff]  ;;  %v6043_v19 = vld [vmem:[#allocation2 + $0x1bb] sm:$0xff] }
 0x26c   : > { %10393 = vmatprep.mubr.msk.bf16.mxu1 %vm879_vm6, %v12914_v9 }
 0x271   : > { %10814 = vmatmul.mubr.msk.bf16.gmra.mrb[28].mxu0 %vm879_vm6, %v5765_v21  ;;  %v6028_v21 = vld [vmem:[#allocation2 + $0x10b] sm:$0xff] }
 0x272   : > { %10819 = vmatprep.mubr.msk.bf16.mxu0 %vm879_vm6, %v12927_v40  ;;  %v12988_v45 = vpack.c.bf16 %v6029_v4, %v6028_v21  ;;  %v2497_v21 = vld [vmem:[#allocation2 + $0xc9] sm:$0xff] }
 0x273   : > { %10394 = vmatmul.mubr.msk.bf16.gmra.mrb[16].mxu1 %vm879_vm6, %v12923_v35  ;;  %v6038_v4 = vld [vmem:[#allocation2 + $0x183] sm:$0xff] }
 0x274   : > { %10397 = vmatprep.mubr.msk.bf16.mxu1 %vm879_vm6, %v12925_v28 }
 0x279   : > { %10820 = vmatmul.mubr.msk.bf16.vlgmr.msra.gmra.mrb[0].mxu0 %vm879_vm6, %v12938_v63 }
 0x27a   : > { %10852 = vmatpush3.bf16.msra.mxu0 %v6405_v22  ;;  %10823 = vmatprep.mubr.msk.bf16.mxu0 %vm879_vm6, %v12942_v20  ;;  %v6030_v22 = vld [vmem:[#allocation2 + $0x123] sm:$0xff] }
 0x27b   : > { %10398 = vmatmul.mubr.msk.bf16.gmra.mrb[20].mxu1 %vm879_vm6, %v12936_v24  ;;  %11880 = vmatprep.subr.msk.bf16.mxu0 %vm928_vm5, %v12949_v29  ;;  %v13005_v17 = vpack.c.bf16 %v6031_v39, %v6030_v22 }
 0x27c   : > { %10401 = vmatprep.mubr.msk.bf16.mxu1 %vm879_vm6, %v12940_v1 }
 0x281   : > { %10824 = vmatmul.mubr.msk.bf16.gmra.mrb[4].mxu0 %vm879_vm6, %v12961_v27 }
 0x282   : > { %10827 = vmatprep.mubr.msk.bf16.mxu0 %vm879_vm6, %v12965_v58 }
 0x283   : > { %10402 = vmatmul.mubr.msk.bf16.gmra.mrb[24].mxu1 %vm879_vm6, %v12959_v8 }
 0x284   : > { %10405 = vmatprep.mubr.msk.bf16.mxu1 %vm879_vm6, %v12963_v37 }
 0x289   : > { %10828 = vmatmul.mubr.msk.bf16.gmra.mrb[8].mxu0 %vm879_vm6, %v12975_v31 }
 0x28a   : > { %10831 = vmatprep.mubr.msk.bf16.mxu0 %vm879_vm6, %v12977_v52 }
 0x28b   : > { %10406 = vmatmul.mubr.msk.bf16.gmra.mrb[28].mxu1 %vm879_vm6, %v12739_v47  ;;  %v2516_v47 = vpack.c.bf16 %v2487_v62, %v2486_v26  ;;  %v2496_v62 = vld [vmem:[#allocation2 + $0xc1] sm:$0xff] }
 0x28c   : > { %10411 = vmatprep.mubr.msk.bf16.mxu1 %vm879_vm6, %v2514_v55  ;;  %v6036_v55 = vld [vmem:[#allocation2 + $0x16b] sm:$0xff]  ;;  %v13035_v22 = vpack.c.bf16 %v2497_v21, %v2496_v62  ;;  %v13050_v62 = vpack.c.bf16 %v2503_v12, %v2502_v11  ;;  %v13052_v21 = vpack.c.bf16 %v6307_v51, %v6306_v60  ;;  %v6700_v12 = vsel %vm928_vm5, %v12949_v29, 0  ;;  %v13074_v60 = vld [vmem:[%s12080_s20 + $0x54] sm:$0xf] }
 0x28d   : > { %v13025_v26 = vpack.c.bf16 %v6037_v16, %v6036_v55  ;;  %v13048_v55 = vpack.c.bf16 %v2501_v3, %v2500_v2  ;;  %v6059_v16 = vpack.c.bf16 %v6043_v19, %v6042_v38  ;;  %v6311_v2 = vld [vmem:[#allocation2 + $0x84] sm:$0xff]  ;;  %v13065_v19 = vpack.c.bf16 %v2507_v36, %v2506_v25  ;;  %v2508_v51 = vld [vmem:[#allocation2 + $0x151] sm:$0xff] }
 0x28e   : > { %v2510_v29 = vld [vmem:[#allocation2 + $0x169] sm:$0xff]  ;;  %v6315_v25 = vld [vmem:[#allocation2 + $0xb4] sm:$0xff] }
 0x28f   : > { %14415 = vst [vmem:[#allocation8_spill] sm:$0xff] %v13065_v19 }
 0x291   : > { %10832 = vmatmul.mubr.msk.bf16.gmra.mrb[12].mxu0 %vm879_vm6, %v12986_v49 }
 0x292   : > { %10835 = vmatprep.mubr.msk.bf16.mxu0 %vm879_vm6, %v12988_v45 }
 0x293   : > { %10412 = vmatmul.mubr.msk.bf16.vlgmr.msra.gmra.mrb[0].mxu1 %vm879_vm6, %v2515_v54  ;;  %v6039_v54 = vld [vmem:[#allocation2 + $0x18b] sm:$0xff] }
 0x294   : > { %10415 = vmatprep.mubr.msk.bf16.mxu1 %vm879_vm6, %v2516_v47  ;;  %10444 = vmatpush3.bf16.msra.mxu1 %v2875_v14  ;;  %v2498_v47 = vld [vmem:[#allocation2 + $0xd9] sm:$0xff]  ;;  %v2499_v14 = vld [vmem:[#allocation2 + $0xe1] sm:$0xff]  ;;  %v13037_v39 = vpack.c.bf16 %v6039_v54, %v6038_v4  ;;  %v2505_v54 = vld [vmem:[#allocation2 + $0x129] sm:$0xff] }
 0x295   : > { %11867 = vmatprep.subr.msk.bf16.mxu1 %vm928_vm5, %v12994_v13  ;;  %v13039_v41 = vpack.c.bf16 %v2499_v14, %v2498_v47  ;;  %v2504_v4 = vld [vmem:[#allocation2 + $0x121] sm:$0xff]  ;;  %v6309_v14 = vld [vmem:[#allocation2 + $0x6c] sm:$0xff] }
 0x296   : > { %v6308_v47 = vld [vmem:[#allocation2 + $0x64] sm:$0xff]  ;;  %v13061_v3 = vpack.c.bf16 %v2505_v54, %v2504_v4  ;;  %v6312_v4 = vld [vmem:[#allocation2 + $0x94] sm:$0xff]  ;;  %v6313_v54 = vld [vmem:[#allocation2 + $0x9c] sm:$0xff] }
 0x297   : > { %v13063_v38 = vpack.c.bf16 %v6309_v14, %v6308_v47  ;;  %v2511_v47 = vld [vmem:[#allocation2 + $0x171] sm:$0xff] }
 0x298   : > { %v6314_v14 = vld [vmem:[#allocation2 + $0xac] sm:$0xff] }
 0x299   : > { %10836 = vmatmul.mubr.msk.bf16.gmra.mrb[16].mxu0 %vm879_vm6, %v13005_v17 }
 0x29a   : > { %10839 = vmatprep.mubr.msk.bf16.mxu0 %vm879_vm6, %v13009_v44 }
 0x29b   : > { %10416 = vmatmul.mubr.msk.bf16.gmra.mrb[4].mxu1 %vm879_vm6, %v13003_v42 }
 0x29c   : > { %10419 = vmatprep.mubr.msk.bf16.mxu1 %vm879_vm6, %v13007_v32 }
 0x2a1   : > { %10840 = vmatmul.mubr.msk.bf16.gmra.mrb[20].mxu0 %vm879_vm6, %v13021_v7 }
 0x2a2   : > { %10843 = vmatprep.mubr.msk.bf16.mxu0 %vm879_vm6, %v13025_v26 }
 0x2a3   : > { %10420 = vmatmul.mubr.msk.bf16.gmra.mrb[8].mxu1 %vm879_vm6, %v13019_v18 }
 0x2a4   : > { %10423 = vmatprep.mubr.msk.bf16.mxu1 %vm879_vm6, %v13023_v50 }
 0x2a9   : > { %10844 = vmatmul.mubr.msk.bf16.gmra.mrb[24].mxu0 %vm879_vm6, %v13037_v39 }
 0x2aa   : > { %10847 = vmatprep.mubr.msk.bf16.mxu0 %vm879_vm6, %v6058_v5  ;;  %v6310_v5 = vld [vmem:[#allocation2 + $0x7c] sm:$0xff] }
 0x2ab   : > { %10424 = vmatmul.mubr.msk.bf16.gmra.mrb[12].mxu1 %vm879_vm6, %v13035_v22  ;;  %v13067_v11 = vpack.c.bf16 %v6311_v2, %v6310_v5  ;;  %v13086_v5 = vpack.c.bf16 %v6313_v54, %v6312_v4  ;;  %v13088_v2 = vpack.c.bf16 %v2511_v47, %v2510_v29  ;;  %v2777_v4 = vld [vmem:[#allocation2 + $0x22] sm:$0xff] }
 0x2ac   : > { %10427 = vmatprep.mubr.msk.bf16.mxu1 %vm879_vm6, %v13039_v41  ;;  %v6318_v54 = vld [vmem:[#allocation2 + $0xdc] sm:$0xff]  ;;  %v6319_v29 = vld [vmem:[#allocation2 + $0xe4] sm:$0xff] }
 0x2ad   : > { %14416 = vst [vmem:[#allocation5_spill] sm:$0xff] %v13086_v5  ;;  %14417 = vst [vmem:[#allocation9_spill] sm:$0xff] %v13088_v2 }
 0x2b1   : > { %10848 = vmatmul.mubr.msk.bf16.gmra.mrb[28].mxu0 %vm879_vm6, %v6059_v16  ;;  %v2509_v16 = vld [vmem:[#allocation2 + $0x159] sm:$0xff] }
 0x2b2   : > { %10853 = vmatprep.mubr.msk.bf16.mxu0 %vm879_vm6, %v13052_v21  ;;  %v13084_v36 = vpack.c.bf16 %v2509_v16, %v2508_v51  ;;  %v6317_v51 = vld [vmem:[#allocation2 + $0xcc] sm:$0xff]  ;;  %v2776_v16 = vld [vmem:[#allocation2 + $0x1a] sm:$0xff] }
 0x2b3   : > { %10428 = vmatmul.mubr.msk.bf16.gmra.mrb[16].mxu1 %vm879_vm6, %v13048_v55 }
 0x2b4   : > { %10431 = vmatprep.mubr.msk.bf16.mxu1 %vm879_vm6, %v13050_v62 }
 0x2b9   : > { %10854 = vmatmul.mubr.msk.bf16.vlgmr.msra.gmra.mrb[0].mxu0 %vm879_vm6, %v13063_v38 }
 0x2ba   : > { %10886 = vmatpush3.bf16.msra.mxu0 %v6700_v12  ;;  %10857 = vmatprep.mubr.msk.bf16.mxu0 %vm879_vm6, %v13067_v11  ;;  %v6316_v12 = vld [vmem:[#allocation2 + $0xc4] sm:$0xff] }
 0x2bb   : > { %10432 = vmatmul.mubr.msk.bf16.gmra.mrb[20].mxu1 %vm879_vm6, %v13061_v3  ;;  %11881 = vmatprep.subr.msk.bf16.mxu0 %vm928_vm5, %v13074_v60  ;;  %v13100_v47 = vpack.c.bf16 %v6317_v51, %v6316_v12  ;;  %v6321_v12 = vld [vmem:[#allocation2 + $0xfc] sm:$0xff]  ;;  %v6322_v51 = vld [vmem:[#allocation2 + $0x10c] sm:$0xff] }
 0x2bc   : > { %10435 = vmatprep.mubr.msk.bf16.mxu1 %vm879_vm6, %v13065_v19  ;;  %v13090_v19 = vpack.c.bf16 %v6315_v25, %v6314_v14  ;;  %v2808_v14 = vpack.c.bf16 %v2777_v4, %v2776_v16  ;;  %v13102_v25 = vpack.c.bf16 %v6319_v29, %v6318_v54  ;;  %v6323_v16 = vld [vmem:[#allocation2 + $0x114] sm:$0xff] }
 0x2bd   : > { %v13113_v29 = vpack.c.bf16 %v6323_v16, %v6322_v51  ;;  %v6329_v16 = vld [vmem:[#allocation2 + $0x15c] sm:$0xff] }
 0x2be   : > { %14418 = vst [vmem:[#allocation6_spill] sm:$0xff] %v13090_v19 }
 0x2c1   : > { %10858 = vmatmul.mubr.msk.bf16.gmra.mrb[4].mxu0 %vm879_vm6, %v13086_v5  ;;  %v6320_v5 = vld [vmem:[#allocation2 + $0xf4] sm:$0xff] }
 0x2c2   : > { %10861 = vmatprep.mubr.msk.bf16.mxu0 %vm879_vm6, %v13090_v19  ;;  %v2778_v19 = vld [vmem:[#allocation2 + $0x32] sm:$0xff]  ;;  %v13111_v54 = vpack.c.bf16 %v6321_v12, %v6320_v5  ;;  %v6327_v12 = vld [vmem:[#allocation2 + $0x144] sm:$0xff] }
 0x2c3   : > { %10436 = vmatmul.mubr.msk.bf16.gmra.mrb[24].mxu1 %vm879_vm6, %v13084_v36  ;;  %v6325_v5 = vld [vmem:[#allocation2 + $0x12c] sm:$0xff] }
 0x2c4   : > { %10439 = vmatprep.mubr.msk.bf16.mxu1 %vm879_vm6, %v13088_v2  ;;  %v2779_v2 = vld [vmem:[#allocation2 + $0x3a] sm:$0xff] }
 0x2c5   : > { %v2809_v4 = vpack.c.bf16 %v2779_v2, %v2778_v19  ;;  %v6324_v19 = vld [vmem:[#allocation2 + $0x124] sm:$0xff]  ;;  %v6326_v2 = vld [vmem:[#allocation2 + $0x13c] sm:$0xff] }
 0x2c6   : > { %v13131_v51 = vpack.c.bf16 %v6327_v12, %v6326_v2  ;;  %v6334_v2 = vld [vmem:[#allocation2 + $0x19c] sm:$0xff]  ;;  %v6335_v12 = vld [vmem:[#allocation2 + $0x1a4] sm:$0xff] }
 0x2c9   : > { %10862 = vmatmul.mubr.msk.bf16.gmra.mrb[8].mxu0 %vm879_vm6, %v13100_v47 }
 0x2ca   : > { %10865 = vmatprep.mubr.msk.bf16.mxu0 %vm879_vm6, %v13102_v25 }
 0x2cb   : > { %10440 = vmatmul.mubr.msk.bf16.gmra.mrb[28].mxu1 %vm879_vm6, %v12810_v10  ;;  %v3169_v10 = vsel %vm928_vm5, %v12994_v13, 0  ;;  %v13129_v13 = vpack.c.bf16 %v6325_v5, %v6324_v19 }
 0x2cc   : > { %10445 = vmatprep.mubr.msk.bf16.mxu1 %vm879_vm6, %v2808_v14  ;;  %v13119_v14 = vld [vmem:[%s12080_s20 + $0x24] sm:$0xf] }
 0x2d1   : > { %10866 = vmatmul.mubr.msk.bf16.gmra.mrb[12].mxu0 %vm879_vm6, %v13111_v54 }
 0x2d2   : > { %10869 = vmatprep.mubr.msk.bf16.mxu0 %vm879_vm6, %v13113_v29 }
 0x2d3   : > { %10446 = vmatmul.mubr.msk.bf16.vlgmr.msra.gmra.mrb[0].mxu1 %vm879_vm6, %v2809_v4  ;;  %v6330_v4 = vld [vmem:[#allocation2 + $0x16c] sm:$0xff] }
 0x2d4   : > { %10449 = vmatprep.mubr.msk.bf16.mxu1 %vm879_vm6, %v12819_v43  ;;  %10478 = vmatpush3.bf16.msra.mxu1 %v3169_v10  ;;  %v6328_v43 = vld [vmem:[#allocation2 + $0x154] sm:$0xff] }
 0x2d5   : > { %11868 = vmatprep.subr.msk.bf16.mxu1 %vm928_vm5, %v13119_v14  ;;  %v6331_v10 = vld [vmem:[#allocation2 + $0x174] sm:$0xff]  ;;  %v13141_v19 = vpack.c.bf16 %v6329_v16, %v6328_v43  ;;  %v6352_v16 = vpack.c.bf16 %v6335_v12, %v6334_v2  ;;  %v6994_v12 = vsel %vm928_vm5, %v13074_v60, 0 }
 0x2d6   : > { %v13143_v5 = vpack.c.bf16 %v6331_v10, %v6330_v4  ;;  %v2799_v10 = vld [vmem:[#allocation2 + $0x12a] sm:$0xff] }
 0x2d9   : > { %10870 = vmatmul.mubr.msk.bf16.gmra.mrb[16].mxu0 %vm879_vm6, %v13129_v13 }
 0x2da   : > { %10873 = vmatprep.mubr.msk.bf16.mxu0 %vm879_vm6, %v13131_v51 }
 0x2db   : > { %10450 = vmatmul.mubr.msk.bf16.gmra.mrb[4].mxu1 %vm879_vm6, %v12828_v61  ;;  %v6332_v61 = vld [vmem:[#allocation2 + $0x184] sm:$0xff] }
 0x2dc   : > { %10453 = vmatprep.mubr.msk.bf16.mxu1 %vm879_vm6, %v12830_v0  ;;  %v6333_v0 = vld [vmem:[#allocation2 + $0x18c] sm:$0xff] }
 0x2dd   : > { %v13153_v43 = vpack.c.bf16 %v6333_v0, %v6332_v61  ;;  %v2801_v61 = vld [vmem:[#allocation2 + $0x142] sm:$0xff] }
 0x2e1   : > { %10874 = vmatmul.mubr.msk.bf16.gmra.mrb[20].mxu0 %vm879_vm6, %v13141_v19 }
 0x2e2   : > { %10877 = vmatprep.mubr.msk.bf16.mxu0 %vm879_vm6, %v13143_v5 }
 0x2e3   : > { %10454 = vmatmul.mubr.msk.bf16.gmra.mrb[8].mxu1 %vm879_vm6, %v12846_v48  ;;  %v6336_v48 = vld [vmem:[#allocation2 + $0x1b4] sm:$0xff] }
 0x2e4   : > { %10457 = vmatprep.mubr.msk.bf16.mxu1 %vm879_vm6, %v12848_v57  ;;  %v6337_v57 = vld [vmem:[#allocation2 + $0x1bc] sm:$0xff] }
 0x2e5   : > { %v6353_v4 = vpack.c.bf16 %v6337_v57, %v6336_v48  ;;  %v2805_v48 = vld [vmem:[#allocation2 + $0x172] sm:$0xff] }
 0x2e9   : > { %10878 = vmatmul.mubr.msk.bf16.gmra.mrb[24].mxu0 %vm879_vm6, %v13153_v43 }
 0x2ea   : > { %10881 = vmatprep.mubr.msk.bf16.mxu0 %vm879_vm6, %v6352_v16  ;;  %v2804_v16 = vld [vmem:[#allocation2 + $0x16a] sm:$0xff] }
 0x2eb   : > { %10458 = vmatmul.mubr.msk.bf16.gmra.mrb[12].mxu1 %vm879_vm6, %v12858_v33  ;;  %v2798_v33 = vld [vmem:[#allocation2 + $0x122] sm:$0xff]  ;;  %v13187_v57 = vpack.c.bf16 %v2805_v48, %v2804_v16  ;;  %v7193_v16 = vld [vmem:[#allocation2 + $0x92] sm:$0xff]  ;;  %v7194_v48 = vld [vmem:[#allocation2 + $0x9a] sm:$0xff] }
 0x2ec   : > { %10461 = vmatprep.mubr.msk.bf16.mxu1 %vm879_vm6, %v12860_v59  ;;  %v2800_v59 = vld [vmem:[#allocation2 + $0x13a] sm:$0xff]  ;;  %v13169_v0 = vpack.c.bf16 %v2799_v10, %v2798_v33 }
 0x2ed   : > { %v13171_v2 = vpack.c.bf16 %v2801_v61, %v2800_v59  ;;  %v3072_v33 = vld [vmem:[#allocation2 + $0x33] sm:$0xff]  ;;  %v3073_v10 = vld [vmem:[#allocation2 + $0x3b] sm:$0xff]  ;;  %v9389_v59 = vld [vmem:[%s12080_s20 + $0x28] sm:$0xf] }
 0x2ee   : > { %v6926_v61 = vld [vmem:[#allocation2 + $0x1d1] sm:$0xff] }
 0x2f1   : > { %10882 = vmatmul.mubr.msk.bf16.gmra.mrb[28].mxu0 %vm879_vm6, %v6353_v4 }
 0x2f2   : > { %10887 = vmatprep.mubr.msk.bf16.mxu0 %vm879_vm6, %v12886_v15  ;;  %v2803_v15 = vld [vmem:[#allocation2 + $0x15a] sm:$0xff] }
 0x2f3   : > { %10462 = vmatmul.mubr.msk.bf16.gmra.mrb[16].mxu1 %vm879_vm6, %v12869_v53  ;;  %v9593_v53 = vld [vmem:[%s12080_s20 + $0x58] sm:$0xf] }
 0x2f4   : > { %10465 = vmatprep.mubr.msk.bf16.mxu1 %vm879_vm6, %v12871_v56  ;;  %v2802_v56 = vld [vmem:[#allocation2 + $0x152] sm:$0xff] }
 0x2f5   : > { %v13185_v60 = vpack.c.bf16 %v2803_v15, %v2802_v56 }
 0x2f9   : > { %10888 = vmatmul.mubr.msk.bf16.vlgmr.msra.gmra.mrb[0].mxu0 %vm879_vm6, %v12888_v30  ;;  %v3070_v30 = vld [vmem:[#allocation2 + $0x1b] sm:$0xff] }
 0x2fa   : > { %10920 = vmatpush3.bf16.msra.mxu0 %v6994_v12  ;;  %10891 = vmatprep.mubr.msk.bf16.mxu0 %vm879_vm6, %v12898_v34  ;;  %v3071_v34 = vld [vmem:[#allocation2 + $0x23] sm:$0xff] }
 0x2fb   : > { %10466 = vmatmul.mubr.msk.bf16.gmra.mrb[20].mxu1 %vm879_vm6, %v13169_v0  ;;  %11882 = vmatprep.subr.msk.bf16.mxu0 %vm928_vm5, %v9593_v53  ;;  %v3102_v4 = vpack.c.bf16 %v3071_v34, %v3070_v30  ;;  %v7189_v12 = vld [vmem:[#allocation2 + $0x62] sm:$0xff]  ;;  %v7223_v34 = vpack.c.bf16 %v7194_v48, %v7193_v16  ;;  %v3678_v16 = vld [vmem:[#allocation2 + $0x110] sm:$0xff] }
 0x2fc   : > { %10469 = vmatprep.mubr.msk.bf16.mxu1 %vm879_vm6, %v13171_v2  ;;  %v7219_v48 = vld [vmem:[#allocation2 + $0x1ca] sm:$0xff] }
 0x301   : > { %10892 = vmatmul.mubr.msk.bf16.gmra.mrb[4].mxu0 %vm879_vm6, %v12900_v46  ;;  %v3103_v46 = vpack.c.bf16 %v3073_v10, %v3072_v33  ;;  %v7196_v33 = vld [vmem:[#allocation2 + $0xb2] sm:$0xff]  ;;  %v7197_v10 = vld [vmem:[#allocation2 + $0xc2] sm:$0xff] }
 0x302   : > { %10895 = vmatprep.mubr.msk.bf16.mxu0 %vm879_vm6, %v12910_v23  ;;  %v3463_v23 = vsel %vm928_vm5, %v13119_v14, 0  ;;  %v6925_v14 = vld [vmem:[#allocation2 + $0x1c9] sm:$0xff] }
 0x303   : > { %10470 = vmatmul.mubr.msk.bf16.gmra.mrb[24].mxu1 %vm879_vm6, %v13185_v60  ;;  %v6942_v56 = vpack.c.bf16 %v6926_v61, %v6925_v14  ;;  %v3675_v14 = vld [vmem:[#allocation2 + $0xf0] sm:$0xff]  ;;  %v3676_v61 = vld [vmem:[#allocation2 + $0xf8] sm:$0xff] }
 0x304   : > { %10473 = vmatprep.mubr.msk.bf16.mxu1 %vm879_vm6, %v13187_v57 }
 0x309   : > { %10896 = vmatmul.mubr.msk.bf16.gmra.mrb[8].mxu0 %vm879_vm6, %v12914_v9  ;;  %v6626_v9 = vld [vmem:[#allocation2 + $0x188] sm:$0xff] }
 0x30a   : > { %10899 = vmatprep.mubr.msk.bf16.mxu0 %vm879_vm6, %v12923_v35 }
 0x30b   : > { %10474 = vmatmul.mubr.msk.bf16.gmra.mrb[28].mxu1 %vm879_vm6, %v12912_v6  ;;  %v6625_v6 = vld [vmem:[#allocation2 + $0x180] sm:$0xff] }
 0x30c   : > { %10479 = vmatprep.mubr.msk.bf16.mxu1 %vm879_vm6, %v3102_v4  ;;  %v13223_v35 = vpack.c.bf16 %v6626_v9, %v6625_v6  ;;  %v3659_v6 = vld [vmem:[#allocation2 + $0x30] sm:$0xff]  ;;  %v3660_v9 = vld [vmem:[#allocation2 + $0x38] sm:$0xff] }
 0x311   : > { %10900 = vmatmul.mubr.msk.bf16.gmra.mrb[12].mxu0 %vm879_vm6, %v12925_v28  ;;  %v6627_v28 = vld [vmem:[#allocation2 + $0x198] sm:$0xff] }
 0x312   : > { %10903 = vmatprep.mubr.msk.bf16.mxu0 %vm879_vm6, %v12936_v24  ;;  %v6629_v24 = vld [vmem:[#allocation2 + $0x1b0] sm:$0xff] }
 0x313   : > { %10480 = vmatmul.mubr.msk.bf16.vlgmr.msra.gmra.mrb[0].mxu1 %vm879_vm6, %v3103_v46  ;;  %v7198_v46 = vld [vmem:[#allocation2 + $0xca] sm:$0xff] }
 0x314   : > { %10483 = vmatprep.mubr.msk.bf16.mxu1 %vm879_vm6, %v12927_v40  ;;  %10512 = vmatpush3.bf16.msra.mxu1 %v3463_v23  ;;  %v6628_v40 = vld [vmem:[#allocation2 + $0x1a0] sm:$0xff] }
 0x315   : > { %11869 = vmatprep.subr.msk.bf16.mxu1 %vm928_vm5, %v9389_v59 }
 0x319   : > { %10904 = vmatmul.mubr.msk.bf16.gmra.mrb[16].mxu0 %vm879_vm6, %v12940_v1  ;;  %v13233_v1 = vpack.c.bf16 %v6628_v40, %v6627_v28  ;;  %v7201_v28 = vld [vmem:[#allocation2 + $0xf2] sm:$0xff]  ;;  %v7202_v40 = vld [vmem:[#allocation2 + $0xfa] sm:$0xff] }
 0x31a   : > { %10907 = vmatprep.mubr.msk.bf16.mxu0 %vm879_vm6, %v12959_v8  ;;  %v6631_v8 = vld [vmem:[#allocation2 + $0x1c8] sm:$0xff] }
 0x31b   : > { %10484 = vmatmul.mubr.msk.bf16.gmra.mrb[4].mxu1 %vm879_vm6, %v12938_v63  ;;  %v6630_v63 = vld [vmem:[#allocation2 + $0x1b8] sm:$0xff] }
 0x31c   : > { %10487 = vmatprep.mubr.msk.bf16.mxu1 %vm879_vm6, %v12942_v20  ;;  %v6647_v20 = vpack.c.bf16 %v6630_v63, %v6629_v24  ;;  %v3691_v63 = vpack.c.bf16 %v3660_v9, %v3659_v6  ;;  %v7485_v6 = vld [vmem:[#allocation2 + $0x7b] sm:$0xff]  ;;  %v7486_v9 = vld [vmem:[#allocation2 + $0x83] sm:$0xff] }
 0x321   : > { %10908 = vmatmul.mubr.msk.bf16.gmra.mrb[20].mxu0 %vm879_vm6, %v12963_v37 }
 0x322   : > { %10911 = vmatprep.mubr.msk.bf16.mxu0 %vm879_vm6, %v13223_v35 }
 0x323   : > { %10488 = vmatmul.mubr.msk.bf16.gmra.mrb[8].mxu1 %vm879_vm6, %v12961_v27  ;;  %v6632_v27 = vld [vmem:[#allocation2 + $0x1d0] sm:$0xff] }
 0x324   : > { %10491 = vmatprep.mubr.msk.bf16.mxu1 %vm879_vm6, %v12965_v58  ;;  %v6648_v37 = vpack.c.bf16 %v6632_v27, %v6631_v8  ;;  %v7288_v58 = vsel %vm928_vm5, %v9593_v53, 0  ;;  %v7190_v53 = vld [vmem:[#allocation2 + $0x6a] sm:$0xff]  ;;  %v7204_v27 = vld [vmem:[#allocation2 + $0x112] sm:$0xff] }
 0x325   : > { %v7221_v15 = vpack.c.bf16 %v7190_v53, %v7189_v12  ;;  %v7203_v8 = vld [vmem:[#allocation2 + $0x10a] sm:$0xff]  ;;  %v7217_v12 = vld [vmem:[#allocation2 + $0x1b2] sm:$0xff]  ;;  %v7218_v53 = vld [vmem:[#allocation2 + $0x1ba] sm:$0xff] }
 0x329   : > { %10912 = vmatmul.mubr.msk.bf16.gmra.mrb[24].mxu0 %vm879_vm6, %v13233_v1 }
 0x32a   : > { %10915 = vmatprep.mubr.msk.bf16.mxu0 %vm879_vm6, %v6647_v20  ;;  %v7227_v20 = vpack.c.bf16 %v7202_v40, %v7201_v28  ;;  %v3683_v28 = vld [vmem:[#allocation2 + $0x150] sm:$0xff]  ;;  %v3684_v40 = vld [vmem:[#allocation2 + $0x158] sm:$0xff] }
 0x32b   : > { %10492 = vmatmul.mubr.msk.bf16.gmra.mrb[12].mxu1 %vm879_vm6, %v12975_v31  ;;  %v13253_v31 = vld [vmem:[%s12080_s20 + $0x5c] sm:$0xf] }
 0x32c   : > { %10495 = vmatprep.mubr.msk.bf16.mxu1 %vm879_vm6, %v12977_v52  ;;  %v3364_v52 = vld [vmem:[#allocation2 + $0x1c] sm:$0xff]  ;;  %v7582_v4 = vsel %vm928_vm5, %v13253_v31, 0 }
 0x331   : > { %10916 = vmatmul.mubr.msk.bf16.gmra.mrb[28].mxu0 %vm879_vm6, %v6648_v37  ;;  %v3663_v37 = vld [vmem:[#allocation2 + $0x60] sm:$0xff] }
 0x332   : > { %10921 = vmatprep.mubr.msk.bf16.mxu0 %vm879_vm6, %v13003_v42  ;;  %v3366_v42 = vld [vmem:[#allocation2 + $0x34] sm:$0xff] }
 0x333   : > { %10496 = vmatmul.mubr.msk.bf16.gmra.mrb[16].mxu1 %vm879_vm6, %v12986_v49  ;;  %v3365_v49 = vld [vmem:[#allocation2 + $0x24] sm:$0xff] }
 0x334   : > { %10499 = vmatprep.mubr.msk.bf16.mxu1 %vm879_vm6, %v12988_v45  ;;  %v3396_v45 = vpack.c.bf16 %v3365_v49, %v3364_v52  ;;  %v7228_v52 = vpack.c.bf16 %v7204_v27, %v7203_v8 }
 0x339   : > { %10922 = vmatmul.mubr.msk.bf16.vlgmr.msra.gmra.mrb[0].mxu0 %vm879_vm6, %v13007_v32 }
 0x33a   : > { %10954 = vmatpush3.bf16.msra.mxu0 %v7288_v58  ;;  %10925 = vmatprep.mubr.msk.bf16.mxu0 %vm879_vm6, %v13019_v18  ;;  %v13281_v18 = vld [vmem:[%s12080_s20 + $0x2c] sm:$0xf] }
 0x33b   : > { %10500 = vmatmul.mubr.msk.bf16.gmra.mrb[20].mxu1 %vm879_vm6, %v13005_v17  ;;  %11883 = vmatprep.subr.msk.bf16.mxu0 %vm928_vm5, %v13253_v31  ;;  %v3367_v17 = vld [vmem:[#allocation2 + $0x3c] sm:$0xff]  ;;  %v3664_v58 = vld [vmem:[#allocation2 + $0x68] sm:$0xff] }
 0x33c   : > { %10503 = vmatprep.mubr.msk.bf16.mxu1 %vm879_vm6, %v13009_v44  ;;  %v3397_v32 = vpack.c.bf16 %v3367_v17, %v3366_v42  ;;  %v3758_v44 = vsel %vm928_vm5, %v9389_v59, 0  ;;  %v7225_v59 = vpack.c.bf16 %v7198_v46, %v7197_v10  ;;  %v3693_v49 = vpack.c.bf16 %v3664_v58, %v3663_v37  ;;  %v3666_v42 = vld [vmem:[#allocation2 + $0x80] sm:$0xff]  ;;  %v3667_v17 = vld [vmem:[#allocation2 + $0x90] sm:$0xff]  ;;  %v3685_v37 = vld [vmem:[#allocation2 + $0x168] sm:$0xff] }
 0x33d   : > { %v3686_v58 = vld [vmem:[#allocation2 + $0x170] sm:$0xff] }
 0x341   : > { %10926 = vmatmul.mubr.msk.bf16.gmra.mrb[4].mxu0 %vm879_vm6, %v13023_v50  ;;  %v6919_v50 = vld [vmem:[#allocation2 + $0x181] sm:$0xff] }
 0x342   : > { %10929 = vmatprep.mubr.msk.bf16.mxu0 %vm879_vm6, %v13035_v22 }
 0x343   : > { %10504 = vmatmul.mubr.msk.bf16.gmra.mrb[24].mxu1 %vm879_vm6, %v13021_v7  ;;  %v14419_v7 = vld [vmem:[#allocation8_spill] sm:$0xff] }
 0x344   : > { %10507 = vmatprep.mubr.msk.bf16.mxu1 %vm879_vm6, %v13025_v26  ;;  %v6920_v26 = vld [vmem:[#allocation2 + $0x189] sm:$0xff] }
 0x345   : > { %v13299_v22 = vpack.c.bf16 %v6920_v26, %v6919_v50  ;;  %v3670_v26 = vld [vmem:[#allocation2 + $0xb0] sm:$0xff] }
 0x349   : > { %10930 = vmatmul.mubr.msk.bf16.gmra.mrb[8].mxu0 %vm879_vm6, %v13039_v41  ;;  %v14421_v41 = vld [vmem:[#allocation9_spill] sm:$0xff] }
 0x34a   : > { %10933 = vmatprep.mubr.msk.bf16.mxu0 %vm879_vm6, %v13048_v55  ;;  %v14422_v55 = vld [vmem:[#allocation6_spill] sm:$0xff] }
 0x34b   : > { %10508 = vmatmul.mubr.msk.bf16.gmra.mrb[28].mxu1 %vm879_vm6, %v13037_v39  ;;  %v14420_v39 = vld [vmem:[#allocation5_spill] sm:$0xff] }
 0x34c   : > { %10513 = vmatprep.mubr.msk.bf16.mxu1 %vm879_vm6, %v3396_v45  ;;  %v4052_v45 = vsel %vm928_vm5, %v13281_v18, 0 }
 0x351   : > { %10934 = vmatmul.mubr.msk.bf16.gmra.mrb[12].mxu0 %vm879_vm6, %v13050_v62  ;;  %v6921_v62 = vld [vmem:[#allocation2 + $0x199] sm:$0xff] }
 0x352   : > { %10937 = vmatprep.mubr.msk.bf16.mxu0 %vm879_vm6, %v13061_v3  ;;  %v6923_v3 = vld [vmem:[#allocation2 + $0x1b1] sm:$0xff] }
 0x353   : > { %10514 = vmatmul.mubr.msk.bf16.vlgmr.msra.gmra.mrb[0].mxu1 %vm879_vm6, %v3397_v32  ;;  %v3668_v32 = vld [vmem:[#allocation2 + $0x98] sm:$0xff] }
 0x354   : > { %10517 = vmatprep.mubr.msk.bf16.mxu1 %vm879_vm6, %v13052_v21  ;;  %10546 = vmatpush3.bf16.msra.mxu1 %v3758_v44  ;;  %v6922_v21 = vld [vmem:[#allocation2 + $0x1a1] sm:$0xff]  ;;  %v11948_v44 = vld [vmem:[%s12080_s20 + $0x30] sm:$0xf]  ;;  %v3695_v50 = vpack.c.bf16 %v3668_v32, %v3667_v17 }
 0x355   : > { %11870 = vmatprep.subr.msk.bf16.mxu1 %vm928_vm5, %v13281_v18  ;;  %v3669_v18 = vld [vmem:[#allocation2 + $0xa8] sm:$0xff] }
 0x356   : > { %v7494_v32 = vld [vmem:[#allocation2 + $0xe3] sm:$0xff] }
 0x359   : > { %10938 = vmatmul.mubr.msk.bf16.gmra.mrb[16].mxu0 %vm879_vm6, %v14419_v7 }
 0x35a   : > { %10941 = vmatprep.mubr.msk.bf16.mxu0 %vm879_vm6, %v13084_v36 }
 0x35b   : > { %10518 = vmatmul.mubr.msk.bf16.gmra.mrb[4].mxu1 %vm879_vm6, %v13063_v38  ;;  %v6924_v38 = vld [vmem:[#allocation2 + $0x1b9] sm:$0xff] }
 0x35c   : > { %10521 = vmatprep.mubr.msk.bf16.mxu1 %vm879_vm6, %v13067_v11  ;;  %v13309_v11 = vpack.c.bf16 %v6922_v21, %v6921_v62  ;;  %v6941_v36 = vpack.c.bf16 %v6924_v38, %v6923_v3  ;;  %v3696_v62 = vpack.c.bf16 %v3670_v26, %v3669_v18  ;;  %v3674_v38 = vld [vmem:[#allocation2 + $0xe0] sm:$0xff] }
 0x35d   : > { %v7496_v18 = vld [vmem:[#allocation2 + $0xfb] sm:$0xff] }
 0x361   : > { %10942 = vmatmul.mubr.msk.bf16.gmra.mrb[20].mxu0 %vm879_vm6, %v14421_v41  ;;  %v7213_v41 = vld [vmem:[#allocation2 + $0x182] sm:$0xff] }
 0x362   : > { %10945 = vmatprep.mubr.msk.bf16.mxu0 %vm879_vm6, %v13299_v22 }
 0x363   : > { %10522 = vmatmul.mubr.msk.bf16.gmra.mrb[8].mxu1 %vm879_vm6, %v14420_v39  ;;  %v3672_v39 = vld [vmem:[#allocation2 + $0xc8] sm:$0xff] }
 0x364   : > { %10525 = vmatprep.mubr.msk.bf16.mxu1 %vm879_vm6, %v14422_v55  ;;  %v7214_v55 = vld [vmem:[#allocation2 + $0x18a] sm:$0xff] }
 0x365   : > { %v13363_v3 = vpack.c.bf16 %v7214_v55, %v7213_v41  ;;  %v3955_v41 = vld [vmem:[#allocation2 + $0x49] sm:$0xff] }
 0x366   : > { %v7497_v55 = vld [vmem:[#allocation2 + $0x10b] sm:$0xff] }
 0x369   : > { %10946 = vmatmul.mubr.msk.bf16.gmra.mrb[24].mxu0 %vm879_vm6, %v13309_v11 }
 0x36a   : > { %10949 = vmatprep.mubr.msk.bf16.mxu0 %vm879_vm6, %v6941_v36  ;;  %v7215_v36 = vld [vmem:[#allocation2 + $0x19a] sm:$0xff] }
 0x36b   : > { %10526 = vmatmul.mubr.msk.bf16.gmra.mrb[12].mxu1 %vm879_vm6, %v13100_v47  ;;  %v7191_v47 = vld [vmem:[#allocation2 + $0x7a] sm:$0xff] }
 0x36c   : > { %10529 = vmatprep.mubr.msk.bf16.mxu1 %vm879_vm6, %v13102_v25  ;;  %v7192_v25 = vld [vmem:[#allocation2 + $0x82] sm:$0xff] }
 0x36d   : > { %v7222_v30 = vpack.c.bf16 %v7192_v25, %v7191_v47  ;;  %v3699_v47 = vpack.c.bf16 %v3676_v61, %v3675_v14  ;;  %v7235_v25 = vpack.c.bf16 %v7218_v53, %v7217_v12  ;;  %v3960_v53 = vld [vmem:[#allocation2 + $0x81] sm:$0xff] }
 0x371   : > { %10950 = vmatmul.mubr.msk.bf16.gmra.mrb[28].mxu0 %vm879_vm6, %v6942_v56 }
 0x372   : > { %10955 = vmatprep.mubr.msk.bf16.mxu0 %vm879_vm6, %v7221_v15 }
 0x373   : > { %10530 = vmatmul.mubr.msk.bf16.gmra.mrb[16].mxu1 %vm879_vm6, %v13111_v54  ;;  %v13329_v54 = vld [vmem:[%s12080_s20 + $0x60] sm:$0xf] }
 0x374   : > { %10533 = vmatprep.mubr.msk.bf16.mxu1 %vm879_vm6, %v13113_v29  ;;  %v7195_v29 = vld [vmem:[#allocation2 + $0xaa] sm:$0xff]  ;;  %v7876_v27 = vsel %vm928_vm5, %v13329_v54, 0 }
 0x375   : > { %v7224_v23 = vpack.c.bf16 %v7196_v33, %v7195_v29  ;;  %v7483_v29 = vld [vmem:[#allocation2 + $0x63] sm:$0xff]  ;;  %v7484_v33 = vld [vmem:[#allocation2 + $0x6b] sm:$0xff] }
 0x379   : > { %10956 = vmatmul.mubr.msk.bf16.vlgmr.msra.gmra.mrb[0].mxu0 %vm879_vm6, %v7222_v30  ;;  %v7220_v30 = vld [vmem:[#allocation2 + $0x1d2] sm:$0xff] }
 0x37a   : > { %10988 = vmatpush3.bf16.msra.mxu0 %v7582_v4  ;;  %10959 = vmatprep.mubr.msk.bf16.mxu0 %vm879_vm6, %v7223_v34  ;;  %v3679_v34 = vld [vmem:[#allocation2 + $0x120] sm:$0xff]  ;;  %v3680_v4 = vld [vmem:[#allocation2 + $0x128] sm:$0xff]  ;;  %v7236_v46 = vpack.c.bf16 %v7220_v30, %v7219_v48  ;;  %v7503_v48 = vld [vmem:[#allocation2 + $0x153] sm:$0xff] }
 0x37b   : > { %10534 = vmatmul.mubr.msk.bf16.gmra.mrb[20].mxu1 %vm879_vm6, %v13129_v13  ;;  %11884 = vmatprep.subr.msk.bf16.mxu0 %vm928_vm5, %v13329_v54  ;;  %v7199_v13 = vld [vmem:[#allocation2 + $0xda] sm:$0xff] }
 0x37c   : > { %10537 = vmatprep.mubr.msk.bf16.mxu1 %vm879_vm6, %v13131_v51  ;;  %v7200_v51 = vld [vmem:[#allocation2 + $0xe2] sm:$0xff] }
 0x37d   : > { %v7226_v24 = vpack.c.bf16 %v7200_v51, %v7199_v13  ;;  %v3681_v13 = vld [vmem:[#allocation2 + $0x138] sm:$0xff]  ;;  %v3682_v51 = vld [vmem:[#allocation2 + $0x140] sm:$0xff] }
 0x37e   : > { %v7493_v54 = vld [vmem:[#allocation2 + $0xdb] sm:$0xff] }
 0x37f   : > { %v7520_v26 = vpack.c.bf16 %v7494_v32, %v7493_v54  ;;  %v7504_v30 = vld [vmem:[#allocation2 + $0x15b] sm:$0xff]  ;;  %v7513_v54 = vld [vmem:[#allocation2 + $0x1cb] sm:$0xff]  ;;  %v7514_v32 = vld [vmem:[#allocation2 + $0x1d3] sm:$0xff] }
 0x381   : > { %10960 = vmatmul.mubr.msk.bf16.gmra.mrb[4].mxu0 %vm879_vm6, %v7224_v23  ;;  %v3701_v23 = vpack.c.bf16 %v3680_v4, %v3679_v34 }
 0x382   : > { %10963 = vmatprep.mubr.msk.bf16.mxu0 %vm879_vm6, %v7225_v59  ;;  %v7515_v59 = vpack.c.bf16 %v7484_v33, %v7483_v29  ;;  %v7525_v33 = vpack.c.bf16 %v7504_v30, %v7503_v48 }
 0x383   : > { %10538 = vmatmul.mubr.msk.bf16.gmra.mrb[24].mxu1 %vm879_vm6, %v13141_v19  ;;  %v3661_v19 = vld [vmem:[#allocation2 + $0x48] sm:$0xff] }
 0x384   : > { %10541 = vmatprep.mubr.msk.bf16.mxu1 %vm879_vm6, %v13143_v5  ;;  %v3662_v5 = vld [vmem:[#allocation2 + $0x50] sm:$0xff] }
 0x385   : > { %v3692_v31 = vpack.c.bf16 %v3662_v5, %v3661_v19  ;;  %v7516_v19 = vpack.c.bf16 %v7486_v9, %v7485_v6  ;;  %v3703_v5 = vpack.c.bf16 %v3684_v40, %v3683_v28  ;;  %v7507_v6 = vld [vmem:[#allocation2 + $0x183] sm:$0xff]  ;;  %v7508_v9 = vld [vmem:[#allocation2 + $0x18b] sm:$0xff] }
 0x389   : > { %10964 = vmatmul.mubr.msk.bf16.gmra.mrb[8].mxu0 %vm879_vm6, %v7226_v24  ;;  %v7487_v24 = vld [vmem:[#allocation2 + $0x93] sm:$0xff] }
 0x38a   : > { %10967 = vmatprep.mubr.msk.bf16.mxu0 %vm879_vm6, %v7227_v20  ;;  %v3702_v20 = vpack.c.bf16 %v3682_v51, %v3681_v13  ;;  %v3965_v13 = vld [vmem:[#allocation2 + $0xc1] sm:$0xff]  ;;  %v3966_v51 = vld [vmem:[#allocation2 + $0xc9] sm:$0xff] }
 0x38b   : > { %10542 = vmatmul.mubr.msk.bf16.gmra.mrb[28].mxu1 %vm879_vm6, %v13153_v43  ;;  %v3665_v43 = vld [vmem:[#allocation2 + $0x78] sm:$0xff] }
 0x38c   : > { %10547 = vmatprep.mubr.msk.bf16.mxu1 %vm879_vm6, %v3691_v63  ;;  %v3694_v7 = vpack.c.bf16 %v3666_v42, %v3665_v43  ;;  %v7488_v63 = vld [vmem:[#allocation2 + $0x9b] sm:$0xff]  ;;  %v3704_v43 = vpack.c.bf16 %v3686_v58, %v3685_v37  ;;  %v7511_v58 = vld [vmem:[#allocation2 + $0x1b3] sm:$0xff] }
 0x38d   : > { %v7517_v8 = vpack.c.bf16 %v7488_v63, %v7487_v24  ;;  %v3991_v24 = vpack.c.bf16 %v3966_v51, %v3965_v13  ;;  %v7527_v63 = vpack.c.bf16 %v7508_v9, %v7507_v6  ;;  %v3970_v37 = vld [vmem:[#allocation2 + $0xf9] sm:$0xff]  ;;  %v7791_v9 = vld [vmem:[#allocation2 + $0x10c] sm:$0xff] }
 0x38e   : > { %v4269_v6 = vld [vmem:[#allocation2 + $0x13a] sm:$0xff] }
 0x391   : > { %10968 = vmatmul.mubr.msk.bf16.gmra.mrb[12].mxu0 %vm879_vm6, %v7228_v52  ;;  %v7490_v52 = vld [vmem:[#allocation2 + $0xb3] sm:$0xff] }
 0x392   : > { %10971 = vmatprep.mubr.msk.bf16.mxu0 %vm879_vm6, %v13169_v0  ;;  %v3671_v0 = vld [vmem:[#allocation2 + $0xc0] sm:$0xff] }
 0x393   : > { %10548 = vmatmul.mubr.msk.bf16.vlgmr.msra.gmra.mrb[0].mxu1 %vm879_vm6, %v3692_v31  ;;  %v3697_v21 = vpack.c.bf16 %v3672_v39, %v3671_v0  ;;  %v7489_v31 = vld [vmem:[#allocation2 + $0xab] sm:$0xff] }
 0x394   : > { %10551 = vmatprep.mubr.msk.bf16.mxu1 %vm879_vm6, %v3693_v49  ;;  %10580 = vmatpush3.bf16.msra.mxu1 %v4052_v45  ;;  %v7491_v49 = vld [vmem:[#allocation2 + $0xc3] sm:$0xff]  ;;  %v7492_v45 = vld [vmem:[#allocation2 + $0xcb] sm:$0xff]  ;;  %v7518_v42 = vpack.c.bf16 %v7490_v52, %v7489_v31  ;;  %v7512_v31 = vld [vmem:[#allocation2 + $0x1bb] sm:$0xff] }
 0x395   : > { %11872 = vmatprep.subr.msk.bf16.mxu1 %vm928_vm5, %v11948_v44  ;;  %v7519_v17 = vpack.c.bf16 %v7492_v45, %v7491_v49  ;;  %v3953_v44 = vld [vmem:[#allocation2 + $0x31] sm:$0xff] }
 0x399   : > { %10972 = vmatmul.mubr.msk.bf16.gmra.mrb[16].mxu0 %vm879_vm6, %v13171_v2  ;;  %v3673_v2 = vld [vmem:[#allocation2 + $0xd8] sm:$0xff] }
 0x39a   : > { %10975 = vmatprep.mubr.msk.bf16.mxu0 %vm879_vm6, %v13185_v60  ;;  %v7216_v60 = vld [vmem:[#allocation2 + $0x1a2] sm:$0xff]  ;;  %v3698_v56 = vpack.c.bf16 %v3674_v38, %v3673_v2 }
 0x39b   : > { %10552 = vmatmul.mubr.msk.bf16.gmra.mrb[4].mxu1 %vm879_vm6, %v3694_v7  ;;  %v13371_v15 = vpack.c.bf16 %v7216_v60, %v7215_v36  ;;  %v3954_v7 = vld [vmem:[#allocation2 + $0x39] sm:$0xff]  ;;  %v3958_v2 = vld [vmem:[#allocation2 + $0x69] sm:$0xff] }
 0x39c   : > { %10555 = vmatprep.mubr.msk.bf16.mxu1 %vm879_vm6, %v3695_v50  ;;  %v7495_v50 = vld [vmem:[#allocation2 + $0xf3] sm:$0xff]  ;;  %v3985_v0 = vpack.c.bf16 %v3954_v7, %v3953_v44  ;;  %v7499_v38 = vld [vmem:[#allocation2 + $0x123] sm:$0xff]  ;;  %v7500_v36 = vld [vmem:[#allocation2 + $0x12b] sm:$0xff] }
 0x39d   : > { %v7521_v39 = vpack.c.bf16 %v7496_v18, %v7495_v50  ;;  %v7523_v12 = vpack.c.bf16 %v7500_v36, %v7499_v38  ;;  %v3973_v44 = vld [vmem:[#allocation2 + $0x121] sm:$0xff]  ;;  %v3974_v7 = vld [vmem:[#allocation2 + $0x129] sm:$0xff]  ;;  %v3978_v38 = vld [vmem:[#allocation2 + $0x159] sm:$0xff] }
 0x39e   : > { %v7777_v50 = vld [vmem:[#allocation2 + $0x64] sm:$0xff]  ;;  %v7778_v18 = vld [vmem:[#allocation2 + $0x6c] sm:$0xff]  ;;  %v7781_v36 = vld [vmem:[#allocation2 + $0x94] sm:$0xff] }
 0x3a1   : > { %10976 = vmatmul.mubr.msk.bf16.gmra.mrb[20].mxu0 %vm879_vm6, %v13187_v57  ;;  %v3677_v57 = vld [vmem:[#allocation2 + $0x108] sm:$0xff] }
 0x3a2   : > { %10979 = vmatprep.mubr.msk.bf16.mxu0 %vm879_vm6, %v13363_v3  ;;  %v3700_v10 = vpack.c.bf16 %v3678_v16, %v3677_v57  ;;  %v3962_v57 = vld [vmem:[#allocation2 + $0x99] sm:$0xff] }
 0x3a3   : > { %10556 = vmatmul.mubr.msk.bf16.gmra.mrb[8].mxu1 %vm879_vm6, %v3696_v62  ;;  %v7498_v62 = vld [vmem:[#allocation2 + $0x113] sm:$0xff]  ;;  %v14423_v16 = vld [vmem:[#allocation4_spill] sm:$0xff] }
 0x3a4   : > { %10559 = vmatprep.mubr.msk.bf16.mxu1 %vm879_vm6, %v3697_v21  ;;  %v3957_v21 = vld [vmem:[#allocation2 + $0x61] sm:$0xff]  ;;  %v7522_v14 = vpack.c.bf16 %v7498_v62, %v7497_v55 }
 0x3a5   : > { %v3987_v61 = vpack.c.bf16 %v3958_v2, %v3957_v21  ;;  %v3976_v55 = vld [vmem:[#allocation2 + $0x141] sm:$0xff]  ;;  %v3977_v2 = vld [vmem:[#allocation2 + $0x151] sm:$0xff] }
 0x3a6   : > { %v7779_v62 = vld [vmem:[#allocation2 + $0x7c] sm:$0xff]  ;;  %v7780_v21 = vld [vmem:[#allocation2 + $0x84] sm:$0xff] }
 0x3a9   : > { %10980 = vmatmul.mubr.msk.bf16.gmra.mrb[24].mxu0 %vm879_vm6, %v13371_v15 }
 0x3aa   : > { %10983 = vmatprep.mubr.msk.bf16.mxu0 %vm879_vm6, %v7235_v25  ;;  %v3961_v25 = vld [vmem:[#allocation2 + $0x91] sm:$0xff] }
 0x3ab   : > { %10560 = vmatmul.mubr.msk.bf16.gmra.mrb[12].mxu1 %vm879_vm6, %v3698_v56  ;;  %v7501_v56 = vld [vmem:[#allocation2 + $0x13b] sm:$0xff]  ;;  %v3989_v29 = vpack.c.bf16 %v3962_v57, %v3961_v25  ;;  %v7785_v57 = vld [vmem:[#allocation2 + $0xc4] sm:$0xff] }
 0x3ac   : > { %10563 = vmatprep.mubr.msk.bf16.mxu1 %vm879_vm6, %v3699_v47  ;;  %v7502_v47 = vld [vmem:[#allocation2 + $0x143] sm:$0xff]  ;;  %v7784_v25 = vld [vmem:[#allocation2 + $0xb4] sm:$0xff] }
 0x3ad   : > { %v7524_v4 = vpack.c.bf16 %v7502_v47, %v7501_v56  ;;  %v3980_v56 = vld [vmem:[#allocation2 + $0x171] sm:$0xff] }
 0x3ae   : > { %v7783_v47 = vld [vmem:[#allocation2 + $0xac] sm:$0xff] }
 0x3af   : > { %v7812_v30 = vpack.c.bf16 %v7784_v25, %v7783_v47 }
 0x3b1   : > { %10984 = vmatmul.mubr.msk.bf16.gmra.mrb[28].mxu0 %vm879_vm6, %v7236_v46  ;;  %v3964_v46 = vld [vmem:[#allocation2 + $0xb1] sm:$0xff] }
 0x3b2   : > { %10989 = vmatprep.mubr.msk.bf16.mxu0 %vm879_vm6, %v7515_v59  ;;  %v7506_v59 = vld [vmem:[#allocation2 + $0x173] sm:$0xff] }
 0x3b3   : > { %10564 = vmatmul.mubr.msk.bf16.gmra.mrb[16].mxu1 %vm879_vm6, %v3700_v10  ;;  %v3963_v10 = vld [vmem:[#allocation2 + $0xa9] sm:$0xff] }
 0x3b4   : > { %10567 = vmatprep.mubr.msk.bf16.mxu1 %vm879_vm6, %v3701_v23  ;;  %v7505_v23 = vld [vmem:[#allocation2 + $0x16b] sm:$0xff]  ;;  %v3990_v28 = vpack.c.bf16 %v3964_v46, %v3963_v10  ;;  %v7789_v46 = vld [vmem:[#allocation2 + $0xf4] sm:$0xff] }
 0x3b5   : > { %v7526_v40 = vpack.c.bf16 %v7506_v59, %v7505_v23  ;;  %v4268_v10 = vld [vmem:[#allocation2 + $0x12a] sm:$0xff]  ;;  %v7790_v23 = vld [vmem:[#allocation2 + $0xfc] sm:$0xff] }
 0x3b6   : > { %v7815_v51 = vpack.c.bf16 %v7790_v23, %v7789_v46 }
 0x3b9   : > { %10990 = vmatmul.mubr.msk.bf16.vlgmr.msra.gmra.mrb[0].mxu0 %vm879_vm6, %v7516_v19  ;;  %v3968_v19 = vld [vmem:[#allocation2 + $0xe1] sm:$0xff] }
 0x3ba   : > { %11022 = vmatpush3.bf16.msra.mxu0 %v7876_v27  ;;  %10993 = vmatprep.mubr.msk.bf16.mxu0 %vm879_vm6, %v7517_v8  ;;  %v7510_v8 = vld [vmem:[#allocation2 + $0x1a3] sm:$0xff]  ;;  %v3969_v27 = vld [vmem:[#allocation2 + $0xf1] sm:$0xff] }
 0x3bb   : > { %10568 = vmatmul.mubr.msk.bf16.gmra.mrb[20].mxu1 %vm879_vm6, %v3702_v20  ;;  %v3967_v20 = vld [vmem:[#allocation2 + $0xd9] sm:$0xff]  ;;  %v3993_v45 = vpack.c.bf16 %v3970_v37, %v3969_v27 }
 0x3bc   : > { %10571 = vmatprep.mubr.msk.bf16.mxu1 %vm879_vm6, %v3703_v5  ;;  %v7509_v5 = vld [vmem:[#allocation2 + $0x19b] sm:$0xff]  ;;  %v3992_v52 = vpack.c.bf16 %v3968_v19, %v3967_v20  ;;  %v7794_v20 = vld [vmem:[#allocation2 + $0x12c] sm:$0xff] }
 0x3bd   : > { %v7528_v49 = vpack.c.bf16 %v7510_v8, %v7509_v5  ;;  %v4274_v37 = vld [vmem:[#allocation2 + $0x172] sm:$0xff] }
 0x3c1   : > { %10994 = vmatmul.mubr.msk.bf16.gmra.mrb[4].mxu0 %vm879_vm6, %v7518_v42  ;;  %v3971_v42 = vld [vmem:[#allocation2 + $0x109] sm:$0xff] }
 0x3c2   : > { %10997 = vmatprep.mubr.msk.bf16.mxu0 %vm879_vm6, %v7519_v17  ;;  %v3972_v17 = vld [vmem:[#allocation2 + $0x111] sm:$0xff] }
 0x3c3   : > { %10572 = vmatmul.mubr.msk.bf16.gmra.mrb[24].mxu1 %vm879_vm6, %v3704_v43  ;;  %v7529_v43 = vpack.c.bf16 %v7512_v31, %v7511_v58  ;;  %v7795_v58 = vld [vmem:[#allocation2 + $0x13c] sm:$0xff]  ;;  %v7796_v31 = vld [vmem:[#allocation2 + $0x144] sm:$0xff] }
 0x3c4   : > { %10575 = vmatprep.mubr.msk.bf16.mxu1 %vm879_vm6, %v13223_v35  ;;  %v3956_v35 = vld [vmem:[#allocation2 + $0x51] sm:$0xff] }
 0x3c5   : > { %v3986_v60 = vpack.c.bf16 %v3956_v35, %v3955_v41  ;;  %v7809_v41 = vpack.c.bf16 %v7778_v18, %v7777_v50  ;;  %v3975_v35 = vld [vmem:[#allocation2 + $0x139] sm:$0xff] }
 0x3c6   : > { %v7803_v18 = vld [vmem:[#allocation2 + $0x19c] sm:$0xff] }
 0x3c9   : > { %10998 = vmatmul.mubr.msk.bf16.gmra.mrb[8].mxu0 %vm879_vm6, %v7520_v26  ;;  %v3994_v26 = vpack.c.bf16 %v3972_v17, %v3971_v42  ;;  %v7799_v17 = vld [vmem:[#allocation2 + $0x16c] sm:$0xff] }
 0x3ca   : > { %11001 = vmatprep.mubr.msk.bf16.mxu0 %vm879_vm6, %v7521_v39  ;;  %v3995_v39 = vpack.c.bf16 %v3974_v7, %v3973_v44  ;;  %v7802_v44 = vld [vmem:[#allocation2 + $0x18c] sm:$0xff] }
 0x3cb   : > { %10576 = vmatmul.mubr.msk.bf16.gmra.mrb[28].mxu1 %vm879_vm6, %v13233_v1  ;;  %v3959_v1 = vld [vmem:[#allocation2 + $0x79] sm:$0xff] }
 0x3cc   : > { %10581 = vmatprep.mubr.msk.bf16.mxu1 %vm879_vm6, %v3985_v0  ;;  %v3988_v34 = vpack.c.bf16 %v3960_v53, %v3959_v1  ;;  %v7530_v0 = vpack.c.bf16 %v7514_v32, %v7513_v54  ;;  %v3979_v53 = vld [vmem:[#allocation2 + $0x169] sm:$0xff]  ;;  %v7800_v54 = vld [vmem:[#allocation2 + $0x174] sm:$0xff] }
 0x3cd   : > { %v3998_v48 = vpack.c.bf16 %v3980_v56, %v3979_v53  ;;  %v7801_v32 = vld [vmem:[#allocation2 + $0x184] sm:$0xff]  ;;  %v7820_v7 = vpack.c.bf16 %v7800_v54, %v7799_v17 }
 0x3ce   : > { %v7821_v50 = vpack.c.bf16 %v7802_v44, %v7801_v32 }
 0x3d1   : > { %11002 = vmatmul.mubr.msk.bf16.gmra.mrb[12].mxu0 %vm879_vm6, %v7522_v14  ;;  %v3996_v14 = vpack.c.bf16 %v3976_v55, %v3975_v35  ;;  %v7807_v35 = vld [vmem:[#allocation2 + $0x1cc] sm:$0xff]  ;;  %v7808_v55 = vld [vmem:[#allocation2 + $0x1d4] sm:$0xff] }
 0x3d2   : > { %11005 = vmatprep.mubr.msk.bf16.mxu0 %vm879_vm6, %v7523_v12  ;;  %v3997_v12 = vpack.c.bf16 %v3978_v38, %v3977_v2  ;;  %v11990_v38 = vmov 0.0|0.0  }
 0x3d3   : > { %10582 = vmatmul.mubr.msk.bf16.vlgmr.msra.gmra.mrb[0].mxu1 %vm879_vm6, %v3986_v60  ;;  %v7782_v60 = vld [vmem:[#allocation2 + $0x9c] sm:$0xff] }
 0x3d4   : > { %10585 = vmatprep.mubr.msk.bf16.mxu1 %vm879_vm6, %v3987_v61  ;;  %11088 = vmatpush3.bf16.msra.mxu1 %v14423_v16  ;;  %v7810_v61 = vpack.c.bf16 %v7780_v21, %v7779_v62  ;;  %v7811_v1 = vpack.c.bf16 %v7782_v60, %v7781_v36  ;;  %v7786_v16 = vld [vmem:[#allocation2 + $0xcc] sm:$0xff]  ;;  %v7824_v62 = vpack.c.bf16 %v7808_v55, %v7807_v35  ;;  %v11992_v36 = vmov 0.0  }
 0x3d5   : > { %v8179_v21 = vld [vmem:[%s14387_s5 + $0x8] sm:$0xff]  ;;  %11079 = vmatprep.subr.bf16.mxu1 %v11990_v38 }
 0x3d9   : > { %11006 = vmatmul.mubr.msk.bf16.gmra.mrb[16].mxu0 %vm879_vm6, %v7524_v4  ;;  %v7787_v4 = vld [vmem:[#allocation2 + $0xdc] sm:$0xff] }
 0x3da   : > { %11009 = vmatprep.mubr.msk.bf16.mxu0 %vm879_vm6, %v7525_v33  ;;  %v4267_v33 = vld [vmem:[#allocation2 + $0x122] sm:$0xff] }
 0x3db   : > { %10586 = vmatmul.mubr.msk.bf16.gmra.mrb[4].mxu1 %vm879_vm6, %v3988_v34  ;;  %v7813_v34 = vpack.c.bf16 %v7786_v16, %v7785_v57  ;;  %v4289_v13 = vpack.c.bf16 %v4268_v10, %v4267_v33  ;;  %v8072_v33 = vlaneseq }
 0x3dc   : > { %10589 = vmatprep.mubr.msk.bf16.mxu1 %vm879_vm6, %v3989_v29  ;;  %v7788_v29 = vld [vmem:[#allocation2 + $0xe4] sm:$0xff] }
 0x3dd   : > { %v7814_v59 = vpack.c.bf16 %v7788_v29, %v7787_v4  ;;  %v13474_v23 = vshrl.u32 %v8072_v33, 7 }
 0x3e1   : > { %11010 = vmatmul.mubr.msk.bf16.gmra.mrb[20].mxu0 %vm879_vm6, %v7526_v40  ;;  %v4271_v40 = vld [vmem:[#allocation2 + $0x152] sm:$0xff] }
 0x3e2   : > { %11013 = vmatprep.mubr.msk.bf16.mxu0 %vm879_vm6, %v7527_v63  ;;  %v7793_v63 = vld [vmem:[#allocation2 + $0x124] sm:$0xff] }
 0x3e3   : > { %10590 = vmatmul.mubr.msk.bf16.gmra.mrb[8].mxu1 %vm879_vm6, %v3990_v28  ;;  %v7792_v28 = vld [vmem:[#allocation2 + $0x114] sm:$0xff]  ;;  %v7817_v27 = vpack.c.bf16 %v7794_v20, %v7793_v63 }
 0x3e4   : > { %10593 = vmatprep.mubr.msk.bf16.mxu1 %vm879_vm6, %v3991_v24  ;;  %v4272_v24 = vld [vmem:[#allocation2 + $0x15a] sm:$0xff]  ;;  %v7816_v5 = vpack.c.bf16 %v7792_v28, %v7791_v9 }
 0x3e5   : > { %v4291_v8 = vpack.c.bf16 %v4272_v24, %v4271_v40 }
 0x3e9   : > { %11014 = vmatmul.mubr.msk.bf16.gmra.mrb[24].mxu0 %vm879_vm6, %v7528_v49  ;;  %v7798_v49 = vld [vmem:[#allocation2 + $0x15c] sm:$0xff] }
 0x3ea   : > { %11017 = vmatprep.mubr.msk.bf16.mxu0 %vm879_vm6, %v7529_v43  ;;  %v7818_v43 = vpack.c.bf16 %v7796_v31, %v7795_v58 }
 0x3eb   : > { %10594 = vmatmul.mubr.msk.bf16.gmra.mrb[12].mxu1 %vm879_vm6, %v3992_v52  ;;  %v7797_v52 = vld [vmem:[#allocation2 + $0x154] sm:$0xff] }
 0x3ec   : > { %10597 = vmatprep.mubr.msk.bf16.mxu1 %vm879_vm6, %v3993_v45  ;;  %v7819_v42 = vpack.c.bf16 %v7798_v49, %v7797_v52 }
 0x3f1   : > { %11018 = vmatmul.mubr.msk.bf16.gmra.mrb[28].mxu0 %vm879_vm6, %v7530_v0  ;;  %v7805_v0 = vld [vmem:[#allocation2 + $0x1b4] sm:$0xff] }
 0x3f2   : > { %11023 = vmatprep.mubr.msk.bf16.mxu0 %vm879_vm6, %v7809_v41 }
 0x3f3   : > { %10598 = vmatmul.mubr.msk.bf16.gmra.mrb[16].mxu1 %vm879_vm6, %v3994_v26  ;;  %v7804_v26 = vld [vmem:[#allocation2 + $0x1a4] sm:$0xff] }
 0x3f4   : > { %10601 = vmatprep.mubr.msk.bf16.mxu1 %vm879_vm6, %v3995_v39  ;;  %v7806_v39 = vld [vmem:[#allocation2 + $0x1bc] sm:$0xff] }
 0x3f5   : > { %v7823_v41 = vpack.c.bf16 %v7806_v39, %v7805_v0 }
 0x3f9   : > { %11024 = vmatmul.mubr.msk.bf16.vlgmr.msra.gmra.mrb[0].mxu0 %vm879_vm6, %v7810_v61 }
 0x3fa   : > { %11027 = vmatprep.mubr.msk.bf16.mxu0 %vm879_vm6, %v7811_v1 }
 0x3fb   : > { %10602 = vmatmul.mubr.msk.bf16.gmra.mrb[20].mxu1 %vm879_vm6, %v3996_v14 }
 0x3fc   : > { %10605 = vmatprep.mubr.msk.bf16.mxu1 %vm879_vm6, %v3997_v12 }
 0x401   : > { %11028 = vmatmul.mubr.msk.bf16.gmra.mrb[4].mxu0 %vm879_vm6, %v7812_v30 }
 0x402   : > { %11031 = vmatprep.mubr.msk.bf16.mxu0 %vm879_vm6, %v7813_v34 }
 0x403   : > { %10606 = vmatmul.mubr.msk.bf16.gmra.mrb[24].mxu1 %vm879_vm6, %v3998_v48 }
 0x404   : > { %10609 = vmatprep.mubr.msk.bf16.mxu1 %vm879_vm6, %v13299_v22  ;;  %v4270_v22 = vld [vmem:[#allocation2 + $0x142] sm:$0xff] }
 0x405   : > { %v4290_v19 = vpack.c.bf16 %v4270_v22, %v4269_v6  ;;  %v13484_v6 = vld [vmem:[%s12085_s23] sm:$0x7] }
 0x409   : > { %11032 = vmatmul.mubr.msk.bf16.gmra.mrb[8].mxu0 %vm879_vm6, %v7814_v59 }
 0x40a   : > { %11035 = vmatprep.mubr.msk.bf16.mxu0 %vm879_vm6, %v7815_v51  ;;  %v13481_v51 = vsub.s32 0, %v13474_v23 }
 0x40b   : > { %10610 = vmatmul.mubr.msk.bf16.gmra.mrb[28].mxu1 %vm879_vm6, %v13309_v11  ;;  %v4273_v11 = vld [vmem:[#allocation2 + $0x16a] sm:$0xff] }
 0x40c   : > { %10635 = vmatprep.mubr.msk.bf16.mxu1 %vm879_vm6, %v4289_v13  ;;  %v4292_v45 = vpack.c.bf16 %v4274_v37, %v4273_v11  ;;  %v13488_v9 = vrot.slane %v13484_v6, %v13481_v51 }
 0x411   : > { %11036 = vmatmul.mubr.msk.bf16.gmra.mrb[12].mxu0 %vm879_vm6, %v7816_v5 }
 0x412   : > { %11039 = vmatprep.mubr.msk.bf16.mxu0 %vm879_vm6, %v7817_v27 }
 0x413   : > { %10636 = vmatmul.mubr.msk.bf16.vlgmr.msra.gmra.mrb[20].mxu1 %vm879_vm6, %v4290_v19 }
 0x414   : > { %10639 = vmatprep.mubr.msk.bf16.mxu1 %vm879_vm6, %v4291_v8 }
 0x419   : > { %11040 = vmatmul.mubr.msk.bf16.gmra.mrb[16].mxu0 %vm879_vm6, %v7818_v43 }
 0x41a   : > { %11043 = vmatprep.mubr.msk.bf16.mxu0 %vm879_vm6, %v7819_v42 }
 0x41b   : > { %10640 = vmatmul.mubr.msk.bf16.gmra.mrb[24].mxu1 %vm879_vm6, %v4292_v45 }
 0x41c   : > { %10643 = vmatprep.mubr.msk.bf16.mxu1 %vm879_vm6, %v13363_v3  ;;  %v7822_v3 = vpack.c.bf16 %v7804_v26, %v7803_v18 }
 0x421   : > { %11044 = vmatmul.mubr.msk.bf16.gmra.mrb[20].mxu0 %vm879_vm6, %v7820_v7 }
 0x422   : > { %11047 = vmatprep.mubr.msk.bf16.mxu0 %vm879_vm6, %v7821_v50 }
 0x423   : > { %10644 = vmatmul.mubr.msk.bf16.gmra.mrb[28].mxu1 %vm879_vm6, %v13371_v15  ;;  %v8178_v15 = vld [vmem:[%s14387_s5] sm:$0xff] }
 0x424   : > { %v13455_v2 = vpack.c.bf16 %v8179_v21, %v8178_v15  ;;  %11059 = vmatprep.mubr.msk.f32.mxu1 %vm11991_vm7, %v11992_v36 }
 0x426   : > { %11081 = vmatpush3.bf16.msra.mxu1 %v13455_v2 }
 0x427   : > { %11062 = vmatprep.subr.mxu1 %v11992_v36 }
 0x429   : > { %11048 = vmatmul.mubr.msk.bf16.gmra.mrb[24].mxu0 %vm879_vm6, %v7822_v3 }
 0x42a   : > { %11051 = vmatprep.mubr.msk.bf16.mxu0 %vm879_vm6, %v7823_v41 }
 0x431   : > { %11052 = vmatmul.mubr.msk.bf16.gmra.mrb[28].mxu0 %vm879_vm6, %v7824_v62 }
 0x4a6   : > { %v10583_v60 = vpop.f32.mrb[0].mxu1 }
 0x4a7   : > { %v4088_v14 = vpop.f32.mrb[1].mxu1 }
 0x4a8   : > { %v10584_v61 = vpop.f32.mrb[2].mxu1 }
 0x4a9   : > { %v4091_v12 = vpop.f32.mrb[3].mxu1 }
 0x4ae   : > { %v10587_v1 = vpop.f32.mrb[4].mxu1 }
 0x4af   : > { %v4104_v53 = vpop.f32.mrb[5].mxu1 }
 0x4b0   : > { %v10588_v56 = vpop.f32.mrb[6].mxu1 }
 0x4b1   : > { %v4107_v47 = vpop.f32.mrb[7].mxu1 }
 0x4b6   : > { %v10591_v25 = vpop.f32.mrb[8].mxu1 }
 0x4b7   : > { %v4120_v57 = vpop.f32.mrb[9].mxu1 }
 0x4b8   : > { %v10592_v16 = vpop.f32.mrb[10].mxu1 }
 0x4b9   : > { %v4123_v48 = vpop.f32.mrb[11].mxu1 }
 0x4be   : > { %v13462_v30 = vpop.f32.mrb[12].mxu1 }
 0x4bf   : > { %v13464_v34 = vpop.f32.mrb[13].mxu1 }
 0x4c0   : > { %v13466_v4 = vpop.f32.mrb[14].mxu1 }
 0x4c1   : > { %v13468_v29 = vpop.f32.mrb[15].mxu1 }
 0x4c6   : > { %v13470_v10 = vpop.f32.mrb[16].mxu1 }
 0x4c7   : > { %v13472_v46 = vpop.f32.mrb[17].mxu1 }
 0x4c8   : > { %v13476_v59 = vpop.f32.mrb[18].mxu1 }
 0x4c9   : > { %v13478_v13 = vpop.f32.mrb[19].mxu1 }
 0x4cc   : > { %v11025_v22 = vpop.f32.mrb[0].mxu0 }
 0x4cd   : > { %v11089_v28 = vadd.f32 %v11025_v22, %v10583_v60  ;;  %v7912_v40 = vpop.f32.mrb[1].mxu0 }
 0x4ce   : > { %v11090_v24 = vadd.f32 %v7912_v40, %v4088_v14  ;;  %v11026_v63 = vpop.f32.mrb[2].mxu0 }
 0x4cf   : > { %v11091_v20 = vadd.f32 %v11026_v63, %v10584_v61  ;;  %v7915_v19 = vpop.f32.mrb[3].mxu0  ;;  %v13494_v27 = vadd.f32 %v11089_v28, %v13488_v9 }
 0x4d0   : > { %v13491_v5 = vadd.f32 %v11090_v24, %v13488_v9  ;;  %v11092_v8 = vadd.f32 %v7915_v19, %v4091_v12 }
 0x4d1   : > { %v13502_v58 = vadd.f32 %v11091_v20, %v13488_v9  ;;  %v8112_v42 = vsel %vm14401_vm8, %v13494_v27, 0.0 }
 0x4d2   : > { %v13497_v11 = vadd.f32 %v11092_v8, %v13488_v9  ;;  %v8109_v37 = vsel %vm14401_vm8, %v13491_v5, 0.0 }
 0x4d3   : > { %v8114_v50 = vsel %vm14401_vm8, %v13502_v58, 0.0 }
 0x4d4   : > { %v8110_v31 = vsel %vm14401_vm8, %v13497_v11, 0.0  ;;  %v11029_v52 = vpop.f32.mrb[4].mxu0 }
 0x4d5   : > { %v8111_v49 = vadd.f32 %v8110_v31, %v8109_v37  ;;  %v11093_v45 = vadd.f32 %v11029_v52, %v10587_v1  ;;  %v7928_v43 = vpop.f32.mrb[5].mxu0 }
 0x4d6   : > { %v11094_v17 = vadd.f32 %v7928_v43, %v4104_v53  ;;  %v11030_v54 = vpop.f32.mrb[6].mxu0 }
 0x4d7   : > { %v8113_v32 = vadd.f32 %v8112_v42, %v8111_v49  ;;  %v11095_v44 = vadd.f32 %v11030_v54, %v10588_v56  ;;  %v7931_v7 = vpop.f32.mrb[7].mxu0  ;;  %v13514_v39 = vadd.f32 %v11093_v45, %v13488_v9 }
 0x4d8   : > { %v13511_v18 = vadd.f32 %v11094_v17, %v13488_v9  ;;  %v11096_v26 = vadd.f32 %v7931_v7, %v4107_v47 }
 0x4d9   : > { %v8115_v0 = vadd.f32 %v8114_v50, %v8113_v32  ;;  %v13522_v55 = vadd.f32 %v11095_v44, %v13488_v9  ;;  %v8120_v61 = vsel %vm14401_vm8, %v13514_v39, 0.0 }
 0x4da   : > { %v8116_v3 = vsel %vm14401_vm8, %v13511_v18, 0.0  ;;  %v13519_v41 = vadd.f32 %v11096_v26, %v13488_v9 }
 0x4db   : > { %v8117_v35 = vadd.f32 %v8116_v3, %v8115_v0  ;;  %v8122_v33 = vsel %vm14401_vm8, %v13522_v55, 0.0 }
 0x4dc   : > { %v8118_v62 = vsel %vm14401_vm8, %v13519_v41, 0.0  ;;  %v11033_v15 = vpop.f32.mrb[8].mxu0 }
 0x4dd   : > { %v8119_v21 = vadd.f32 %v8118_v62, %v8117_v35  ;;  %v11097_v60 = vadd.f32 %v11033_v15, %v10591_v25  ;;  %v7944_v14 = vpop.f32.mrb[9].mxu0 }
 0x4de   : > { %v11098_v12 = vadd.f32 %v7944_v14, %v4120_v57  ;;  %v11034_v1 = vpop.f32.mrb[10].mxu0 }
 0x4df   : > { %v8121_v53 = vadd.f32 %v8120_v61, %v8119_v21  ;;  %v11099_v56 = vadd.f32 %v11034_v1, %v10592_v16  ;;  %v7947_v47 = vpop.f32.mrb[11].mxu0  ;;  %v13534_v24 = vadd.f32 %v11097_v60, %v13488_v9 }
 0x4e0   : > { %v13531_v22 = vadd.f32 %v11098_v12, %v13488_v9  ;;  %v11100_v28 = vadd.f32 %v7947_v47, %v4123_v48 }
 0x4e1   : > { %v8123_v40 = vadd.f32 %v8122_v33, %v8121_v53  ;;  %v13542_v20 = vadd.f32 %v11099_v56, %v13488_v9  ;;  %v8128_v45 = vsel %vm14401_vm8, %v13534_v24, 0.0 }
 0x4e2   : > { %v8124_v25 = vsel %vm14401_vm8, %v13531_v22, 0.0  ;;  %v13539_v57 = vadd.f32 %v11100_v28, %v13488_v9 }
 0x4e3   : > { %v8125_v63 = vadd.f32 %v8124_v25, %v8123_v40  ;;  %v8130_v7 = vsel %vm14401_vm8, %v13542_v20, 0.0 }
 0x4e4   : > { %v8126_v19 = vsel %vm14401_vm8, %v13539_v57, 0.0  ;;  %v11037_v8 = vpop.f32.mrb[12].mxu0 }
 0x4e5   : > { %v8127_v37 = vadd.f32 %v8126_v19, %v8125_v63  ;;  %v11101_v31 = vadd.f32 %v11037_v8, %v13462_v30  ;;  %v7960_v52 = vpop.f32.mrb[13].mxu0 }
 0x4e6   : > { %v10637_v16 = vpop.f32.mrb[20].mxu1  ;;  %v11102_v43 = vadd.f32 %v7960_v52, %v13464_v34  ;;  %v11038_v42 = vpop.f32.mrb[14].mxu0 }
 0x4e7   : > { %v4462_v48 = vpop.f32.mrb[21].mxu1  ;;  %v8129_v54 = vadd.f32 %v8128_v45, %v8127_v37  ;;  %v11103_v32 = vadd.f32 %v11038_v42, %v13466_v4  ;;  %v7963_v44 = vpop.f32.mrb[15].mxu0  ;;  %v13558_v0 = vadd.f32 %v11101_v31, %v13488_v9 }
 0x4e8   : > { %v10638_v49 = vpop.f32.mrb[22].mxu1  ;;  %v13554_v50 = vadd.f32 %v11102_v43, %v13488_v9  ;;  %v11104_v30 = vadd.f32 %v7963_v44, %v13468_v29 }
 0x4e9   : > { %v4465_v17 = vpop.f32.mrb[23].mxu1  ;;  %v8131_v26 = vadd.f32 %v8130_v7, %v8129_v54  ;;  %v13566_v62 = vadd.f32 %v11103_v32, %v13488_v9  ;;  %v8136_v1 = vsel %vm14401_vm8, %v13558_v0, 0.0 }
 0x4ea   : > { %v8132_v34 = vsel %vm14401_vm8, %v13554_v50, 0.0  ;;  %v13563_v3 = vadd.f32 %v11104_v30, %v13488_v9 }
 0x4eb   : > { %v8133_v4 = vadd.f32 %v8132_v34, %v8131_v26  ;;  %v8138_v25 = vsel %vm14401_vm8, %v13566_v62, 0.0 }
 0x4ec   : > { %v8134_v15 = vsel %vm14401_vm8, %v13563_v3, 0.0  ;;  %v11041_v21 = vpop.f32.mrb[16].mxu0 }
 0x4ed   : > { %v8135_v60 = vadd.f32 %v8134_v15, %v8133_v4  ;;  %v11105_v14 = vadd.f32 %v11041_v21, %v13470_v10  ;;  %v7976_v61 = vpop.f32.mrb[17].mxu0 }
 0x4ee   : > { %v10641_v35 = vpop.f32.mrb[24].mxu1  ;;  %v11106_v53 = vadd.f32 %v7976_v61, %v13472_v46  ;;  %v11042_v56 = vpop.f32.mrb[18].mxu0 }
 0x4ef   : > { %v4478_v29 = vpop.f32.mrb[25].mxu1  ;;  %v8137_v33 = vadd.f32 %v8136_v1, %v8135_v60  ;;  %v11107_v28 = vadd.f32 %v11042_v56, %v13476_v59  ;;  %v7979_v40 = vpop.f32.mrb[19].mxu0  ;;  %v13582_v8 = vadd.f32 %v11105_v14, %v13488_v9 }
 0x4f0   : > { %v10642_v12 = vpop.f32.mrb[26].mxu1  ;;  %v13578_v63 = vadd.f32 %v11106_v53, %v13488_v9  ;;  %v11108_v10 = vadd.f32 %v7979_v40, %v13478_v13 }
 0x4f1   : > { %v4481_v47 = vpop.f32.mrb[27].mxu1  ;;  %v8139_v19 = vadd.f32 %v8138_v25, %v8137_v33  ;;  %v13590_v52 = vadd.f32 %v11107_v28, %v13488_v9  ;;  %v8144_v7 = vsel %vm14401_vm8, %v13582_v8, 0.0 }
 0x4f2   : > { %v8140_v46 = vsel %vm14401_vm8, %v13578_v63, 0.0  ;;  %v13587_v37 = vadd.f32 %v11108_v10, %v13488_v9 }
 0x4f3   : > { %v8141_v59 = vadd.f32 %v8140_v46, %v8139_v19  ;;  %v8146_v60 = vsel %vm14401_vm8, %v13590_v52, 0.0 }
 0x4f4   : > { %v8142_v45 = vsel %vm14401_vm8, %v13587_v37, 0.0  ;;  %v11045_v43 = vpop.f32.mrb[20].mxu0 }
 0x4f5   : > { %v8143_v42 = vadd.f32 %v8142_v45, %v8141_v59  ;;  %v11109_v54 = vadd.f32 %v11045_v43, %v10637_v16  ;;  %v7992_v32 = vpop.f32.mrb[21].mxu0 }
 0x4f6   : > { %v10645_v31 = vpop.f32.mrb[28].mxu1  ;;  %v11110_v30 = vadd.f32 %v7992_v32, %v4462_v48  ;;  %v11046_v26 = vpop.f32.mrb[22].mxu0 }
 0x4f7   : > { %v4494_v13 = vpop.f32.mrb[29].mxu1  ;;  %v8145_v4 = vadd.f32 %v8144_v7, %v8143_v42  ;;  %v11111_v15 = vadd.f32 %v11046_v26, %v10638_v49  ;;  %v7995_v21 = vpop.f32.mrb[23].mxu0  ;;  %v13602_v16 = vadd.f32 %v11109_v54, %v13488_v9 }
 0x4f8   : > { %v10646_v44 = vpop.f32.mrb[30].mxu1  ;;  %v13599_v14 = vadd.f32 %v11110_v30, %v13488_v9  ;;  %v11112_v61 = vadd.f32 %v7995_v21, %v4465_v17 }
 0x4f9   : > { %v4497_v34 = vpop.f32.mrb[31].mxu1  ;;  %v8147_v1 = vadd.f32 %v8146_v60, %v8145_v4  ;;  %v13610_v49 = vadd.f32 %v11111_v15, %v13488_v9  ;;  %v8152_v10 = vsel %vm14401_vm8, %v13602_v16, 0.0 }
 0x4fa   : > { %v8148_v53 = vsel %vm14401_vm8, %v13599_v14, 0.0  ;;  %v13607_v48 = vadd.f32 %v11112_v61, %v13488_v9 }
 0x4fb   : > { %v8149_v56 = vadd.f32 %v8148_v53, %v8147_v1  ;;  %v8154_v42 = vsel %vm14401_vm8, %v13610_v49, 0.0 }
 0x4fc   : > { %v8150_v33 = vsel %vm14401_vm8, %v13607_v48, 0.0  ;;  %v11049_v28 = vpop.f32.mrb[24].mxu0 }
 0x4fd   : > { %v8151_v40 = vadd.f32 %v8150_v33, %v8149_v56  ;;  %v11113_v17 = vadd.f32 %v11049_v28, %v10641_v35  ;;  %v8008_v25 = vpop.f32.mrb[25].mxu0 }
 0x4fe   : > { %v11114_v19 = vadd.f32 %v8008_v25, %v4478_v29  ;;  %v11050_v46 = vpop.f32.mrb[26].mxu0 }
 0x4ff   : > { %v8153_v59 = vadd.f32 %v8152_v10, %v8151_v40  ;;  %v11115_v45 = vadd.f32 %v11050_v46, %v10642_v12  ;;  %v8011_v43 = vpop.f32.mrb[27].mxu0  ;;  %v13622_v30 = vadd.f32 %v11113_v17, %v13488_v9 }
 0x500   : > { %v13619_v54 = vadd.f32 %v11114_v19, %v13488_v9  ;;  %v11116_v32 = vadd.f32 %v8011_v43, %v4481_v47 }
 0x501   : > { %v8155_v7 = vadd.f32 %v8154_v42, %v8153_v59  ;;  %v13630_v12 = vadd.f32 %v11115_v45, %v13488_v9  ;;  %v8160_v61 = vsel %vm14401_vm8, %v13622_v30, 0.0 }
 0x502   : > { %v8156_v35 = vsel %vm14401_vm8, %v13619_v54, 0.0  ;;  %v13627_v29 = vadd.f32 %v11116_v32, %v13488_v9 }
 0x503   : > { %v8157_v26 = vadd.f32 %v8156_v35, %v8155_v7  ;;  %v8162_v40 = vsel %vm14401_vm8, %v13630_v12, 0.0 }
 0x504   : > { %v8158_v4 = vsel %vm14401_vm8, %v13627_v29, 0.0  ;;  %v11053_v15 = vpop.f32.mrb[28].mxu0 }
 0x505   : > { %v8159_v21 = vadd.f32 %v8158_v4, %v8157_v26  ;;  %v11117_v47 = vadd.f32 %v11053_v15, %v10645_v31  ;;  %v8024_v60 = vpop.f32.mrb[29].mxu0 }
 0x506   : > { %v11118_v1 = vadd.f32 %v8024_v60, %v4494_v13  ;;  %v11054_v53 = vpop.f32.mrb[30].mxu0 }
 0x507   : > { %v8161_v56 = vadd.f32 %v8160_v61, %v8159_v21  ;;  %v11119_v33 = vadd.f32 %v11054_v53, %v10646_v44  ;;  %v8027_v28 = vpop.f32.mrb[31].mxu0  ;;  %v13642_v19 = vadd.f32 %v11117_v47, %v13488_v9 }
 0x508   : > { %v13639_v17 = vadd.f32 %v11118_v1, %v13488_v9  ;;  %v11120_v25 = vadd.f32 %v8027_v28, %v4497_v34 }
 0x509   : > { %v8163_v10 = vadd.f32 %v8162_v40, %v8161_v56  ;;  %v13650_v44 = vadd.f32 %v11119_v33, %v13488_v9  ;;  %v8168_v34 = vsel %vm14401_vm8, %v13642_v19, 0.0 }
 0x50a   : > { %v8164_v31 = vsel %vm14401_vm8, %v13639_v17, 0.0  ;;  %v13647_v13 = vadd.f32 %v11120_v25, %v13488_v9  ;;  %v13664_v9 = vld [vmem:[%s14388_s6] sm:$0x3] }
 0x50b   : > { %v8165_v46 = vadd.f32 %v8164_v31, %v8163_v10  ;;  %v8170_v42 = vsel %vm14401_vm8, %v13650_v44, 0.0 }
 0x50c   : > { %v8166_v59 = vsel %vm14401_vm8, %v13647_v13, 0.0 }
 0x50d   : > { %v8167_v45 = vadd.f32 %v8166_v59, %v8165_v46 }
 0x50f   : > { %v8169_v43 = vadd.f32 %v8168_v34, %v8167_v45 }
 0x511   : > { %v8171_v32 = vadd.f32 %v8170_v42, %v8169_v43 }
 0x513   : > { %v8172_v7 = vrot.slane %v8171_v32, 4 }
 0x515   : > { %v8173_v35 = vadd.f32 %v8172_v7, %v8171_v32 }
 0x517   : > { %v8174_v26 = vrot.slane %v8173_v35, 2 }
 0x519   : > { %v8175_v4 = vadd.f32 %v8174_v26, %v8173_v35 }
 0x51b   : > { %v8176_v15 = vrot.slane %v8175_v4, 1 }
 0x51d   : > { %v8177_v21 = vadd.f32 %v8176_v15, %v8175_v4 }
 0x51f   : > { %11060 = vmatmul.mubr.msk.f32.vlgmr.msra.gmra.mrb[32].mxu1 %vm14401_vm8, %v8177_v21 }
 0x520   : > { %11064 = vmatprep.mubr.msk.f32.mxu1 %vm11991_vm7, %v11992_v36  ;;  %11063 = vmatpush3.msk.msra.mxu1 %vm8259_vm9, %v13664_v9 }
 0x521   : > { %11082 = vmatprep.subr.bf16.mxu1 %v11990_v38 }
 0x5f2   : > { %v8249_v47 = vpop.f32.mrb[32].mxu1 }
 0x5f3   : > { %v8253_v60 = vmul.f32 0.00048828125, %v8249_v47  ;;  %v11061_v61 = vpop.f32.mrb[33].mxu1 }
 0x5f5   : > { %11065 = vmatmul.mubr.msk.f32.vlgmr.msra.gmra.mrb[34].mxu1 %vm8255_vm10, %v8253_v60 }
 0x5f6   : > { %11084 = vmatpush3.bf16.msra.mxu1 %v13455_v2  ;;  %11071 = vmatprep.mubr.msk.f32.mxu1 %vm11991_vm7, %v11992_v36 }
 0x5f7   : > { %11074 = vmatprep.subr.mxu1 %v11992_v36 }
 0x6c8   : > { %v8329_v1 = vpop.f32.mrb[34].mxu1 }
 0x6c9   : > { %v11066_v53 = vpop.f32.mrb[35].mxu1  ;;  %v13675_v56 = vrot.slane %v8329_v1, %v13481_v51 }
 0x6cb   : > { %v13679_v38 = vsub.f32 %v13491_v5, %v13675_v56  ;;  %v13683_v33 = vsub.f32 %v13497_v11, %v13675_v56  ;;  %v13687_v2 = vsub.f32 %v13494_v27, %v13675_v56  ;;  %v13691_v28 = vsub.f32 %v13502_v58, %v13675_v56 }
 0x6cc   : > { %v13699_v5 = vsub.f32 %v13511_v18, %v13675_v56  ;;  %v13705_v27 = vsub.f32 %v13519_v41, %v13675_v56  ;;  %v13713_v59 = vsub.f32 %v13514_v39, %v13675_v56  ;;  %v13720_v41 = vsub.f32 %v13522_v55, %v13675_v56 }
 0x6cd   : > { %v8369_v40 = vmul.f32 %v13679_v38, %v13679_v38  ;;  %v8370_v25 = vmul.f32 %v13683_v33, %v13683_v33  ;;  %v8371_v11 = vmul.f32 %v13687_v2, %v13687_v2  ;;  %v8372_v58 = vmul.f32 %v13691_v28, %v13691_v28 }
 0x6ce   : > { %v8373_v18 = vmul.f32 %v13699_v5, %v13699_v5  ;;  %v8374_v43 = vmul.f32 %v13705_v27, %v13705_v27  ;;  %v13727_v39 = vsub.f32 %v13531_v22, %v13675_v56  ;;  %v8375_v7 = vmul.f32 %v13713_v59, %v13713_v59 }
 0x6cf   : > { %v8401_v10 = vsel %vm14401_vm8, %v8369_v40, 0.0  ;;  %v8402_v31 = vsel %vm14401_vm8, %v8370_v25, 0.0  ;;  %v8404_v45 = vsel %vm14401_vm8, %v8371_v11, 0.0  ;;  %v8406_v42 = vsel %vm14401_vm8, %v8372_v58, 0.0 }
 0x6d0   : > { %v8403_v46 = vadd.f32 %v8402_v31, %v8401_v10  ;;  %v8408_v35 = vsel %vm14401_vm8, %v8373_v18, 0.0  ;;  %v13734_v55 = vsub.f32 %v13539_v57, %v13675_v56  ;;  %v8376_v4 = vmul.f32 %v13720_v41, %v13720_v41 }
 0x6d1   : > { %v8410_v15 = vsel %vm14401_vm8, %v8374_v43, 0.0  ;;  %v13741_v22 = vsub.f32 %v13534_v24, %v13675_v56  ;;  %v8377_v47 = vmul.f32 %v13727_v39, %v13727_v39  ;;  %v8412_v60 = vsel %vm14401_vm8, %v8375_v7, 0.0 }
 0x6d2   : > { %v8405_v34 = vadd.f32 %v8404_v45, %v8403_v46  ;;  %v13748_v57 = vsub.f32 %v13542_v20, %v13675_v56  ;;  %v8378_v1 = vmul.f32 %v13734_v55, %v13734_v55  ;;  %v8414_v53 = vsel %vm14401_vm8, %v8376_v4, 0.0 }
 0x6d3   : > { %v13755_v24 = vsub.f32 %v13554_v50, %v13675_v56  ;;  %v8379_v25 = vmul.f32 %v13741_v22, %v13741_v22  ;;  %v8416_v11 = vsel %vm14401_vm8, %v8377_v47, 0.0  ;;  %v13762_v20 = vsub.f32 %v13563_v3, %v13675_v56 }
 0x6d4   : > { %v8407_v32 = vadd.f32 %v8406_v42, %v8405_v34  ;;  %v8380_v10 = vmul.f32 %v13748_v57, %v13748_v57  ;;  %v8418_v31 = vsel %vm14401_vm8, %v8378_v1, 0.0  ;;  %v13769_v50 = vsub.f32 %v13558_v0, %v13675_v56 }
 0x6d5   : > { %v8381_v18 = vmul.f32 %v13755_v24, %v13755_v24  ;;  %v8420_v45 = vsel %vm14401_vm8, %v8379_v25, 0.0  ;;  %v13776_v3 = vsub.f32 %v13566_v62, %v13675_v56  ;;  %v8382_v43 = vmul.f32 %v13762_v20, %v13762_v20 }
 0x6d6   : > { %v8409_v26 = vadd.f32 %v8408_v35, %v8407_v32  ;;  %v8422_v42 = vsel %vm14401_vm8, %v8380_v10, 0.0  ;;  %v13783_v0 = vsub.f32 %v13578_v63, %v13675_v56  ;;  %v8383_v7 = vmul.f32 %v13769_v50, %v13769_v50 }
 0x6d7   : > { %v8424_v35 = vsel %vm14401_vm8, %v8381_v18, 0.0  ;;  %v13790_v62 = vsub.f32 %v13587_v37, %v13675_v56  ;;  %v8384_v4 = vmul.f32 %v13776_v3, %v13776_v3  ;;  %v13797_v63 = vsub.f32 %v13582_v8, %v13675_v56 }
 0x6d8   : > { %v8411_v21 = vadd.f32 %v8410_v15, %v8409_v26  ;;  %v8426_v15 = vsel %vm14401_vm8, %v8382_v43, 0.0  ;;  %v8385_v47 = vmul.f32 %v13783_v0, %v13783_v0  ;;  %v13804_v37 = vsub.f32 %v13590_v52, %v13675_v56 }
 0x6d9   : > { %v8386_v1 = vmul.f32 %v13790_v62, %v13790_v62  ;;  %v13811_v8 = vsub.f32 %v13599_v14, %v13675_v56  ;;  %v8387_v25 = vmul.f32 %v13797_v63, %v13797_v63  ;;  %v13818_v52 = vsub.f32 %v13607_v48, %v13675_v56 }
 0x6da   : > { %v8413_v61 = vadd.f32 %v8412_v60, %v8411_v21  ;;  %v8428_v60 = vsel %vm14401_vm8, %v8383_v7, 0.0  ;;  %v8388_v10 = vmul.f32 %v13804_v37, %v13804_v37  ;;  %v13825_v14 = vsub.f32 %v13602_v16, %v13675_v56 }
 0x6db   : > { %v8389_v18 = vmul.f32 %v13811_v8, %v13811_v8  ;;  %v13832_v48 = vsub.f32 %v13610_v49, %v13675_v56  ;;  %v8390_v43 = vmul.f32 %v13818_v52, %v13818_v52  ;;  %v13839_v16 = vsub.f32 %v13619_v54, %v13675_v56 }
 0x6dc   : > { %v8415_v40 = vadd.f32 %v8414_v53, %v8413_v61  ;;  %v8430_v53 = vsel %vm14401_vm8, %v8384_v4, 0.0  ;;  %v8391_v7 = vmul.f32 %v13825_v14, %v13825_v14  ;;  %v13846_v49 = vsub.f32 %v13627_v29, %v13675_v56 }
 0x6dd   : > { %v8392_v4 = vmul.f32 %v13832_v48, %v13832_v48  ;;  %v13853_v54 = vsub.f32 %v13622_v30, %v13675_v56  ;;  %v13860_v29 = vsub.f32 %v13630_v12, %v13675_v56  ;;  %v13867_v30 = vsub.f32 %v13639_v17, %v13675_v56 }
 0x6de   : > { %v8417_v58 = vadd.f32 %v8416_v11, %v8415_v40  ;;  %v8432_v11 = vsel %vm14401_vm8, %v8385_v47, 0.0  ;;  %v8393_v47 = vmul.f32 %v13839_v16, %v13839_v16  ;;  %v13874_v12 = vsub.f32 %v13647_v13, %v13675_v56 }
 0x6df   : > { %v13881_v17 = vsub.f32 %v13642_v19, %v13675_v56  ;;  %v13888_v13 = vsub.f32 %v13650_v44, %v13675_v56 }
 0x6e0   : > { %v8419_v46 = vadd.f32 %v8418_v31, %v8417_v58  ;;  %v8434_v31 = vsel %vm14401_vm8, %v8386_v1, 0.0  ;;  %v8394_v1 = vmul.f32 %v13846_v49, %v13846_v49 }
 0x6e1   : > { %v8399_v19 = vmul.f32 %v13881_v17, %v13881_v17 }
 0x6e2   : > { %v8421_v34 = vadd.f32 %v8420_v45, %v8419_v46  ;;  %v8436_v45 = vsel %vm14401_vm8, %v8387_v25, 0.0  ;;  %v8395_v25 = vmul.f32 %v13853_v54, %v13853_v54 }
 0x6e3   : > { %v8460_v44 = vsel %vm14401_vm8, %v8399_v19, 0.0 }
 0x6e4   : > { %v8423_v32 = vadd.f32 %v8422_v42, %v8421_v34  ;;  %v8438_v42 = vsel %vm14401_vm8, %v8388_v10, 0.0  ;;  %v8396_v10 = vmul.f32 %v13860_v29, %v13860_v29 }
 0x6e6   : > { %v8425_v26 = vadd.f32 %v8424_v35, %v8423_v32  ;;  %v8440_v35 = vsel %vm14401_vm8, %v8389_v18, 0.0  ;;  %v8397_v18 = vmul.f32 %v13867_v30, %v13867_v30 }
 0x6e8   : > { %v8427_v21 = vadd.f32 %v8426_v15, %v8425_v26  ;;  %v8442_v15 = vsel %vm14401_vm8, %v8390_v43, 0.0  ;;  %v8398_v43 = vmul.f32 %v13874_v12, %v13874_v12 }
 0x6ea   : > { %v8429_v61 = vadd.f32 %v8428_v60, %v8427_v21  ;;  %v8444_v60 = vsel %vm14401_vm8, %v8391_v7, 0.0  ;;  %v8456_v7 = vsel %vm14401_vm8, %v8397_v18, 0.0 }
 0x6ec   : > { %v8431_v40 = vadd.f32 %v8430_v53, %v8429_v61  ;;  %v8446_v53 = vsel %vm14401_vm8, %v8392_v4, 0.0  ;;  %v8458_v4 = vsel %vm14401_vm8, %v8398_v43, 0.0 }
 0x6ee   : > { %v8433_v58 = vadd.f32 %v8432_v11, %v8431_v40  ;;  %v8448_v11 = vsel %vm14401_vm8, %v8393_v47, 0.0 }
 0x6f0   : > { %v8435_v46 = vadd.f32 %v8434_v31, %v8433_v58  ;;  %v8450_v31 = vsel %vm14401_vm8, %v8394_v1, 0.0 }
 0x6f2   : > { %v8437_v34 = vadd.f32 %v8436_v45, %v8435_v46  ;;  %v8452_v45 = vsel %vm14401_vm8, %v8395_v25, 0.0 }
 0x6f4   : > { %v8439_v32 = vadd.f32 %v8438_v42, %v8437_v34  ;;  %v8454_v42 = vsel %vm14401_vm8, %v8396_v10, 0.0 }
 0x6f6   : > { %v8441_v26 = vadd.f32 %v8440_v35, %v8439_v32 }
 0x6f8   : > { %v8443_v21 = vadd.f32 %v8442_v15, %v8441_v26  ;;  %v8400_v26 = vmul.f32 %v13888_v13, %v13888_v13 }
 0x6fa   : > { %v8445_v61 = vadd.f32 %v8444_v60, %v8443_v21  ;;  %v8462_v21 = vsel %vm14401_vm8, %v8400_v26, 0.0 }
 0x6fc   : > { %v8447_v40 = vadd.f32 %v8446_v53, %v8445_v61 }
 0x6fe   : > { %v8449_v58 = vadd.f32 %v8448_v11, %v8447_v40 }
 0x700   : > { %v8451_v46 = vadd.f32 %v8450_v31, %v8449_v58 }
 0x702   : > { %v8453_v34 = vadd.f32 %v8452_v45, %v8451_v46  ;;  %v8621_v45 = vrot.slane %v13484_v6, 1 }
 0x704   : > { %v8455_v32 = vadd.f32 %v8454_v42, %v8453_v34 }
 0x706   : > { %v8457_v35 = vadd.f32 %v8456_v7, %v8455_v32  ;;  %v8662_v32 = vsub.s32 2, %v13474_v23 }
 0x708   : > { %v8459_v15 = vadd.f32 %v8458_v4, %v8457_v35 }
 0x70a   : > { %v8461_v56 = vadd.f32 %v8460_v44, %v8459_v15 }
 0x70c   : > { %v8463_v47 = vadd.f32 %v8462_v21, %v8461_v56 }
 0x70e   : > { %v8464_v60 = vrot.slane %v8463_v47, 4 }
 0x710   : > { %v8465_v61 = vadd.f32 %v8464_v60, %v8463_v47 }
 0x712   : > { %v8466_v1 = vrot.slane %v8465_v61, 2 }
 0x714   : > { %v8467_v53 = vadd.f32 %v8466_v1, %v8465_v61 }
 0x716   : > { %v8468_v40 = vrot.slane %v8467_v53, 1 }
 0x718   : > { %v8469_v25 = vadd.f32 %v8468_v40, %v8467_v53 }
 0x71a   : > { %11072 = vmatmul.mubr.msk.f32.vlgmr.msra.gmra.mrb[36].mxu1 %vm14401_vm8, %v8469_v25 }
 0x71b   : > { %11075 = vmatpush3.msk.msra.mxu1 %vm8259_vm9, %v13664_v9  ;;  %11076 = vmatprep.mubr.msk.f32.mxu1 %vm11991_vm7, %v11992_v36  ;;  %v13911_v36 = vrot.slane %v13484_v6, %v8662_v32 }
 0x7ed   : > { %v8539_v11 = vpop.f32.mrb[36].mxu1 }
 0x7ee   : > { %v8543_v58 = vmul.f32 0.00048828125, %v8539_v11  ;;  %v11073_v10 = vpop.f32.mrb[37].mxu1 }
 0x7f0   : > { %v8544_v31 = vmax.f32 %v8543_v58, 0.0 }
 0x7f2   : > { %v8545_v46 = vadd.f32 1e-05, %v8544_v31 }
 0x7f4   : > { %11946 = vrsqrt.f32 %v8545_v46 }
 0x7fe   : > { %v11947_v18 = vpop.eup %11946 }
 0x7ff   : > { %11077 = vmatmul.mubr.msk.f32.vlgmr.msra.gmra.mrb[38].mxu1 %vm8255_vm10, %v11947_v18 }
 0x8d2   : > { %v8616_v34 = vpop.f32.mrb[38].mxu1 }
 0x8d3   : > { %v11078_v43 = vpop.f32.mrb[39].mxu1  ;;  %v8623_v42 = vmul.f32 %v8621_v45, %v8616_v34 }
 0x8d5   : > { %v8627_v9 = vrot.slane %v8623_v42, %v13481_v51 }
 0x8d7   : > { %v8628_v19 = vmul.f32 %v8627_v9, %v13679_v38  ;;  %v8629_v7 = vmul.f32 %v8627_v9, %v13683_v33  ;;  %v8630_v35 = vmul.f32 %v8627_v9, %v13687_v2  ;;  %v8631_v26 = vmul.f32 %v8627_v9, %v13691_v28 }
 0x8d8   : > { %v8632_v4 = vmul.f32 %v8627_v9, %v13699_v5  ;;  %v8633_v15 = vmul.f32 %v8627_v9, %v13705_v27  ;;  %v8634_v44 = vmul.f32 %v8627_v9, %v13713_v59  ;;  %v8635_v23 = vmul.f32 %v8627_v9, %v13720_v41 }
 0x8d9   : > { %v8636_v51 = vmul.f32 %v8627_v9, %v13727_v39  ;;  %v8637_v6 = vmul.f32 %v8627_v9, %v13734_v55  ;;  %v8638_v38 = vmul.f32 %v8627_v9, %v13741_v22  ;;  %v8639_v33 = vmul.f32 %v8627_v9, %v13748_v57 }
 0x8da   : > { %v8640_v2 = vmul.f32 %v8627_v9, %v13755_v24  ;;  %v8641_v28 = vmul.f32 %v8627_v9, %v13762_v20  ;;  %v8642_v5 = vmul.f32 %v8627_v9, %v13769_v50  ;;  %v8643_v27 = vmul.f32 %v8627_v9, %v13776_v3 }
 0x8db   : > { %v8644_v59 = vmul.f32 %v8627_v9, %v13783_v0  ;;  %v8645_v41 = vmul.f32 %v8627_v9, %v13790_v62  ;;  %v8646_v39 = vmul.f32 %v8627_v9, %v13797_v63  ;;  %v8647_v55 = vmul.f32 %v8627_v9, %v13804_v37 }
 0x8dc   : > { %v8648_v22 = vmul.f32 %v8627_v9, %v13811_v8  ;;  %v8649_v57 = vmul.f32 %v8627_v9, %v13818_v52  ;;  %v8650_v24 = vmul.f32 %v8627_v9, %v13825_v14  ;;  %v8651_v20 = vmul.f32 %v8627_v9, %v13832_v48 }
 0x8dd   : > { %v8652_v50 = vmul.f32 %v8627_v9, %v13839_v16  ;;  %v8653_v3 = vmul.f32 %v8627_v9, %v13846_v49  ;;  %v8654_v0 = vmul.f32 %v8627_v9, %v13853_v54  ;;  %v8655_v62 = vmul.f32 %v8627_v9, %v13860_v29 }
 0x8de   : > { %v8656_v63 = vmul.f32 %v8627_v9, %v13867_v30  ;;  %v8657_v37 = vmul.f32 %v8627_v9, %v13874_v12  ;;  %v8658_v8 = vmul.f32 %v8627_v9, %v13881_v17  ;;  %v8659_v52 = vmul.f32 %v8627_v9, %v13888_v13 }
 0x8df   : > { %v13946_v14 = vadd.f32 %v13911_v36, %v8628_v19  ;;  %v13949_v48 = vadd.f32 %v13911_v36, %v8629_v7  ;;  %v13952_v16 = vadd.f32 %v13911_v36, %v8630_v35  ;;  %v13955_v49 = vadd.f32 %v13911_v36, %v8631_v26 }
 0x8e0   : > { %v13958_v54 = vadd.f32 %v13911_v36, %v8632_v4  ;;  %v13961_v29 = vadd.f32 %v13911_v36, %v8633_v15  ;;  %v13964_v30 = vadd.f32 %v13911_v36, %v8634_v44  ;;  %v13967_v12 = vadd.f32 %v13911_v36, %v8635_v23 }
 0x8e1   : > { %v13970_v17 = vadd.f32 %v13911_v36, %v8636_v51  ;;  %v13973_v13 = vadd.f32 %v13911_v36, %v8637_v6  ;;  %v13976_v56 = vadd.f32 %v13911_v36, %v8638_v38  ;;  %v13979_v21 = vadd.f32 %v13911_v36, %v8639_v33 }
 0x8e2   : > { %v13982_v47 = vadd.f32 %v13911_v36, %v8640_v2  ;;  %v13985_v60 = vadd.f32 %v13911_v36, %v8641_v28  ;;  %v13988_v61 = vadd.f32 %v13911_v36, %v8642_v5  ;;  %v13991_v1 = vadd.f32 %v13911_v36, %v8643_v27 }
 0x8e3   : > { %v13994_v53 = vadd.f32 %v13911_v36, %v8644_v59  ;;  %v13997_v40 = vadd.f32 %v13911_v36, %v8645_v41  ;;  %v14000_v25 = vadd.f32 %v13911_v36, %v8646_v39  ;;  %v14003_v11 = vadd.f32 %v13911_v36, %v8647_v55 }
 0x8e4   : > { %v14006_v58 = vadd.f32 %v13911_v36, %v8648_v22  ;;  %v14009_v10 = vadd.f32 %v13911_v36, %v8649_v57  ;;  %v14012_v31 = vadd.f32 %v13911_v36, %v8650_v24  ;;  %v14015_v46 = vadd.f32 %v13911_v36, %v8651_v20 }
 0x8e5   : > { %v14018_v18 = vadd.f32 %v13911_v36, %v8652_v50  ;;  %v14021_v45 = vadd.f32 %v13911_v36, %v8653_v3  ;;  %v14024_v34 = vadd.f32 %v13911_v36, %v8654_v0  ;;  %v14027_v43 = vadd.f32 %v13911_v36, %v8655_v62 }
 0x8e6   : > { %v14030_v42 = vadd.f32 %v13911_v36, %v8656_v63  ;;  %v14033_v32 = vadd.f32 %v13911_v36, %v8657_v37  ;;  %vm8696_vm11 = vcmp.gt.f32.partialorder %v13946_v14, 0.0  ;;  %vm8697_vm12 = vcmp.gt.f32.partialorder %v13949_v48, 0.0 }
 0x8e7   : > { %vm8698_vm13 = vcmp.gt.f32.partialorder %v13952_v16, 0.0  ;;  %vm8699_vm14 = vcmp.gt.f32.partialorder %v13955_v49, 0.0  ;;  %vm8700_vm15 = vcmp.gt.f32.partialorder %v13958_v54, 0.0  ;;  %vm8701_vm0 = vcmp.gt.f32.partialorder %v13961_v29, 0.0 }
 0x8e8   : > { %vm8702_vm1 = vcmp.gt.f32.partialorder %v13964_v30, 0.0  ;;  %vm8703_vm2 = vcmp.gt.f32.partialorder %v13967_v12, 0.0  ;;  %vm8704_vm3 = vcmp.gt.f32.partialorder %v13970_v17, 0.0  ;;  %v14046_v9 = vadd.f32 %v13911_v36, %v8658_v8 }
 0x8e9   : > { %v8728_v19 = vmul.f32 0.2, %v13946_v14  ;;  %v8729_v7 = vmul.f32 0.2, %v13949_v48  ;;  %v8730_v35 = vmul.f32 0.2, %v13952_v16  ;;  %v14056_v26 = vadd.f32 %v13911_v36, %v8659_v52 }
 0x8ea   : > { %vm8711_vm8 = vcmp.gt.f32.partialorder %v13991_v1, 0.0  ;;  %vm8712_vm5 = vcmp.gt.f32.partialorder %v13994_v53, 0.0  ;;  %v8731_v4 = vmul.f32 0.2, %v13955_v49  ;;  %v8732_v15 = vmul.f32 0.2, %v13958_v54 }
 0x8eb   : > { %v8733_v44 = vmul.f32 0.2, %v13961_v29  ;;  %vm8717_vm10 = vcmp.gt.f32.partialorder %v14009_v10, 0.0  ;;  %v8734_v36 = vmul.f32 0.2, %v13964_v30  ;;  %v14075_v6 = vsel %vm8696_vm11, %v13946_v14, %v8728_v19 }
 0x8ec   : > { %v8735_v23 = vmul.f32 0.2, %v13967_v12  ;;  %v8736_v51 = vmul.f32 0.2, %v13970_v17  ;;  %vm8721_vm4 = vcmp.gt.f32.partialorder %v14021_v45, 0.0  ;;  %v14087_v28 = vsel %vm8697_vm12, %v13949_v48, %v8729_v7 }
 0x8ed   : > { %v8737_v38 = vmul.f32 0.2, %v13973_v13  ;;  %v8738_v33 = vmul.f32 0.2, %v13976_v56  ;;  %v8739_v2 = vmul.f32 0.2, %v13979_v21  ;;  %v14099_v41 = vsel %vm8698_vm13, %v13952_v16, %v8730_v35 }
 0x8ee   : > { %vm8723_vm6 = vcmp.gt.f32.partialorder %v14027_v43, 0.0  ;;  %vm8724_vm9 = vcmp.gt.f32.partialorder %v14030_v42, 0.0  ;;  %vm8725_vm7 = vcmp.gt.f32.partialorder %v14033_v32, 0.0  ;;  %v8740_v5 = vmul.f32 0.2, %v13982_v47 }
 0x8ef   : > { %v8741_v27 = vmul.f32 0.2, %v13985_v60  ;;  %v8742_v59 = vmul.f32 0.2, %v13988_v61  ;;  %vm8726_vm12 = vcmp.gt.f32.partialorder %v14046_v9, 0.0  ;;  %vm8727_vm11 = vcmp.gt.f32.partialorder %v14056_v26, 0.0 }
 0x8f0   : > { %v8743_v39 = vmul.f32 0.2, %v13991_v1  ;;  %v8744_v55 = vmul.f32 0.2, %v13994_v53  ;;  %v8745_v22 = vmul.f32 0.2, %v13997_v40  ;;  %v14109_v57 = vsel %vm8699_vm14, %v13955_v49, %v8731_v4 }
 0x8f1   : > { %v8746_v24 = vmul.f32 0.2, %v14000_v25  ;;  %v8747_v20 = vmul.f32 0.2, %v14003_v11  ;;  %v8748_v50 = vmul.f32 0.2, %v14006_v58  ;;  %v14117_v3 = vsel %vm8700_vm15, %v13958_v54, %v8732_v15 }
 0x8f2   : > { %v8749_v0 = vmul.f32 0.2, %v14009_v10  ;;  %v8750_v62 = vmul.f32 0.2, %v14012_v31  ;;  %v8751_v63 = vmul.f32 0.2, %v14015_v46  ;;  %v8765_v37 = vsel %vm8701_vm0, %v13961_v29, %v8733_v44 }
 0x8f3   : > { %v8752_v8 = vmul.f32 0.2, %v14018_v18  ;;  %v8753_v52 = vmul.f32 0.2, %v14021_v45  ;;  %v8754_v14 = vmul.f32 0.2, %v14024_v34  ;;  %v8766_v48 = vsel %vm8702_vm1, %v13964_v30, %v8734_v36 }
 0x8f4   : > { %v8755_v16 = vmul.f32 0.2, %v14027_v43  ;;  %v8756_v49 = vmul.f32 0.2, %v14030_v42  ;;  %v8757_v54 = vmul.f32 0.2, %v14033_v32  ;;  %v8767_v29 = vsel %vm8703_vm2, %v13967_v12, %v8735_v23 }
 0x8f5   : > { %v8758_v19 = vmul.f32 0.2, %v14046_v9  ;;  %v8759_v7 = vmul.f32 0.2, %v14056_v26  ;;  %v8768_v35 = vsel %vm8704_vm3, %v13970_v17, %v8736_v51  ;;  %vm14424_vm13 = vcmp.gt.f32.partialorder %v13973_v13, 0.0  ;;  %v8792_v44 = vld [vmem:[#allocation3] sm:$0xff] }
 0x8f6   : > { %v8769_v30 = vsel %vm14424_vm13, %v13973_v13, %v8737_v38  ;;  %vm14425_vm14 = vcmp.gt.f32.partialorder %v13976_v56, 0.0  ;;  %vm14426_vm15 = vcmp.gt.f32.partialorder %v13979_v21, 0.0  ;;  %vm14427_vm0 = vcmp.gt.f32.partialorder %v13982_v47, 0.0  ;;  %v8793_v36 = vld [vmem:[#allocation3 + $0x8] sm:$0xff]  ;;  %v8795_v23 = vld [vmem:[#allocation3 + $0x18] sm:$0xff]  ;;  %v8796_v51 = vld [vmem:[#allocation3 + $0x20] sm:$0xff] }
 0x8f7   : > { %v8770_v4 = vsel %vm14425_vm14, %v13976_v56, %v8738_v33  ;;  %v8771_v12 = vsel %vm14426_vm15, %v13979_v21, %v8739_v2  ;;  %v8772_v15 = vsel %vm14427_vm0, %v13982_v47, %v8740_v5  ;;  %vm14428_vm1 = vcmp.gt.f32.partialorder %v13985_v60, 0.0  ;;  %v8798_v33 = vld [vmem:[#allocation3 + $0x30] sm:$0xff]  ;;  %v8799_v2 = vld [vmem:[#allocation3 + $0x38] sm:$0xff]  ;;  %v8800_v5 = vld [vmem:[#allocation3 + $0x40] sm:$0xff] }
 0x8f8   : > { %v8773_v17 = vsel %vm14428_vm1, %v13985_v60, %v8741_v27  ;;  %vm14429_vm2 = vcmp.gt.f32.partialorder %v13988_v61, 0.0  ;;  %v14165_v56 = vsel %vm8711_vm8, %v13991_v1, %v8743_v39  ;;  %v14170_v21 = vsel %vm8712_vm5, %v13994_v53, %v8744_v55  ;;  %v8794_v60 = vld [vmem:[#allocation3 + $0x10] sm:$0xff]  ;;  %v8801_v27 = vld [vmem:[#allocation3 + $0x48] sm:$0xff]  ;;  %v8803_v39 = vld [vmem:[#allocation3 + $0x58] sm:$0xff] }
 0x8f9   : > { %v14160_v13 = vsel %vm14429_vm2, %v13988_v61, %v8742_v59  ;;  %vm14430_vm3 = vcmp.gt.f32.partialorder %v13997_v40, 0.0  ;;  %v8797_v61 = vld [vmem:[#allocation3 + $0x28] sm:$0xff]  ;;  %vm14431_vm13 = vcmp.gt.f32.partialorder %v14000_v25, 0.0  ;;  %vm14432_vm8 = vcmp.gt.f32.partialorder %v14003_v11, 0.0  ;;  %v8802_v59 = vld [vmem:[#allocation3 + $0x50] sm:$0xff]  ;;  %v8804_v55 = vld [vmem:[#allocation3 + $0x60] sm:$0xff] }
 0x8fa   : > { %v14175_v47 = vsel %vm14430_vm3, %v13997_v40, %v8745_v22  ;;  %v14180_v38 = vsel %vm14431_vm13, %v14000_v25, %v8746_v24  ;;  %v14185_v1 = vsel %vm14432_vm8, %v14003_v11, %v8747_v20  ;;  %vm14433_vm5 = vcmp.gt.f32.partialorder %v14006_v58, 0.0  ;;  %v8805_v22 = vld [vmem:[#allocation3 + $0x68] sm:$0xff]  ;;  %v8806_v24 = vld [vmem:[#allocation3 + $0x70] sm:$0xff]  ;;  %v8808_v20 = vld [vmem:[#allocation3 + $0x80] sm:$0xff] }
 0x8fb   : > { %v14190_v53 = vsel %vm14433_vm5, %v14006_v58, %v8748_v50  ;;  %v14195_v40 = vsel %vm8717_vm10, %v14009_v10, %v8749_v0  ;;  %vm14434_vm14 = vcmp.gt.f32.partialorder %v14012_v31, 0.0  ;;  %vm14435_vm15 = vcmp.gt.f32.partialorder %v14015_v46, 0.0  ;;  %v8809_v50 = vld [vmem:[#allocation3 + $0x88] sm:$0xff] }
 0x8fc   : > { %v14200_v25 = vsel %vm14434_vm14, %v14012_v31, %v8750_v62  ;;  %v14205_v11 = vsel %vm14435_vm15, %v14015_v46, %v8751_v63  ;;  %vm14436_vm0 = vcmp.gt.f32.partialorder %v14018_v18, 0.0  ;;  %v14215_v10 = vsel %vm8721_vm4, %v14021_v45, %v8753_v52  ;;  %v8810_v62 = vld [vmem:[#allocation3 + $0x90] sm:$0xff]  ;;  %v8811_v63 = vld [vmem:[#allocation3 + $0x98] sm:$0xff] }
 0x8fd   : > { %v14210_v58 = vsel %vm14436_vm0, %v14018_v18, %v8752_v8  ;;  %vm14437_vm10 = vcmp.gt.f32.partialorder %v14024_v34, 0.0  ;;  %v14225_v46 = vsel %vm8723_vm6, %v14027_v43, %v8755_v16  ;;  %v14230_v18 = vsel %vm8724_vm9, %v14030_v42, %v8756_v49  ;;  %v8807_v42 = vld [vmem:[#allocation3 + $0x78] sm:$0xff]  ;;  %v8812_v8 = vld [vmem:[#allocation3 + $0xa0] sm:$0xff]  ;;  %v8813_v49 = vld [vmem:[#allocation3 + $0xa8] sm:$0xff] }
 0x8fe   : > { %v14220_v31 = vsel %vm14437_vm10, %v14024_v34, %v8754_v14  ;;  %v14235_v45 = vsel %vm8725_vm7, %v14033_v32, %v8757_v54  ;;  %v14240_v34 = vsel %vm8726_vm12, %v14046_v9, %v8758_v19  ;;  %v14245_v43 = vsel %vm8727_vm11, %v14056_v26, %v8759_v7  ;;  %v8814_v26 = vld [vmem:[#allocation3 + $0xb0] sm:$0xff]  ;;  %v8815_v54 = vld [vmem:[#allocation3 + $0xb8] sm:$0xff] }
 0x8ff   : > { %14438 = vst [vmem:[#allocation10_spill] sm:$0xff] %v14240_v34  ;;  %14439 = vst [vmem:[#allocation7_spill] sm:$0xff] %v14245_v43  ;;  %v8824_v0 = vadd.f32 %v8792_v44, %v14075_v6  ;;  %v8825_v32 = vadd.f32 %v8793_v36, %v14087_v28  ;;  %v8826_v52 = vadd.f32 %v8794_v60, %v14099_v41  ;;  %vm14440_vm4 = vcmask 130048   ;;  %v8816_v6 = vld [vmem:[#allocation3 + $0xc0] sm:$0xff]  ;;  %v8817_v28 = vld [vmem:[#allocation3 + $0xc8] sm:$0xff] }
 0x900   : > { %v8827_v9 = vadd.f32 %v8795_v23, %v14109_v57  ;;  %v8828_v14 = vadd.f32 %v8796_v51, %v14117_v3  ;;  %v8829_v16 = vadd.f32 %v8797_v61, %v8765_v37  ;;  %v8830_v19 = vadd.f32 %v8798_v33, %v8766_v48  ;;  %vm14441_vm6 = vmmov %vm14440_vm4  ;;  %v8818_v44 = vld [vmem:[#allocation3 + $0xd0] sm:$0xff]  ;;  %v8819_v3 = vld [vmem:[#allocation3 + $0xd8] sm:$0xff] }
 0x901   : > { %v8831_v7 = vadd.f32 %v8799_v2, %v8767_v29  ;;  %v8832_v43 = vadd.f32 %v8800_v5, %v8768_v35  ;;  %v8833_v34 = vadd.f32 %v8801_v27, %v8769_v30  ;;  %8856 = vst.msk [vmem:[#allocation3] sm:$0xff] %vm14440_vm4, %v8824_v0  ;;  %v8834_v41 = vadd.f32 %v8802_v59, %v8770_v4  ;;  %vm14442_vm7 = vmmov %vm14440_vm4  ;;  %v8820_v37 = vld [vmem:[#allocation3 + $0xe0] sm:$0xff]  ;;  %v8821_v48 = vld [vmem:[#allocation3 + $0xe8] sm:$0xff] }
 0x902   : > { %8857 = vst.msk [vmem:[#allocation3 + $0x8] sm:$0xff] %vm14441_vm6, %v8825_v32  ;;  %v8835_v36 = vadd.f32 %v8803_v39, %v8771_v12  ;;  %v8836_v57 = vadd.f32 %v8804_v55, %v8772_v15  ;;  %v8837_v60 = vadd.f32 %v8805_v22, %v8773_v17  ;;  %vm14443_vm9 = vmmov %vm14440_vm4  ;;  %v8838_v29 = vadd.f32 %v8806_v24, %v14160_v13  ;;  %v8822_v12 = vld [vmem:[#allocation3 + $0xf0] sm:$0xff]  ;;  %v8823_v15 = vld [vmem:[#allocation3 + $0xf8] sm:$0xff] }
 0x903   : > { %8858 = vst.msk [vmem:[#allocation3 + $0x10] sm:$0xff] %vm14442_vm7, %v8826_v52  ;;  %vm14444_vm11 = vmmov %vm14440_vm4  ;;  %v8839_v35 = vadd.f32 %v8807_v42, %v14165_v56  ;;  %v8840_v30 = vadd.f32 %v8808_v20, %v14170_v21  ;;  %v8841_v4 = vadd.f32 %v8809_v50, %v14175_v47  ;;  %v8842_v17 = vadd.f32 %v8810_v62, %v14180_v38 }
 0x904   : > { %8859 = vst.msk [vmem:[#allocation3 + $0x18] sm:$0xff] %vm14443_vm9, %v8827_v9  ;;  %vm14445_vm12 = vmmov %vm14440_vm4  ;;  %v8843_v13 = vadd.f32 %v8811_v63, %v14185_v1  ;;  %v8844_v56 = vadd.f32 %v8812_v8, %v14190_v53  ;;  %v8845_v21 = vadd.f32 %v8813_v49, %v14195_v40  ;;  %v8846_v47 = vadd.f32 %v8814_v26, %v14200_v25 }
 0x905   : > { %8860 = vst.msk [vmem:[#allocation3 + $0x20] sm:$0xff] %vm14444_vm11, %v8828_v14  ;;  %vm14446_vm1 = vmmov %vm14440_vm4  ;;  %v8847_v23 = vadd.f32 %v8815_v54, %v14205_v11  ;;  %v8848_v51 = vadd.f32 %v8816_v6, %v14210_v58  ;;  %v8849_v61 = vadd.f32 %v8817_v28, %v14215_v10  ;;  %v8850_v38 = vadd.f32 %v8818_v44, %v14220_v31 }
 0x906   : > { %8861 = vst.msk [vmem:[#allocation3 + $0x28] sm:$0xff] %vm14445_vm12, %v8829_v16  ;;  %vm14447_vm2 = vmmov %vm14446_vm1  ;;  %v8851_v1 = vadd.f32 %v8819_v3, %v14225_v46  ;;  %v8852_v53 = vadd.f32 %v8820_v37, %v14230_v18  ;;  %v8853_v40 = vadd.f32 %v8821_v48, %v14235_v45  ;;  %v14462_v33 = vld [vmem:[#allocation10_spill] sm:$0xff]  ;;  %v14463_v5 = vld [vmem:[#allocation7_spill] sm:$0xff] }
 0x907   : > { %8862 = vst.msk [vmem:[#allocation3 + $0x30] sm:$0xff] %vm14446_vm1, %v8830_v19  ;;  %vm14448_vm3 = vmmov %vm14446_vm1  ;;  %v8854_v2 = vadd.f32 %v8822_v12, %v14462_v33  ;;  %v8855_v25 = vadd.f32 %v8823_v15, %v14463_v5 }
 0x908   : > { %8863 = vst.msk [vmem:[#allocation3 + $0x38] sm:$0xff] %vm14447_vm2, %v8831_v7  ;;  %vm14449_vm13 = vmmov %vm14446_vm1  ;;  %v8892_v11 = vld [vmem:[#allocation3] sm:$0xff] (!%p9650_p8) }
 0x909   : > { %8864 = vst.msk [vmem:[#allocation3 + $0x40] sm:$0xff] %vm14448_vm3, %v8832_v43  ;;  %vm14450_vm8 = vmmov %vm14446_vm1  ;;  %v8893_v58 = vld [vmem:[#allocation3 + $0x8] sm:$0xff] (!%p9650_p8)  ;;  %v9687_v27 = vpack.c.bf16 (!%p9650_p8), %v8892_v11, %v8892_v11 }
 0x90a   : > { %8865 = vst.msk [vmem:[#allocation3 + $0x48] sm:$0xff] %vm14449_vm13, %v8833_v34  ;;  %vm14451_vm5 = vmmov %vm14446_vm1  ;;  %v8894_v10 = vld [vmem:[#allocation3 + $0x10] sm:$0xff] (!%p9650_p8)  ;;  %v9688_v59 = vpack.c.bf16 (!%p9650_p8), %v8893_v58, %v8893_v58 }
 0x90b   : > { %8866 = vst.msk [vmem:[#allocation3 + $0x50] sm:$0xff] %vm14450_vm8, %v8834_v41  ;;  %vm14452_vm14 = vmmov %vm14446_vm1  ;;  %v9689_v39 = vpack.c.bf16 (!%p9650_p8), %v8894_v10, %v8894_v10  ;;  %v8895_v31 = vld [vmem:[#allocation3 + $0x18] sm:$0xff] (!%p9650_p8) }
 0x90c   : > { %8867 = vst.msk [vmem:[#allocation3 + $0x58] sm:$0xff] %vm14451_vm5, %v8835_v36  ;;  %vm14453_vm15 = vmmov %vm14446_vm1  ;;  %v8896_v46 = vld [vmem:[#allocation3 + $0x20] sm:$0xff] (!%p9650_p8)  ;;  %v9690_v45 = vpack.c.bf16 (!%p9650_p8), %v8895_v31, %v8895_v31 }
 0x90d   : > { %8868 = vst.msk [vmem:[#allocation3 + $0x60] sm:$0xff] %vm14452_vm14, %v8836_v57  ;;  %vm14454_vm0 = vmmov %vm14446_vm1  ;;  %v8897_v18 = vld [vmem:[#allocation3 + $0x28] sm:$0xff] (!%p9650_p8)  ;;  %v9691_v55 = vpack.c.bf16 (!%p9650_p8), %v8896_v46, %v8896_v46 }
 0x90e   : > { %8869 = vst.msk [vmem:[#allocation3 + $0x68] sm:$0xff] %vm14453_vm15, %v8837_v60  ;;  %vm14455_vm10 = vmmov %vm14454_vm0  ;;  %v9692_v22 = vpack.c.bf16 (!%p9650_p8), %v8897_v18, %v8897_v18  ;;  %v8898_v24 = vld [vmem:[#allocation3 + $0x30] sm:$0xff] (!%p9650_p8) }
 0x90f   : > { %8870 = vst.msk [vmem:[#allocation3 + $0x70] sm:$0xff] %vm14454_vm0, %v8838_v29  ;;  %vm14456_vm4 = vmmov %vm14454_vm0  ;;  %v8899_v34 = vld [vmem:[#allocation3 + $0x38] sm:$0xff] (!%p9650_p8)  ;;  %v9693_v42 = vpack.c.bf16 (!%p9650_p8), %v8898_v24, %v8898_v24 }
 0x910   : > { %8871 = vst.msk [vmem:[#allocation3 + $0x78] sm:$0xff] %vm14455_vm10, %v8839_v35  ;;  %vm14457_vm6 = vmmov %vm14454_vm0  ;;  %v8900_v43 = vld [vmem:[#allocation3 + $0x40] sm:$0xff] (!%p9650_p8)  ;;  %v9694_v20 = vpack.c.bf16 (!%p9650_p8), %v8899_v34, %v8899_v34 }
 0x911   : > { %8872 = vst.msk [vmem:[#allocation3 + $0x80] sm:$0xff] %vm14456_vm4, %v8840_v30  ;;  %vm14458_vm7 = vmmov %vm14454_vm0  ;;  %vm9052_vm4 = vcmask (!%p9650_p8), 125952   ;;  %v9695_v50 = vpack.c.bf16 (!%p9650_p8), %v8900_v43, %v8900_v43  ;;  %v8901_v0 = vld [vmem:[#allocation3 + $0x48] sm:$0xff] (!%p9650_p8) }
 0x912   : > { %8873 = vst.msk [vmem:[#allocation3 + $0x88] sm:$0xff] %vm14457_vm6, %v8841_v4  ;;  %vm14459_vm9 = vmmov %vm14454_vm0  ;;  %v8902_v32 = vld [vmem:[#allocation3 + $0x50] sm:$0xff] (!%p9650_p8)  ;;  %v9696_v63 = vpack.c.bf16 (!%p9650_p8), %v8901_v0, %v8901_v0 }
 0x913   : > { %8874 = vst.msk [vmem:[#allocation3 + $0x90] sm:$0xff] %vm14458_vm7, %v8842_v17  ;;  %vm14460_vm11 = vmmov %vm14454_vm0  ;;  %v8903_v62 = vld [vmem:[#allocation3 + $0x58] sm:$0xff] (!%p9650_p8)  ;;  %v9697_v8 = vpack.c.bf16 (!%p9650_p8), %v8902_v32, %v8902_v32 }
 0x914   : > { %8875 = vst.msk [vmem:[#allocation3 + $0x98] sm:$0xff] %vm14459_vm9, %v8843_v13  ;;  %vm14461_vm12 = vmmov %vm14454_vm0  ;;  %v9698_v52 = vpack.c.bf16 (!%p9650_p8), %v8903_v62, %v8903_v62  ;;  %v8904_v9 = vld [vmem:[#allocation3 + $0x60] sm:$0xff] (!%p9650_p8) }
 0x915   : > { %8876 = vst.msk [vmem:[#allocation3 + $0xa0] sm:$0xff] %vm14460_vm11, %v8844_v56  ;;  %vm14464_vm1 = vmmov %vm14454_vm0  ;;  %v8905_v14 = vld [vmem:[#allocation3 + $0x68] sm:$0xff] (!%p9650_p8)  ;;  %v9699_v49 = vpack.c.bf16 (!%p9650_p8), %v8904_v9, %v8904_v9 }
 0x916   : > { %8877 = vst.msk [vmem:[#allocation3 + $0xa8] sm:$0xff] %vm14461_vm12, %v8845_v21  ;;  %vm14465_vm2 = vmmov %vm14454_vm0  ;;  %v8906_v16 = vld [vmem:[#allocation3 + $0x70] sm:$0xff] (!%p9650_p8)  ;;  %v9700_v26 = vpack.c.bf16 (!%p9650_p8), %v8905_v14, %v8905_v14 }
 0x917   : > { %8878 = vst.msk [vmem:[#allocation3 + $0xb0] sm:$0xff] %vm14464_vm1, %v8846_v47  ;;  %vm14466_vm3 = vmmov %vm14454_vm0  ;;  %v9701_v54 = vpack.c.bf16 (!%p9650_p8), %v8906_v16, %v8906_v16  ;;  %v8907_v19 = vld [vmem:[#allocation3 + $0x78] sm:$0xff] (!%p9650_p8) }
 0x918   : > { %8879 = vst.msk [vmem:[#allocation3 + $0xb8] sm:$0xff] %vm14465_vm2, %v8847_v23  ;;  %vm14467_vm13 = vmmov %vm14454_vm0  ;;  %v8908_v7 = vld [vmem:[#allocation3 + $0x80] sm:$0xff] (!%p9650_p8)  ;;  %v9702_v28 = vpack.c.bf16 (!%p9650_p8), %v8907_v19, %v8907_v19 }
 0x919   : > { %8880 = vst.msk [vmem:[#allocation3 + $0xc0] sm:$0xff] %vm14466_vm3, %v8848_v51  ;;  %vm14468_vm8 = vmmov %vm14454_vm0  ;;  %v8909_v6 = vld [vmem:[#allocation3 + $0x88] sm:$0xff] (!%p9650_p8)  ;;  %v9703_v44 = vpack.c.bf16 (!%p9650_p8), %v8908_v7, %v8908_v7 }
 0x91a   : > { %8881 = vst.msk [vmem:[#allocation3 + $0xc8] sm:$0xff] %vm14467_vm13, %v8849_v61  ;;  %vm14469_vm5 = vmmov %vm14454_vm0  ;;  %8891 = sbr.rel (%p9650_p8) target bundleno = 2353 (0x931), region = 56  ;;  %v9704_v41 = vpack.c.bf16 (!%p9650_p8), %v8909_v6, %v8909_v6  ;;  %v8910_v36 = vld [vmem:[#allocation3 + $0x90] sm:$0xff] (!%p9650_p8) }
 0x91b   : > { %8882 = vst.msk [vmem:[#allocation3 + $0xd0] sm:$0xff] %vm14468_vm8, %v8850_v38  ;;  %vm14470_vm14 = vmmov %vm14454_vm0  ;;  %v8911_v57 = vld [vmem:[#allocation3 + $0x98] sm:$0xff] (!%p9650_p8)  ;;  %v9705_v3 = vpack.c.bf16 (!%p9650_p8), %v8910_v36, %v8910_v36 }
 0x91c   : > { %8883 = vst.msk [vmem:[#allocation3 + $0xd8] sm:$0xff] %vm14469_vm5, %v8851_v1  ;;  %vm14471_vm15 = vmmov %vm14454_vm0  ;;  %v8912_v60 = vld [vmem:[#allocation3 + $0xa0] sm:$0xff] (!%p9650_p8)  ;;  %v9706_v37 = vpack.c.bf16 (!%p9650_p8), %v8911_v57, %v8911_v57 }
 0x91d   : > { %8884 = vst.msk [vmem:[#allocation3 + $0xe0] sm:$0xff] %vm14470_vm14, %v8852_v53  ;;  %vm14472_vm10 = vmmov %vm14454_vm0  ;;  %v9707_v48 = vpack.c.bf16 (!%p9650_p8), %v8912_v60, %v8912_v60  ;;  %v8913_v29 = vld [vmem:[#allocation3 + $0xa8] sm:$0xff] (!%p9650_p8) }
 0x91e   : > { %8885 = vst.msk [vmem:[#allocation3 + $0xe8] sm:$0xff] %vm14471_vm15, %v8853_v40  ;;  %v8914_v35 = vld [vmem:[#allocation3 + $0xb0] sm:$0xff] (!%p9650_p8)  ;;  %v9708_v4 = vpack.c.bf16 (!%p9650_p8), %v8913_v29, %v8913_v29 }
 0x91f   : > { %8886 = vst.msk [vmem:[#allocation3 + $0xf0] sm:$0xff] %vm14454_vm0, %v8854_v2  ;;  %v8915_v30 = vld [vmem:[#allocation3 + $0xb8] sm:$0xff] (!%p9650_p8)  ;;  %v9709_v12 = vpack.c.bf16 (!%p9650_p8), %v8914_v35, %v8914_v35 }
 0x920   : > { %8887 = vst.msk [vmem:[#allocation3 + $0xf8] sm:$0xff] %vm14472_vm10, %v8855_v25  ;;  %v9710_v15 = vpack.c.bf16 (!%p9650_p8), %v8915_v30, %v8915_v30  ;;  %v8916_v17 = vld [vmem:[#allocation3 + $0xc0] sm:$0xff] (!%p9650_p8) }
 0x921   : > { %9053 = vst.msk [vmem:[%s12075_s17] sm:$0xf] %vm9052_vm4, %v9687_v27  ;;  %9054 = vst.msk [vmem:[%s12075_s17 + $0x4] sm:$0xf] %vm9052_vm4, %v9688_v59  ;;  %v8917_v13 = vld [vmem:[#allocation3 + $0xc8] sm:$0xff]  ;;  %v9711_v21 = vpack.c.bf16 %v8916_v17, %v8916_v17 }
 0x922   : > { %9055 = vst.msk [vmem:[%s12075_s17 + $0x8] sm:$0xf] %vm9052_vm4, %v9689_v39  ;;  %9056 = vst.msk [vmem:[%s12075_s17 + $0xc] sm:$0xf] %vm9052_vm4, %v9690_v45  ;;  %v8918_v56 = vld [vmem:[#allocation3 + $0xd0] sm:$0xff]  ;;  %v9712_v47 = vpack.c.bf16 %v8917_v13, %v8917_v13 }
 0x923   : > { %9057 = vst.msk [vmem:[%s12075_s17 + $0x10] sm:$0xf] %vm9052_vm4, %v9691_v55  ;;  %9058 = vst.msk [vmem:[%s12075_s17 + $0x14] sm:$0xf] %vm9052_vm4, %v9692_v22  ;;  %v9713_v23 = vpack.c.bf16 %v8918_v56, %v8918_v56  ;;  %v8919_v51 = vld [vmem:[#allocation3 + $0xd8] sm:$0xff] }
 0x924   : > { %9059 = vst.msk [vmem:[%s12075_s17 + $0x18] sm:$0xf] %vm9052_vm4, %v9693_v42  ;;  %9060 = vst.msk [vmem:[%s12075_s17 + $0x1c] sm:$0xf] %vm9052_vm4, %v9694_v20  ;;  %v8920_v61 = vld [vmem:[#allocation3 + $0xe0] sm:$0xff]  ;;  %v9714_v1 = vpack.c.bf16 %v8919_v51, %v8919_v51 }
 0x925   : > { %9061 = vst.msk [vmem:[%s12075_s17 + $0x20] sm:$0xf] %vm9052_vm4, %v9695_v50  ;;  %9062 = vst.msk [vmem:[%s12075_s17 + $0x24] sm:$0xf] %vm9052_vm4, %v9696_v63  ;;  %v8921_v38 = vld [vmem:[#allocation3 + $0xe8] sm:$0xff]  ;;  %v9715_v53 = vpack.c.bf16 %v8920_v61, %v8920_v61 }
 0x926   : > { %9063 = vst.msk [vmem:[%s12075_s17 + $0x28] sm:$0xf] %vm9052_vm4, %v9697_v8  ;;  %9064 = vst.msk [vmem:[%s12075_s17 + $0x2c] sm:$0xf] %vm9052_vm4, %v9698_v52  ;;  %v9716_v40 = vpack.c.bf16 %v8921_v38, %v8921_v38  ;;  %v8922_v33 = vld [vmem:[#allocation3 + $0xf0] sm:$0xff] }
 0x927   : > { %9065 = vst.msk [vmem:[%s12075_s17 + $0x30] sm:$0xf] %vm9052_vm4, %v9699_v49  ;;  %9066 = vst.msk [vmem:[%s12075_s17 + $0x34] sm:$0xf] %vm9052_vm4, %v9700_v26  ;;  %v8923_v2 = vld [vmem:[#allocation3 + $0xf8] sm:$0xff]  ;;  %v9717_v5 = vpack.c.bf16 %v8922_v33, %v8922_v33 }
 0x928   : > { %9067 = vst.msk [vmem:[%s12075_s17 + $0x38] sm:$0xf] %vm9052_vm4, %v9701_v54  ;;  %9068 = vst.msk [vmem:[%s12075_s17 + $0x3c] sm:$0xf] %vm9052_vm4, %v9702_v28  ;;  %v9718_v25 = vpack.c.bf16 %v8923_v2, %v8923_v2 }
 0x929   : > { %9069 = vst.msk [vmem:[%s12075_s17 + $0x40] sm:$0xf] %vm9052_vm4, %v9703_v44  ;;  %9070 = vst.msk [vmem:[%s12075_s17 + $0x44] sm:$0xf] %vm9052_vm4, %v9704_v41 }
 0x92a   : > { %9071 = vst.msk [vmem:[%s12075_s17 + $0x48] sm:$0xf] %vm9052_vm4, %v9705_v3  ;;  %9072 = vst.msk [vmem:[%s12075_s17 + $0x4c] sm:$0xf] %vm9052_vm4, %v9706_v37 }
 0x92b   : > { %9073 = vst.msk [vmem:[%s12075_s17 + $0x50] sm:$0xf] %vm9052_vm4, %v9707_v48  ;;  %9074 = vst.msk [vmem:[%s12075_s17 + $0x54] sm:$0xf] %vm9052_vm4, %v9708_v4 }
 0x92c   : > { %9075 = vst.msk [vmem:[%s12075_s17 + $0x58] sm:$0xf] %vm9052_vm4, %v9709_v12  ;;  %9076 = vst.msk [vmem:[%s12075_s17 + $0x5c] sm:$0xf] %vm9052_vm4, %v9710_v15 }
 0x92d   : > { %9077 = vst.msk [vmem:[%s12075_s17 + $0x60] sm:$0xf] %vm9052_vm4, %v9711_v21  ;;  %9078 = vst.msk [vmem:[%s12075_s17 + $0x64] sm:$0xf] %vm9052_vm4, %v9712_v47 }
 0x92e   : > { %9079 = vst.msk [vmem:[%s12075_s17 + $0x68] sm:$0xf] %vm9052_vm4, %v9713_v23  ;;  %9080 = vst.msk [vmem:[%s12075_s17 + $0x6c] sm:$0xf] %vm9052_vm4, %v9714_v1 }
 0x92f   : > { %9081 = vst.msk [vmem:[%s12075_s17 + $0x70] sm:$0xf] %vm9052_vm4, %v9715_v53  ;;  %9082 = vst.msk [vmem:[%s12075_s17 + $0x74] sm:$0xf] %vm9052_vm4, %v9716_v40 }
 0x930   : > { %9083 = vst.msk [vmem:[%s12075_s17 + $0x78] sm:$0xf] %vm9052_vm4, %v9717_v5  ;;  %9084 = vst.msk [vmem:[%s12075_s17 + $0x7c] sm:$0xf] %vm9052_vm4, %v9718_v25 }
 0x931 PF: > { %s17_s28 = sadd.s32 1, %s11987_s28   ;;  %s14473_s24 = smov %s11979_s26 }
 0x932   : > { %p14_p9 = scmp.ge.s32.totalorder %s17_s28, 6   ;;  %s14474_s25 = smov %s11983_s27 }
 0x933   : > { %s14475_s26 = smov %s14478_s29  ;;  %s14476_s27 = smov %s14482_s30 }
 0x934   :  { %16 = sbr.rel (!%p14_p9) target bundleno = 3 (0x3), region = 122 }

</bundles_post_ra>
